<compile_context>
chip_gen: v6e
topology: v6e:2x2x1
jax: 0.10.0
libtpu: 0.0.40
codegen_flags: <defaults>
</compile_context>

<pallas_src>
import functools

import jax
import jax.numpy as jnp
from jax import lax
from jax.experimental import pallas as pl
from jax.experimental.pallas import tpu as pltpu


def _round_up(x, m):
    return (x + m - 1) // m * m


def down_kernel(x_ref, w1_ref, s1_ref, b1_ref, w2_ref, s2_ref, b2_ref,
                o_ref, pad1, pad2, patches):
    """One grid step processes NB batch elements.

    x_ref   : (NB, H, W, Cin) f32      input images (NHWC)
    w1_ref  : (9*CP, CP)  bf16         conv1 weights, row = tap*CP + cin (zero padded)
    s1_ref  : (1, CP)     f32          fused BN1 scale (zero padded)
    b1_ref  : (1, CP)     f32          fused BN1 shift (conv bias folded, zero padded)
    w2_ref  : (9*CP, CP)  bf16         conv2 weights
    s2_ref  : (1, CP)     f32          fused BN2 scale
    b2_ref  : (1, CP)     f32          fused BN2 shift
    o_ref   : (NB, Hp, Wp, CP) f32     output tile (lane-dense, padded channels)
    pad1    : VMEM (NB, Hp+2, Wp+2, CP) f32   zero-padded pooled activations
    pad2    : VMEM (NB, Hp+2, Wp+2, CP) f32   zero-padded hidden activations
    patches : VMEM (NB*Hp*Wp, 9*CP) bf16      shared im2col buffer (fully rewritten per use)
    """
    NB, H, W, Cin = x_ref.shape
    Hp, Wp = H // 2, W // 2
    CP = s1_ref.shape[1]          # lane-padded channel count
    M = NB * Hp * Wp              # matmul M dimension

    # ---- 2x2 max pool, stride 2: max of four strided reads (no VMEM bounce)
    p00 = x_ref[:, pl.ds(0, Hp, 2), pl.ds(0, Wp, 2), :]
    p01 = x_ref[:, pl.ds(0, Hp, 2), pl.ds(1, Wp, 2), :]
    p10 = x_ref[:, pl.ds(1, Hp, 2), pl.ds(0, Wp, 2), :]
    p11 = x_ref[:, pl.ds(1, Hp, 2), pl.ds(1, Wp, 2), :]
    pooled = jnp.maximum(jnp.maximum(p00, p01), jnp.maximum(p10, p11))

    # ---- conv1 (3x3, pad=1): im2col -> single bf16 matmul + fused BN + ReLU
    # pad1 is fully zeroed every step: both the 1-px border AND the padded
    # channel lanes [Cin:CP) must be well-defined zeros (stale VMEM could hold
    # NaN/Inf, and NaN * 0-weight still poisons the MXU accumulator).  This
    # also keeps the kernel state-free per step so the batch axis can be
    # "parallel" across TensorCores.
    pad1[...] = jnp.zeros_like(pad1)
    pad1[:, 1:Hp + 1, 1:Wp + 1, 0:Cin] = pooled

    k = 0
    for dh in range(3):
        for dw in range(3):
            # lane-tile-aligned chunk store: tap k occupies lanes [k*CP, (k+1)*CP)
            win = pad1[:, dh:dh + Hp, dw:dw + Wp, :]
            patches[:, k * CP:(k + 1) * CP] = (
                win.reshape(M, CP).astype(jnp.bfloat16))
            k += 1
    acc1 = jnp.dot(patches[...], w1_ref[...],
                   preferred_element_type=jnp.float32)
    h1 = jnp.maximum(acc1 * s1_ref[...] + b1_ref[...], 0.0)   # (M, CP)

    # ---- conv2 (3x3, pad=1): im2col -> single bf16 matmul + fused BN + ReLU
    # pad2's interior (all CP lanes) is fully overwritten each step; only the
    # 1-px spatial border needs re-zeroing (cheap: ~2*(Hp+Wp)/Hp/Wp of the
    # interior traffic).
    zrow = jnp.zeros((NB, 1, Wp + 2, CP), jnp.float32)
    zcol = jnp.zeros((NB, Hp + 2, 1, CP), jnp.float32)
    pad2[:, 0:1, :, :] = zrow
    pad2[:, Hp + 1:Hp + 2, :, :] = zrow
    pad2[:, :, 0:1, :] = zcol
    pad2[:, :, Wp + 1:Wp + 2, :] = zcol
    pad2[:, 1:Hp + 1, 1:Wp + 1, :] = h1.reshape(NB, Hp, Wp, CP)

    k = 0
    for dh in range(3):
        for dw in range(3):
            win = pad2[:, dh:dh + Hp, dw:dw + Wp, :]
            patches[:, k * CP:(k + 1) * CP] = (
                win.reshape(M, CP).astype(jnp.bfloat16))
            k += 1
    acc2 = jnp.dot(patches[...], w2_ref[...],
                   preferred_element_type=jnp.float32)
    h2 = jnp.maximum(acc2 * s2_ref[...] + b2_ref[...], 0.0)   # (M, CP)

    # lane-dense (CP multiple of 128) store
    o_ref[...] = h2.reshape(NB, Hp, Wp, CP).astype(o_ref.dtype)


@functools.partial(jax.jit, static_argnames=("out_channels",))
def down_forward(x_nchw, w1, s1, b1, w2, s2, b2, *, out_channels):
    """x_nchw: (N, Cin, H, W) f32 -> (N, out_channels, H/2, W/2) f32."""
    N, Cin, H, W = x_nchw.shape
    Hp, Wp = H // 2, W // 2
    CP = s1.shape[1]
    KCP = w1.shape[0]

    # Batch block: raise matmul M (= NB*Hp*Wp) toward >=128 at small spatial
    # sizes while keeping >1 grid steps when the batch allows it.
    NB = 2 if N % 2 == 0 else 1
    M = NB * Hp * Wp

    # NCHW -> NHWC (channels on the lane axis inside the kernel).
    x = jnp.transpose(x_nchw, (0, 2, 3, 1))

    flops = 2 * 2 * N * Hp * Wp * KCP * CP          # two padded im2col matmuls
    bytes_accessed = (x.size * 4                     # input read
                      + N * Hp * Wp * CP * 4         # output write
                      + (w1.size + w2.size) * 2      # bf16 weights
                      + (s1.size + b1.size + s2.size + b2.size) * 4)

    out_nhwc = pl.pallas_call(
        down_kernel,
        out_shape=jax.ShapeDtypeStruct((N, Hp, Wp, CP), jnp.float32),
        grid_spec=pltpu.PrefetchScalarGridSpec(
            num_scalar_prefetch=0,
            grid=(N // NB,),
            in_specs=[
                pl.BlockSpec((NB, H, W, Cin), lambda n: (n, 0, 0, 0)),
                pl.BlockSpec((KCP, CP), lambda n: (0, 0)),
                pl.BlockSpec((1, CP), lambda n: (0, 0)),
                pl.BlockSpec((1, CP), lambda n: (0, 0)),
                pl.BlockSpec((KCP, CP), lambda n: (0, 0)),
                pl.BlockSpec((1, CP), lambda n: (0, 0)),
                pl.BlockSpec((1, CP), lambda n: (0, 0)),
            ],
            out_specs=pl.BlockSpec((NB, Hp, Wp, CP),
                                   lambda n: (n, 0, 0, 0)),
            scratch_shapes=[
                pltpu.VMEM((NB, Hp + 2, Wp + 2, CP), jnp.float32),  # pad1
                pltpu.VMEM((NB, Hp + 2, Wp + 2, CP), jnp.float32),  # pad2
                pltpu.VMEM((M, 9 * CP), jnp.bfloat16),              # im2col
            ],
        ),
        compiler_params=pltpu.CompilerParams(
            # Per-step scratch zeroing -> no cross-step state -> safe to shard
            # the batch axis across TensorCores on multi-core parts (v7x).
            dimension_semantics=("parallel",),
            vmem_limit_bytes=32 * 1024 * 1024,
        ),
        cost_estimate=pl.CostEstimate(flops=flops, transcendentals=0,
                                      bytes_accessed=bytes_accessed),
    )(x, w1, s1, b1, w2, s2, b2)

    out = out_nhwc[..., :out_channels]           # drop channel padding
    return jnp.transpose(out, (0, 3, 1, 2))      # NHWC -> NCHW


def make_params(key, in_c, out_c, eps=1e-5):
    """Deterministic parameters matching nn.Conv2d / nn.BatchNorm2d shapes,
    packed into the kernel's lane-padded bf16 im2col layout."""
    mid_c = out_c  # double_conv default: mid_channels = out_c
    cp = _round_up(max(in_c, mid_c, out_c, 128), 128)

    k1, k2, k3, k4 = jax.random.split(key, 4)
    cw1 = 0.1 * jax.random.normal(k1, (mid_c, in_c, 3, 3), jnp.float32)
    cb1 = 0.1 * jax.random.normal(k2, (mid_c,), jnp.float32)
    cw2 = 0.1 * jax.random.normal(k3, (out_c, mid_c, 3, 3), jnp.float32)
    cb2 = 0.1 * jax.random.normal(k4, (out_c,), jnp.float32)

    # fresh nn.BatchNorm2d state: gamma=1, beta=0, running_mean=0, running_var=1
    def fold_bn(gamma, beta, mean, var, bias):
        scale = gamma / jnp.sqrt(var + eps)
        shift = beta + scale * (bias - mean)
        return scale, shift

    g1 = jnp.ones((mid_c,), jnp.float32); be1 = jnp.zeros((mid_c,), jnp.float32)
    m1 = jnp.zeros((mid_c,), jnp.float32); v1 = jnp.ones((mid_c,), jnp.float32)
    g2 = jnp.ones((out_c,), jnp.float32); be2 = jnp.zeros((out_c,), jnp.float32)
    m2 = jnp.zeros((out_c,), jnp.float32); v2 = jnp.ones((out_c,), jnp.float32)
    scale1, shift1 = fold_bn(g1, be1, m1, v1, cb1)
    scale2, shift2 = fold_bn(g2, be2, m2, v2, cb2)

    def pack_w(w_oihw, cin_p, cout_p):
        # PyTorch (O, I, 3, 3) -> (9, I, O) -> zero-pad -> (9*cin_p, cout_p) bf16
        o, i, kh, kw = w_oihw.shape
        w = jnp.transpose(w_oihw, (2, 3, 1, 0)).reshape(kh * kw, i, o)
        w = jnp.pad(w, ((0, 0), (0, cin_p - i), (0, cout_p - o)))
        return w.reshape(kh * kw * cin_p, cout_p).astype(jnp.bfloat16)

    def pack_v(v, cp_):
        return jnp.pad(v, (0, cp_ - v.shape[0])).reshape(1, cp_).astype(jnp.float32)

    params = (pack_w(cw1, cp, cp), pack_v(scale1, cp), pack_v(shift1, cp),
              pack_w(cw2, cp, cp), pack_v(scale2, cp), pack_v(shift2, cp))
    raw = (cw1, scale1, shift1, cw2, scale2, shift2)
    return params, raw


def reference_forward(x_nchw, raw):
    """Pure-JAX (XLA) reference in NCHW mirroring the PyTorch graph, with the
    same bf16-operand / f32-accumulation matmul precision as the kernel."""
    cw1, scale1, shift1, cw2, scale2, shift2 = raw
    dn = ("NCHW", "OIHW", "NCHW")

    pool = lax.reduce_window(x_nchw, -jnp.inf, lax.max,
                             (1, 1, 2, 2), (1, 1, 2, 2), "VALID")
    y = lax.conv_general_dilated(pool.astype(jnp.bfloat16),
                                 cw1.astype(jnp.bfloat16),
                                 (1, 1), "SAME", dimension_numbers=dn,
                                 preferred_element_type=jnp.float32)
    y = jnp.maximum(y * scale1[None, :, None, None]
                    + shift1[None, :, None, None], 0.0)
    z = lax.conv_general_dilated(y.astype(jnp.bfloat16),
                                 cw2.astype(jnp.bfloat16),
                                 (1, 1), "SAME", dimension_numbers=dn,
                                 preferred_element_type=jnp.float32)
    z = jnp.maximum(z * scale2[None, :, None, None]
                    + shift2[None, :, None, None], 0.0)
    return z


if __name__ == "__main__":
    N, Cin, H, W = 2, 4, 16, 16
    Cout = 8  # "doubling channels"

    key = jax.random.PRNGKey(0)
    kx, kp = jax.random.split(key)
    x = jax.random.normal(kx, (N, Cin, H, W), jnp.float32)

    params, raw = make_params(kp, Cin, Cout)

    out = jax.block_until_ready(down_forward(x, *params, out_channels=Cout))
    ref = jax.block_until_ready(reference_forward(x, raw))

    assert out.shape == (N, Cout, H // 2, W // 2), out.shape
    max_err = float(jnp.max(jnp.abs(out - ref)))
    assert max_err < 2e-2, max_err

    print("KERNEL_OK")
</pallas_src>

<mosaic_0001>
module attributes {stable_mosaic.version = 11 : i64} {
  func.func @down_kernel(%arg0: i32, %arg1: memref<2x16x16x4xf32, #tpu.memory_space<vmem>>, %arg2: memref<1152x128xbf16, #tpu.memory_space<vmem>>, %arg3: memref<1x128xf32, #tpu.memory_space<vmem>>, %arg4: memref<1x128xf32, #tpu.memory_space<vmem>>, %arg5: memref<1152x128xbf16, #tpu.memory_space<vmem>>, %arg6: memref<1x128xf32, #tpu.memory_space<vmem>>, %arg7: memref<1x128xf32, #tpu.memory_space<vmem>>, %arg8: memref<2x8x8x128xf32, #tpu.memory_space<vmem>>, %arg9: memref<2x10x10x128xf32, #tpu.memory_space<vmem>>, %arg10: memref<2x10x10x128xf32, #tpu.memory_space<vmem>>, %arg11: memref<128x1152xbf16, #tpu.memory_space<vmem>>) attributes {dimension_semantics = [#tpu.dimension_semantics<parallel>], iteration_bounds = array<i64: 1>, scalar_prefetch = 0 : i64, scratch_operands = 3 : i64, tpu.core_type = #tpu.core_type<tc>, window_params = [{transform_indices = @transform_0, window_bounds = array<i64: 2, 16, 16, 4>}, {pipeline_mode = #tpu.pipeline_mode<synchronous>, transform_indices = @transform_1, window_bounds = array<i64: 1152, 128>}, {pipeline_mode = #tpu.pipeline_mode<synchronous>, transform_indices = @transform_2, window_bounds = array<i64: 1, 128>}, {pipeline_mode = #tpu.pipeline_mode<synchronous>, transform_indices = @transform_3, window_bounds = array<i64: 1, 128>}, {pipeline_mode = #tpu.pipeline_mode<synchronous>, transform_indices = @transform_4, window_bounds = array<i64: 1152, 128>}, {pipeline_mode = #tpu.pipeline_mode<synchronous>, transform_indices = @transform_5, window_bounds = array<i64: 1, 128>}, {pipeline_mode = #tpu.pipeline_mode<synchronous>, transform_indices = @transform_6, window_bounds = array<i64: 1, 128>}, {transform_indices = @transform_7, window_bounds = array<i64: 2, 8, 8, 128>}]} {
    %c0 = arith.constant 0 : index
    %c0_0 = arith.constant 0 : index
    %c0_1 = arith.constant 0 : index
    %c0_2 = arith.constant 0 : index
    %0 = tpu.strided_load %arg1[%c0, %c0_0, %c0_1, %c0_2] {strides = array<i32: 1, 2, 2, 1>} : memref<2x16x16x4xf32, #tpu.memory_space<vmem>>, vector<2x8x8x4xf32>
    %c0_3 = arith.constant 0 : index
    %c0_4 = arith.constant 0 : index
    %c1 = arith.constant 1 : index
    %c0_5 = arith.constant 0 : index
    %1 = tpu.strided_load %arg1[%c0_3, %c0_4, %c1, %c0_5] {strides = array<i32: 1, 2, 2, 1>} : memref<2x16x16x4xf32, #tpu.memory_space<vmem>>, vector<2x8x8x4xf32>
    %c0_6 = arith.constant 0 : index
    %c1_7 = arith.constant 1 : index
    %c0_8 = arith.constant 0 : index
    %c0_9 = arith.constant 0 : index
    %2 = tpu.strided_load %arg1[%c0_6, %c1_7, %c0_8, %c0_9] {strides = array<i32: 1, 2, 2, 1>} : memref<2x16x16x4xf32, #tpu.memory_space<vmem>>, vector<2x8x8x4xf32>
    %c0_10 = arith.constant 0 : index
    %c1_11 = arith.constant 1 : index
    %c1_12 = arith.constant 1 : index
    %c0_13 = arith.constant 0 : index
    %3 = tpu.strided_load %arg1[%c0_10, %c1_11, %c1_12, %c0_13] {strides = array<i32: 1, 2, 2, 1>} : memref<2x16x16x4xf32, #tpu.memory_space<vmem>>, vector<2x8x8x4xf32>
    %4 = arith.maximumf %0, %1 : vector<2x8x8x4xf32>
    %5 = arith.maximumf %2, %3 : vector<2x8x8x4xf32>
    %6 = arith.maximumf %4, %5 : vector<2x8x8x4xf32>
    %cst = arith.constant 0.000000e+00 : f32
    %7 = vector.broadcast %cst : f32 to vector<2x10x10x128xf32>
    %c0_14 = arith.constant 0 : index
    %c0_15 = arith.constant 0 : index
    %c0_16 = arith.constant 0 : index
    %c0_17 = arith.constant 0 : index
    %8 = vector.load %arg9[%c0_14, %c0_15, %c0_16, %c0_17] : memref<2x10x10x128xf32, #tpu.memory_space<vmem>>, vector<2x10x10x128xf32>
    tpu.vector_store %arg9[%c0_14, %c0_15, %c0_16, %c0_17], %7 {strides = array<i32>} : memref<2x10x10x128xf32, #tpu.memory_space<vmem>>, vector<2x10x10x128xf32>,
    %c0_18 = arith.constant 0 : index
    %c1_19 = arith.constant 1 : index
    %c1_20 = arith.constant 1 : index
    %c0_21 = arith.constant 0 : index
    %9 = vector.load %arg9[%c0_18, %c1_19, %c1_20, %c0_21] : memref<2x10x10x128xf32, #tpu.memory_space<vmem>>, vector<2x8x8x4xf32>
    tpu.vector_store %arg9[%c0_18, %c1_19, %c1_20, %c0_21], %6 {strides = array<i32>} : memref<2x10x10x128xf32, #tpu.memory_space<vmem>>, vector<2x8x8x4xf32>,
    %c0_22 = arith.constant 0 : index
    %c0_23 = arith.constant 0 : index
    %c0_24 = arith.constant 0 : index
    %c0_25 = arith.constant 0 : index
    %10 = vector.load %arg9[%c0_22, %c0_23, %c0_24, %c0_25] : memref<2x10x10x128xf32, #tpu.memory_space<vmem>>, vector<2x8x8x128xf32>
    %11 = vector.shape_cast %10 : vector<2x8x8x128xf32> to vector<128x128xf32>
    %12 = arith.truncf %11 : vector<128x128xf32> to vector<128x128xbf16>
    %c0_26 = arith.constant 0 : index
    %c0_27 = arith.constant 0 : index
    %13 = vector.load %arg11[%c0_26, %c0_27] : memref<128x1152xbf16, #tpu.memory_space<vmem>>, vector<128x128xbf16>
    tpu.vector_store %arg11[%c0_26, %c0_27], %12 {strides = array<i32>} : memref<128x1152xbf16, #tpu.memory_space<vmem>>, vector<128x128xbf16>,
    %c0_28 = arith.constant 0 : index
    %c0_29 = arith.constant 0 : index
    %c1_30 = arith.constant 1 : index
    %c0_31 = arith.constant 0 : index
    %14 = vector.load %arg9[%c0_28, %c0_29, %c1_30, %c0_31] : memref<2x10x10x128xf32, #tpu.memory_space<vmem>>, vector<2x8x8x128xf32>
    %15 = vector.shape_cast %14 : vector<2x8x8x128xf32> to vector<128x128xf32>
    %16 = arith.truncf %15 : vector<128x128xf32> to vector<128x128xbf16>
    %c0_32 = arith.constant 0 : index
    %c128 = arith.constant 128 : index
    %17 = vector.load %arg11[%c0_32, %c128] : memref<128x1152xbf16, #tpu.memory_space<vmem>>, vector<128x128xbf16>
    tpu.vector_store %arg11[%c0_32, %c128], %16 {strides = array<i32>} : memref<128x1152xbf16, #tpu.memory_space<vmem>>, vector<128x128xbf16>,
    %c0_33 = arith.constant 0 : index
    %c0_34 = arith.constant 0 : index
    %c2 = arith.constant 2 : index
    %c0_35 = arith.constant 0 : index
    %18 = vector.load %arg9[%c0_33, %c0_34, %c2, %c0_35] : memref<2x10x10x128xf32, #tpu.memory_space<vmem>>, vector<2x8x8x128xf32>
    %19 = vector.shape_cast %18 : vector<2x8x8x128xf32> to vector<128x128xf32>
    %20 = arith.truncf %19 : vector<128x128xf32> to vector<128x128xbf16>
    %c0_36 = arith.constant 0 : index
    %c256 = arith.constant 256 : index
    %21 = vector.load %arg11[%c0_36, %c256] : memref<128x1152xbf16, #tpu.memory_space<vmem>>, vector<128x128xbf16>
    tpu.vector_store %arg11[%c0_36, %c256], %20 {strides = array<i32>} : memref<128x1152xbf16, #tpu.memory_space<vmem>>, vector<128x128xbf16>,
    %c0_37 = arith.constant 0 : index
    %c1_38 = arith.constant 1 : index
    %c0_39 = arith.constant 0 : index
    %c0_40 = arith.constant 0 : index
    %22 = vector.load %arg9[%c0_37, %c1_38, %c0_39, %c0_40] : memref<2x10x10x128xf32, #tpu.memory_space<vmem>>, vector<2x8x8x128xf32>
    %23 = vector.shape_cast %22 : vector<2x8x8x128xf32> to vector<128x128xf32>
    %24 = arith.truncf %23 : vector<128x128xf32> to vector<128x128xbf16>
    %c0_41 = arith.constant 0 : index
    %c384 = arith.constant 384 : index
    %25 = vector.load %arg11[%c0_41, %c384] : memref<128x1152xbf16, #tpu.memory_space<vmem>>, vector<128x128xbf16>
    tpu.vector_store %arg11[%c0_41, %c384], %24 {strides = array<i32>} : memref<128x1152xbf16, #tpu.memory_space<vmem>>, vector<128x128xbf16>,
    %c0_42 = arith.constant 0 : index
    %c1_43 = arith.constant 1 : index
    %c1_44 = arith.constant 1 : index
    %c0_45 = arith.constant 0 : index
    %26 = vector.load %arg9[%c0_42, %c1_43, %c1_44, %c0_45] : memref<2x10x10x128xf32, #tpu.memory_space<vmem>>, vector<2x8x8x128xf32>
    %27 = vector.shape_cast %26 : vector<2x8x8x128xf32> to vector<128x128xf32>
    %28 = arith.truncf %27 : vector<128x128xf32> to vector<128x128xbf16>
    %c0_46 = arith.constant 0 : index
    %c512 = arith.constant 512 : index
    %29 = vector.load %arg11[%c0_46, %c512] : memref<128x1152xbf16, #tpu.memory_space<vmem>>, vector<128x128xbf16>
    tpu.vector_store %arg11[%c0_46, %c512], %28 {strides = array<i32>} : memref<128x1152xbf16, #tpu.memory_space<vmem>>, vector<128x128xbf16>,
    %c0_47 = arith.constant 0 : index
    %c1_48 = arith.constant 1 : index
    %c2_49 = arith.constant 2 : index
    %c0_50 = arith.constant 0 : index
    %30 = vector.load %arg9[%c0_47, %c1_48, %c2_49, %c0_50] : memref<2x10x10x128xf32, #tpu.memory_space<vmem>>, vector<2x8x8x128xf32>
    %31 = vector.shape_cast %30 : vector<2x8x8x128xf32> to vector<128x128xf32>
    %32 = arith.truncf %31 : vector<128x128xf32> to vector<128x128xbf16>
    %c0_51 = arith.constant 0 : index
    %c640 = arith.constant 640 : index
    %33 = vector.load %arg11[%c0_51, %c640] : memref<128x1152xbf16, #tpu.memory_space<vmem>>, vector<128x128xbf16>
    tpu.vector_store %arg11[%c0_51, %c640], %32 {strides = array<i32>} : memref<128x1152xbf16, #tpu.memory_space<vmem>>, vector<128x128xbf16>,
    %c0_52 = arith.constant 0 : index
    %c2_53 = arith.constant 2 : index
    %c0_54 = arith.constant 0 : index
    %c0_55 = arith.constant 0 : index
    %34 = vector.load %arg9[%c0_52, %c2_53, %c0_54, %c0_55] : memref<2x10x10x128xf32, #tpu.memory_space<vmem>>, vector<2x8x8x128xf32>
    %35 = vector.shape_cast %34 : vector<2x8x8x128xf32> to vector<128x128xf32>
    %36 = arith.truncf %35 : vector<128x128xf32> to vector<128x128xbf16>
    %c0_56 = arith.constant 0 : index
    %c768 = arith.constant 768 : index
    %37 = vector.load %arg11[%c0_56, %c768] : memref<128x1152xbf16, #tpu.memory_space<vmem>>, vector<128x128xbf16>
    tpu.vector_store %arg11[%c0_56, %c768], %36 {strides = array<i32>} : memref<128x1152xbf16, #tpu.memory_space<vmem>>, vector<128x128xbf16>,
    %c0_57 = arith.constant 0 : index
    %c2_58 = arith.constant 2 : index
    %c1_59 = arith.constant 1 : index
    %c0_60 = arith.constant 0 : index
    %38 = vector.load %arg9[%c0_57, %c2_58, %c1_59, %c0_60] : memref<2x10x10x128xf32, #tpu.memory_space<vmem>>, vector<2x8x8x128xf32>
    %39 = vector.shape_cast %38 : vector<2x8x8x128xf32> to vector<128x128xf32>
    %40 = arith.truncf %39 : vector<128x128xf32> to vector<128x128xbf16>
    %c0_61 = arith.constant 0 : index
    %c896 = arith.constant 896 : index
    %41 = vector.load %arg11[%c0_61, %c896] : memref<128x1152xbf16, #tpu.memory_space<vmem>>, vector<128x128xbf16>
    tpu.vector_store %arg11[%c0_61, %c896], %40 {strides = array<i32>} : memref<128x1152xbf16, #tpu.memory_space<vmem>>, vector<128x128xbf16>,
    %c0_62 = arith.constant 0 : index
    %c2_63 = arith.constant 2 : index
    %c2_64 = arith.constant 2 : index
    %c0_65 = arith.constant 0 : index
    %42 = vector.load %arg9[%c0_62, %c2_63, %c2_64, %c0_65] : memref<2x10x10x128xf32, #tpu.memory_space<vmem>>, vector<2x8x8x128xf32>
    %43 = vector.shape_cast %42 : vector<2x8x8x128xf32> to vector<128x128xf32>
    %44 = arith.truncf %43 : vector<128x128xf32> to vector<128x128xbf16>
    %c0_66 = arith.constant 0 : index
    %c1024 = arith.constant 1024 : index
    %45 = vector.load %arg11[%c0_66, %c1024] : memref<128x1152xbf16, #tpu.memory_space<vmem>>, vector<128x128xbf16>
    tpu.vector_store %arg11[%c0_66, %c1024], %44 {strides = array<i32>} : memref<128x1152xbf16, #tpu.memory_space<vmem>>, vector<128x128xbf16>,
    %c0_67 = arith.constant 0 : index
    %c0_68 = arith.constant 0 : index
    %46 = vector.load %arg11[%c0_67, %c0_68] : memref<128x1152xbf16, #tpu.memory_space<vmem>>, vector<128x1152xbf16>
    %c0_69 = arith.constant 0 : index
    %c0_70 = arith.constant 0 : index
    %47 = vector.load %arg2[%c0_69, %c0_70] : memref<1152x128xbf16, #tpu.memory_space<vmem>>, vector<1152x128xbf16>
    %cst_71 = arith.constant dense<0.000000e+00> : vector<128x128xf32>
    %48 = tpu.matmul %46, %47, %cst_71 {dimension_numbers = #tpu.dot_dimension_numbers<[1], [0], [0], [1], [0, 0, 1, 1], [], []>} : vector<128x1152xbf16>, vector<1152x128xbf16>, vector<128x128xf32> -> vector<128x128xf32>
    %c0_72 = arith.constant 0 : index
    %c0_73 = arith.constant 0 : index
    %49 = vector.load %arg3[%c0_72, %c0_73] : memref<1x128xf32, #tpu.memory_space<vmem>>, vector<1x128xf32>
    %50 = vector.broadcast %49 : vector<1x128xf32> to vector<128x128xf32>
    %51 = arith.mulf %48, %50 : vector<128x128xf32>
    %c0_74 = arith.constant 0 : index
    %c0_75 = arith.constant 0 : index
    %52 = vector.load %arg4[%c0_74, %c0_75] : memref<1x128xf32, #tpu.memory_space<vmem>>, vector<1x128xf32>
    %53 = vector.broadcast %52 : vector<1x128xf32> to vector<128x128xf32>
    %54 = arith.addf %51, %53 : vector<128x128xf32>
    %cst_76 = arith.constant 0.000000e+00 : f32
    %55 = vector.broadcast %cst_76 : f32 to vector<128x128xf32>
    %56 = arith.maximumf %54, %55 : vector<128x128xf32>
    %cst_77 = arith.constant 0.000000e+00 : f32
    %57 = vector.broadcast %cst_77 : f32 to vector<2x1x10x128xf32>
    %cst_78 = arith.constant 0.000000e+00 : f32
    %58 = vector.broadcast %cst_78 : f32 to vector<2x10x1x128xf32>
    %c0_79 = arith.constant 0 : index
    %c0_80 = arith.constant 0 : index
    %c0_81 = arith.constant 0 : index
    %c0_82 = arith.constant 0 : index
    %59 = vector.load %arg10[%c0_79, %c0_80, %c0_81, %c0_82] : memref<2x10x10x128xf32, #tpu.memory_space<vmem>>, vector<2x1x10x128xf32>
    tpu.vector_store %arg10[%c0_79, %c0_80, %c0_81, %c0_82], %57 {strides = array<i32>} : memref<2x10x10x128xf32, #tpu.memory_space<vmem>>, vector<2x1x10x128xf32>,
    %c0_83 = arith.constant 0 : index
    %c9 = arith.constant 9 : index
    %c0_84 = arith.constant 0 : index
    %c0_85 = arith.constant 0 : index
    %60 = vector.load %arg10[%c0_83, %c9, %c0_84, %c0_85] : memref<2x10x10x128xf32, #tpu.memory_space<vmem>>, vector<2x1x10x128xf32>
    tpu.vector_store %arg10[%c0_83, %c9, %c0_84, %c0_85], %57 {strides = array<i32>} : memref<2x10x10x128xf32, #tpu.memory_space<vmem>>, vector<2x1x10x128xf32>,
    %c0_86 = arith.constant 0 : index
    %c0_87 = arith.constant 0 : index
    %c0_88 = arith.constant 0 : index
    %c0_89 = arith.constant 0 : index
    %61 = vector.load %arg10[%c0_86, %c0_87, %c0_88, %c0_89] : memref<2x10x10x128xf32, #tpu.memory_space<vmem>>, vector<2x10x1x128xf32>
    tpu.vector_store %arg10[%c0_86, %c0_87, %c0_88, %c0_89], %58 {strides = array<i32>} : memref<2x10x10x128xf32, #tpu.memory_space<vmem>>, vector<2x10x1x128xf32>,
    %c0_90 = arith.constant 0 : index
    %c0_91 = arith.constant 0 : index
    %c9_92 = arith.constant 9 : index
    %c0_93 = arith.constant 0 : index
    %62 = vector.load %arg10[%c0_90, %c0_91, %c9_92, %c0_93] : memref<2x10x10x128xf32, #tpu.memory_space<vmem>>, vector<2x10x1x128xf32>
    tpu.vector_store %arg10[%c0_90, %c0_91, %c9_92, %c0_93], %58 {strides = array<i32>} : memref<2x10x10x128xf32, #tpu.memory_space<vmem>>, vector<2x10x1x128xf32>,
    %63 = vector.shape_cast %56 : vector<128x128xf32> to vector<2x8x8x128xf32>
    %c0_94 = arith.constant 0 : index
    %c1_95 = arith.constant 1 : index
    %c1_96 = arith.constant 1 : index
    %c0_97 = arith.constant 0 : index
    %64 = vector.load %arg10[%c0_94, %c1_95, %c1_96, %c0_97] : memref<2x10x10x128xf32, #tpu.memory_space<vmem>>, vector<2x8x8x128xf32>
    tpu.vector_store %arg10[%c0_94, %c1_95, %c1_96, %c0_97], %63 {strides = array<i32>} : memref<2x10x10x128xf32, #tpu.memory_space<vmem>>, vector<2x8x8x128xf32>,
    %c0_98 = arith.constant 0 : index
    %c0_99 = arith.constant 0 : index
    %c0_100 = arith.constant 0 : index
    %c0_101 = arith.constant 0 : index
    %65 = vector.load %arg10[%c0_98, %c0_99, %c0_100, %c0_101] : memref<2x10x10x128xf32, #tpu.memory_space<vmem>>, vector<2x8x8x128xf32>
    %66 = vector.shape_cast %65 : vector<2x8x8x128xf32> to vector<128x128xf32>
    %67 = arith.truncf %66 : vector<128x128xf32> to vector<128x128xbf16>
    %c0_102 = arith.constant 0 : index
    %c0_103 = arith.constant 0 : index
    %68 = vector.load %arg11[%c0_102, %c0_103] : memref<128x1152xbf16, #tpu.memory_space<vmem>>, vector<128x128xbf16>
    tpu.vector_store %arg11[%c0_102, %c0_103], %67 {strides = array<i32>} : memref<128x1152xbf16, #tpu.memory_space<vmem>>, vector<128x128xbf16>,
    %c0_104 = arith.constant 0 : index
    %c0_105 = arith.constant 0 : index
    %c1_106 = arith.constant 1 : index
    %c0_107 = arith.constant 0 : index
    %69 = vector.load %arg10[%c0_104, %c0_105, %c1_106, %c0_107] : memref<2x10x10x128xf32, #tpu.memory_space<vmem>>, vector<2x8x8x128xf32>
    %70 = vector.shape_cast %69 : vector<2x8x8x128xf32> to vector<128x128xf32>
    %71 = arith.truncf %70 : vector<128x128xf32> to vector<128x128xbf16>
    %c0_108 = arith.constant 0 : index
    %c128_109 = arith.constant 128 : index
    %72 = vector.load %arg11[%c0_108, %c128_109] : memref<128x1152xbf16, #tpu.memory_space<vmem>>, vector<128x128xbf16>
    tpu.vector_store %arg11[%c0_108, %c128_109], %71 {strides = array<i32>} : memref<128x1152xbf16, #tpu.memory_space<vmem>>, vector<128x128xbf16>,
    %c0_110 = arith.constant 0 : index
    %c0_111 = arith.constant 0 : index
    %c2_112 = arith.constant 2 : index
    %c0_113 = arith.constant 0 : index
    %73 = vector.load %arg10[%c0_110, %c0_111, %c2_112, %c0_113] : memref<2x10x10x128xf32, #tpu.memory_space<vmem>>, vector<2x8x8x128xf32>
    %74 = vector.shape_cast %73 : vector<2x8x8x128xf32> to vector<128x128xf32>
    %75 = arith.truncf %74 : vector<128x128xf32> to vector<128x128xbf16>
    %c0_114 = arith.constant 0 : index
    %c256_115 = arith.constant 256 : index
    %76 = vector.load %arg11[%c0_114, %c256_115] : memref<128x1152xbf16, #tpu.memory_space<vmem>>, vector<128x128xbf16>
    tpu.vector_store %arg11[%c0_114, %c256_115], %75 {strides = array<i32>} : memref<128x1152xbf16, #tpu.memory_space<vmem>>, vector<128x128xbf16>,
    %c0_116 = arith.constant 0 : index
    %c1_117 = arith.constant 1 : index
    %c0_118 = arith.constant 0 : index
    %c0_119 = arith.constant 0 : index
    %77 = vector.load %arg10[%c0_116, %c1_117, %c0_118, %c0_119] : memref<2x10x10x128xf32, #tpu.memory_space<vmem>>, vector<2x8x8x128xf32>
    %78 = vector.shape_cast %77 : vector<2x8x8x128xf32> to vector<128x128xf32>
    %79 = arith.truncf %78 : vector<128x128xf32> to vector<128x128xbf16>
    %c0_120 = arith.constant 0 : index
    %c384_121 = arith.constant 384 : index
    %80 = vector.load %arg11[%c0_120, %c384_121] : memref<128x1152xbf16, #tpu.memory_space<vmem>>, vector<128x128xbf16>
    tpu.vector_store %arg11[%c0_120, %c384_121], %79 {strides = array<i32>} : memref<128x1152xbf16, #tpu.memory_space<vmem>>, vector<128x128xbf16>,
    %c0_122 = arith.constant 0 : index
    %c1_123 = arith.constant 1 : index
    %c1_124 = arith.constant 1 : index
    %c0_125 = arith.constant 0 : index
    %81 = vector.load %arg10[%c0_122, %c1_123, %c1_124, %c0_125] : memref<2x10x10x128xf32, #tpu.memory_space<vmem>>, vector<2x8x8x128xf32>
    %82 = vector.shape_cast %81 : vector<2x8x8x128xf32> to vector<128x128xf32>
    %83 = arith.truncf %82 : vector<128x128xf32> to vector<128x128xbf16>
    %c0_126 = arith.constant 0 : index
    %c512_127 = arith.constant 512 : index
    %84 = vector.load %arg11[%c0_126, %c512_127] : memref<128x1152xbf16, #tpu.memory_space<vmem>>, vector<128x128xbf16>
    tpu.vector_store %arg11[%c0_126, %c512_127], %83 {strides = array<i32>} : memref<128x1152xbf16, #tpu.memory_space<vmem>>, vector<128x128xbf16>,
    %c0_128 = arith.constant 0 : index
    %c1_129 = arith.constant 1 : index
    %c2_130 = arith.constant 2 : index
    %c0_131 = arith.constant 0 : index
    %85 = vector.load %arg10[%c0_128, %c1_129, %c2_130, %c0_131] : memref<2x10x10x128xf32, #tpu.memory_space<vmem>>, vector<2x8x8x128xf32>
    %86 = vector.shape_cast %85 : vector<2x8x8x128xf32> to vector<128x128xf32>
    %87 = arith.truncf %86 : vector<128x128xf32> to vector<128x128xbf16>
    %c0_132 = arith.constant 0 : index
    %c640_133 = arith.constant 640 : index
    %88 = vector.load %arg11[%c0_132, %c640_133] : memref<128x1152xbf16, #tpu.memory_space<vmem>>, vector<128x128xbf16>
    tpu.vector_store %arg11[%c0_132, %c640_133], %87 {strides = array<i32>} : memref<128x1152xbf16, #tpu.memory_space<vmem>>, vector<128x128xbf16>,
    %c0_134 = arith.constant 0 : index
    %c2_135 = arith.constant 2 : index
    %c0_136 = arith.constant 0 : index
    %c0_137 = arith.constant 0 : index
    %89 = vector.load %arg10[%c0_134, %c2_135, %c0_136, %c0_137] : memref<2x10x10x128xf32, #tpu.memory_space<vmem>>, vector<2x8x8x128xf32>
    %90 = vector.shape_cast %89 : vector<2x8x8x128xf32> to vector<128x128xf32>
    %91 = arith.truncf %90 : vector<128x128xf32> to vector<128x128xbf16>
    %c0_138 = arith.constant 0 : index
    %c768_139 = arith.constant 768 : index
    %92 = vector.load %arg11[%c0_138, %c768_139] : memref<128x1152xbf16, #tpu.memory_space<vmem>>, vector<128x128xbf16>
    tpu.vector_store %arg11[%c0_138, %c768_139], %91 {strides = array<i32>} : memref<128x1152xbf16, #tpu.memory_space<vmem>>, vector<128x128xbf16>,
    %c0_140 = arith.constant 0 : index
    %c2_141 = arith.constant 2 : index
    %c1_142 = arith.constant 1 : index
    %c0_143 = arith.constant 0 : index
    %93 = vector.load %arg10[%c0_140, %c2_141, %c1_142, %c0_143] : memref<2x10x10x128xf32, #tpu.memory_space<vmem>>, vector<2x8x8x128xf32>
    %94 = vector.shape_cast %93 : vector<2x8x8x128xf32> to vector<128x128xf32>
    %95 = arith.truncf %94 : vector<128x128xf32> to vector<128x128xbf16>
    %c0_144 = arith.constant 0 : index
    %c896_145 = arith.constant 896 : index
    %96 = vector.load %arg11[%c0_144, %c896_145] : memref<128x1152xbf16, #tpu.memory_space<vmem>>, vector<128x128xbf16>
    tpu.vector_store %arg11[%c0_144, %c896_145], %95 {strides = array<i32>} : memref<128x1152xbf16, #tpu.memory_space<vmem>>, vector<128x128xbf16>,
    %c0_146 = arith.constant 0 : index
    %c2_147 = arith.constant 2 : index
    %c2_148 = arith.constant 2 : index
    %c0_149 = arith.constant 0 : index
    %97 = vector.load %arg10[%c0_146, %c2_147, %c2_148, %c0_149] : memref<2x10x10x128xf32, #tpu.memory_space<vmem>>, vector<2x8x8x128xf32>
    %98 = vector.shape_cast %97 : vector<2x8x8x128xf32> to vector<128x128xf32>
    %99 = arith.truncf %98 : vector<128x128xf32> to vector<128x128xbf16>
    %c0_150 = arith.constant 0 : index
    %c1024_151 = arith.constant 1024 : index
    %100 = vector.load %arg11[%c0_150, %c1024_151] : memref<128x1152xbf16, #tpu.memory_space<vmem>>, vector<128x128xbf16>
    tpu.vector_store %arg11[%c0_150, %c1024_151], %99 {strides = array<i32>} : memref<128x1152xbf16, #tpu.memory_space<vmem>>, vector<128x128xbf16>,
    %c0_152 = arith.constant 0 : index
    %c0_153 = arith.constant 0 : index
    %101 = vector.load %arg11[%c0_152, %c0_153] : memref<128x1152xbf16, #tpu.memory_space<vmem>>, vector<128x1152xbf16>
    %c0_154 = arith.constant 0 : index
    %c0_155 = arith.constant 0 : index
    %102 = vector.load %arg5[%c0_154, %c0_155] : memref<1152x128xbf16, #tpu.memory_space<vmem>>, vector<1152x128xbf16>
    %cst_156 = arith.constant dense<0.000000e+00> : vector<128x128xf32>
    %103 = tpu.matmul %101, %102, %cst_156 {dimension_numbers = #tpu.dot_dimension_numbers<[1], [0], [0], [1], [0, 0, 1, 1], [], []>} : vector<128x1152xbf16>, vector<1152x128xbf16>, vector<128x128xf32> -> vector<128x128xf32>
    %c0_157 = arith.constant 0 : index
    %c0_158 = arith.constant 0 : index
    %104 = vector.load %arg6[%c0_157, %c0_158] : memref<1x128xf32, #tpu.memory_space<vmem>>, vector<1x128xf32>
    %105 = vector.broadcast %104 : vector<1x128xf32> to vector<128x128xf32>
    %106 = arith.mulf %103, %105 : vector<128x128xf32>
    %c0_159 = arith.constant 0 : index
    %c0_160 = arith.constant 0 : index
    %107 = vector.load %arg7[%c0_159, %c0_160] : memref<1x128xf32, #tpu.memory_space<vmem>>, vector<1x128xf32>
    %108 = vector.broadcast %107 : vector<1x128xf32> to vector<128x128xf32>
    %109 = arith.addf %106, %108 : vector<128x128xf32>
    %cst_161 = arith.constant 0.000000e+00 : f32
    %110 = vector.broadcast %cst_161 : f32 to vector<128x128xf32>
    %111 = arith.maximumf %109, %110 : vector<128x128xf32>
    %112 = vector.shape_cast %111 : vector<128x128xf32> to vector<2x8x8x128xf32>
    %c0_162 = arith.constant 0 : index
    %c0_163 = arith.constant 0 : index
    %c0_164 = arith.constant 0 : index
    %c0_165 = arith.constant 0 : index
    %113 = vector.load %arg8[%c0_162, %c0_163, %c0_164, %c0_165] : memref<2x8x8x128xf32, #tpu.memory_space<vmem>>, vector<2x8x8x128xf32>
    tpu.vector_store %arg8[%c0_162, %c0_163, %c0_164, %c0_165], %112 {strides = array<i32>} : memref<2x8x8x128xf32, #tpu.memory_space<vmem>>, vector<2x8x8x128xf32>,
    return
  }
  func.func @transform_0(%arg0: i32) -> (i32, i32, i32, i32) {
    %c0_i32 = arith.constant 0 : i32
    %c0_i32_0 = arith.constant 0 : i32
    %c0_i32_1 = arith.constant 0 : i32
    %c0_i32_2 = arith.constant 0 : i32
    return %arg0, %c0_i32, %c0_i32_0, %c0_i32_1 : i32, i32, i32, i32
  }
  func.func @transform_1(%arg0: i32) -> (i32, i32) {
    %c0_i32 = arith.constant 0 : i32
    %c0_i32_0 = arith.constant 0 : i32
    %c0_i32_1 = arith.constant 0 : i32
    return %c0_i32, %c0_i32_0 : i32, i32
  }
  func.func @transform_2(%arg0: i32) -> (i32, i32) {
    %c0_i32 = arith.constant 0 : i32
    %c0_i32_0 = arith.constant 0 : i32
    %c0_i32_1 = arith.constant 0 : i32
    return %c0_i32, %c0_i32_0 : i32, i32
  }
  func.func @transform_3(%arg0: i32) -> (i32, i32) {
    %c0_i32 = arith.constant 0 : i32
    %c0_i32_0 = arith.constant 0 : i32
    %c0_i32_1 = arith.constant 0 : i32
    return %c0_i32, %c0_i32_0 : i32, i32
  }
  func.func @transform_4(%arg0: i32) -> (i32, i32) {
    %c0_i32 = arith.constant 0 : i32
    %c0_i32_0 = arith.constant 0 : i32
    %c0_i32_1 = arith.constant 0 : i32
    return %c0_i32, %c0_i32_0 : i32, i32
  }
  func.func @transform_5(%arg0: i32) -> (i32, i32) {
    %c0_i32 = arith.constant 0 : i32
    %c0_i32_0 = arith.constant 0 : i32
    %c0_i32_1 = arith.constant 0 : i32
    return %c0_i32, %c0_i32_0 : i32, i32
  }
  func.func @transform_6(%arg0: i32) -> (i32, i32) {
    %c0_i32 = arith.constant 0 : i32
    %c0_i32_0 = arith.constant 0 : i32
    %c0_i32_1 = arith.constant 0 : i32
    return %c0_i32, %c0_i32_0 : i32, i32
  }
  func.func @transform_7(%arg0: i32) -> (i32, i32, i32, i32) {
    %c0_i32 = arith.constant 0 : i32
    %c0_i32_0 = arith.constant 0 : i32
    %c0_i32_1 = arith.constant 0 : i32
    %c0_i32_2 = arith.constant 0 : i32
    return %arg0, %c0_i32, %c0_i32_0, %c0_i32_1 : i32, i32, i32, i32
  }
}

</mosaic_0001>

<bundles_post_ra>
// kernel: down_forward.1
= control target key start
LH: loop header
LB: loop body
LE: loop exit
PB: predicated region body
PF: predicated region fallthrough
CT: control target
= control target key end

     0   :  { %12 = vsyncpa [#allocation6], 0  ;;  %s7169_s24 = smov [#allocation5]   ;;  %s8248_s0 = inlined_call_operand.vmem [shape: f32[2,16,16,4], index: 0, kind: input, shape index: {}]   ;;  %s8249_s1 = inlined_call_operand.vmem [shape: bf16[1152,128], index: 1, kind: input, shape index: {}]   ;;  %s8250_s2 = inlined_call_operand.vmem [shape: f32[1,128], index: 2, kind: input, shape index: {}]   ;;  %s8251_s3 = inlined_call_operand.vmem [shape: f32[1,128], index: 3, kind: input, shape index: {}]   ;;  %s8252_s4 = inlined_call_operand.hbm [shape: bf16[1152,128], index: 4, kind: input, shape index: {}]   ;;  %s8253_s5 = inlined_call_operand.vmem [shape: f32[1,128], index: 5, kind: input, shape index: {}]   ;;  %s8254_s6 = inlined_call_operand.vmem [shape: f32[1,128], index: 6, kind: input, shape index: {}]   ;;  %s8255_s7 = inlined_call_operand.vmem [shape: f32[2,8,8,128], index: 7, kind: output, shape index: {}]  }
   0x1   :  { %s26_s25 = sshll.u32 %s7169_s24, 4  ;;  %s27_s25 = int_to_ptr.vmem [resolvable:$true] %s26_s25 }
   0x2   :  { %s7155_s26 = scalar_lea.vmem %s27_s25, 9216  ;;  %p7160_p1 = scmp.lt.s32.totalorder %s27_s25, %s27_s25 }
   0x3   :  { %p7156_p0 = scmp.ne.s32.totalorder %s27_s25, %s7155_s26  ;;  %p7161_p2 = scmp.lt.s32.totalorder %s7155_s26, %s7155_s26 }
   0x5   :  { %p7162_p3 = por %p7161_p2, %p7160_p1 }
   0x7   :  { %p7163_p4 = pnand %p7162_p3, %p7156_p0 }
   0x9   :  { %7166 = shalt.err (!%p7163_p4)
}
   0xa   :  { %s7170_s27 = smov 64   ;;  %s7171_s28 = smov 4  }
   0xb   :  { %32 = dma.hbm_to_vmem [thread:$0]  %s8252_s4, 9216, %s27_s25, [#allocation6], %s7170_s27, %s7170_s27, %s7171_s28  }
   0xc   :  { %7167 = dma.done.wait [#allocation6], 9216  }
   0xd   :  { %7168 = vsyncadd [#allocation6], 4294958080  ;;  %v7172_v0 = vmov 0.0   ;;  %v7173_v1 = vmov 0.0|0.0   ;;  %v6807_v2 = vld [vmem:[%s8249_s1 + $0x78] sm:$0xff]   ;;  %v6811_v6 = vld [vmem:[%s8249_s1 + $0x70] sm:$0xff]  }
   0xe   :  { %216 = vst [vmem:[#allocation2] sm:$0xff] %v7172_v0  ;;  %217 = vst [vmem:[#allocation2 + $0x8] sm:$0x3] %v7172_v0  ;;  %v6808_v3 = vld [vmem:[%s8249_s1 + $0xf8] sm:$0xff]   ;;  %6195 = vmatprep.subr.bf16.mxu0 %v6807_v2  ;;  %v6812_v7 = vld [vmem:[%s8249_s1 + $0xf0] sm:$0xff]   ;;  %vm257_vm0 = vcmask 31744  }
   0xf   :  { %218 = vst [vmem:[#allocation2 + $0x10] sm:$0xff] %v7172_v0  ;;  %219 = vst [vmem:[#allocation2 + $0x18] sm:$0x3] %v7172_v0  ;;  %v6809_v4 = vld [vmem:[%s8249_s1 + $0x38] sm:$0xff]   ;;  %6259 = vmatprep.subr.bf16.mxu1 %v6808_v3  ;;  %v6813_v8 = vld [vmem:[%s8249_s1 + $0x30] sm:$0xff]  }
  0x10   :  { %2710 = vst [vmem:[#allocation3] sm:$0xff] %v7172_v0  ;;  %2711 = vst [vmem:[#allocation3 + $0x8] sm:$0x3] %v7172_v0  ;;  %v6810_v5 = vld [vmem:[%s8249_s1 + $0xb8] sm:$0xff]   ;;  %6196 = vmatpush3.bf16.msra.mxu0 %v6809_v4  ;;  %v6814_v9 = vld [vmem:[%s8249_s1 + $0xb0] sm:$0xff]  }
  0x11   :  { %220 = vst [vmem:[#allocation2 + $0x20] sm:$0xff] %v7172_v0  ;;  %221 = vst [vmem:[#allocation2 + $0x28] sm:$0x3] %v7172_v0  ;;  %6260 = vmatpush3.bf16.msra.mxu1 %v6810_v5  ;;  %6197 = vmatprep.subr.bf16.mxu0 %v6811_v6  ;;  %v6815_v10 = vld [vmem:[%s8249_s1 + $0x68] sm:$0xff]   ;;  %v6819_v14 = vld [vmem:[%s8249_s1 + $0x60] sm:$0xff]  }
  0x12   :  { %222 = vst [vmem:[#allocation2 + $0x30] sm:$0xff] %v7172_v0  ;;  %223 = vst [vmem:[#allocation2 + $0x38] sm:$0x3] %v7172_v0  ;;  %6261 = vmatprep.subr.bf16.mxu1 %v6812_v7  ;;  %v6816_v11 = vld [vmem:[%s8249_s1 + $0xe8] sm:$0xff]   ;;  %v6820_v15 = vld [vmem:[%s8249_s1 + $0xe0] sm:$0xff]  }
  0x13   :  { %224 = vst [vmem:[#allocation2 + $0x40] sm:$0xff] %v7172_v0  ;;  %225 = vst [vmem:[#allocation2 + $0x48] sm:$0x3] %v7172_v0  ;;  %v6817_v12 = vld [vmem:[%s8249_s1 + $0x28] sm:$0xff]   ;;  %v6821_v16 = vld [vmem:[%s8249_s1 + $0x20] sm:$0xff]  }
  0x14   :  { %226 = vst [vmem:[#allocation2 + $0x50] sm:$0xff] %v7172_v0  ;;  %227 = vst [vmem:[#allocation2 + $0x58] sm:$0x3] %v7172_v0  ;;  %6198 = vmatpush3.bf16.msra.mxu0 %v6813_v8  ;;  %v6818_v13 = vld [vmem:[%s8249_s1 + $0xa8] sm:$0xff]   ;;  %v6822_v17 = vld [vmem:[%s8249_s1 + $0xa0] sm:$0xff]  }
  0x15   :  { %228 = vst [vmem:[#allocation2 + $0x60] sm:$0xff] %v7172_v0  ;;  %229 = vst [vmem:[#allocation2 + $0x68] sm:$0x3] %v7172_v0  ;;  %6262 = vmatpush3.bf16.msra.mxu1 %v6814_v9  ;;  %6199 = vmatprep.subr.bf16.mxu0 %v6815_v10  ;;  %v6823_v18 = vld [vmem:[%s8249_s1 + $0x58] sm:$0xff]   ;;  %v6827_v22 = vld [vmem:[%s8249_s1 + $0x50] sm:$0xff]  }
  0x16   :  { %230 = vst [vmem:[#allocation2 + $0x70] sm:$0xff] %v7172_v0  ;;  %231 = vst [vmem:[#allocation2 + $0x78] sm:$0x3] %v7172_v0  ;;  %6263 = vmatprep.subr.bf16.mxu1 %v6816_v11  ;;  %v6824_v19 = vld [vmem:[%s8249_s1 + $0xd8] sm:$0xff]   ;;  %v6828_v23 = vld [vmem:[%s8249_s1 + $0xd0] sm:$0xff]  }
  0x17   :  { %232 = vst [vmem:[#allocation2 + $0x80] sm:$0xff] %v7172_v0  ;;  %233 = vst [vmem:[#allocation2 + $0x88] sm:$0x3] %v7172_v0  ;;  %v6825_v20 = vld [vmem:[%s8249_s1 + $0x18] sm:$0xff]   ;;  %v6829_v24 = vld [vmem:[%s8249_s1 + $0x10] sm:$0xff]  }
  0x18   :  { %234 = vst [vmem:[#allocation2 + $0x90] sm:$0xff] %v7172_v0  ;;  %235 = vst [vmem:[#allocation2 + $0x98] sm:$0x3] %v7172_v0  ;;  %6200 = vmatpush3.bf16.msra.mxu0 %v6817_v12  ;;  %v6826_v21 = vld [vmem:[%s8249_s1 + $0x98] sm:$0xff]   ;;  %v6830_v25 = vld [vmem:[%s8249_s1 + $0x90] sm:$0xff]  }
  0x19   :  { %236 = vst [vmem:[#allocation2 + $0xa0] sm:$0xff] %v7172_v0  ;;  %237 = vst [vmem:[#allocation2 + $0xa8] sm:$0x3] %v7172_v0  ;;  %6264 = vmatpush3.bf16.msra.mxu1 %v6818_v13  ;;  %6201 = vmatprep.subr.bf16.mxu0 %v6819_v14  ;;  %v6831_v26 = vld [vmem:[%s8249_s1 + $0x48] sm:$0xff]   ;;  %v6835_v30 = vld [vmem:[%s8249_s1 + $0x40] sm:$0xff]  }
  0x1a   :  { %238 = vst [vmem:[#allocation2 + $0xb0] sm:$0xff] %v7172_v0  ;;  %239 = vst [vmem:[#allocation2 + $0xb8] sm:$0x3] %v7172_v0  ;;  %6265 = vmatprep.subr.bf16.mxu1 %v6820_v15  ;;  %v6832_v27 = vld [vmem:[%s8249_s1 + $0xc8] sm:$0xff]   ;;  %v6836_v31 = vld [vmem:[%s8249_s1 + $0xc0] sm:$0xff]  }
  0x1b   :  { %240 = vst [vmem:[#allocation2 + $0xc0] sm:$0xff] %v7172_v0  ;;  %241 = vst [vmem:[#allocation2 + $0xc8] sm:$0x3] %v7172_v0  ;;  %v6833_v28 = vld [vmem:[%s8249_s1 + $0x8] sm:$0xff]   ;;  %v6837_v32 = vld [vmem:[%s8249_s1] sm:$0xff]  }
  0x1c   :  { %242 = vst [vmem:[#allocation2 + $0xd0] sm:$0xff] %v7172_v0  ;;  %243 = vst [vmem:[#allocation2 + $0xd8] sm:$0x3] %v7172_v0  ;;  %6202 = vmatpush3.bf16.msra.mxu0 %v6821_v16  ;;  %v6834_v29 = vld [vmem:[%s8249_s1 + $0x88] sm:$0xff]   ;;  %v6838_v33 = vld [vmem:[%s8249_s1 + $0x80] sm:$0xff]  }
  0x1d   :  { %244 = vst [vmem:[#allocation2 + $0xe0] sm:$0xff] %v7172_v0  ;;  %245 = vst [vmem:[#allocation2 + $0xe8] sm:$0x3] %v7172_v0  ;;  %6266 = vmatpush3.bf16.msra.mxu1 %v6822_v17  ;;  %6203 = vmatprep.subr.bf16.mxu0 %v6823_v18  ;;  %v41_v34 = vld [vmem:[%s8248_s0] ss:$2 sm:$0xff]  ;;  %v6843_v51 = vld [vmem:[%s8249_s1 + $0x178] sm:$0xff]  }
  0x1e   :  { %246 = vst [vmem:[#allocation2 + $0xf0] sm:$0xff] %v7172_v0  ;;  %247 = vst [vmem:[#allocation2 + $0xf8] sm:$0x3] %v7172_v0  ;;  %6267 = vmatprep.subr.bf16.mxu1 %v6824_v19  ;;  %v5279_v35 = vld [vmem:[%s8248_s0 + $0x1] ss:$2 sm:$0xff] }
  0x1f   :  { %248 = vst [vmem:[#allocation2 + $0x100] sm:$0xff] %v7172_v0  ;;  %249 = vst [vmem:[#allocation2 + $0x108] sm:$0x3] %v7172_v0  ;;  %v5295_v36 = vld [vmem:[%s8248_s0 + $0x10] ss:$2 sm:$0xff]  ;;  %v168_v38 = vmax.f32 %v41_v34, %v5279_v35  ;;  %v370_v39 = vld [vmem:[#allocation2 + $0x1] sm:$0xff] }
  0x20   :  { %250 = vst [vmem:[#allocation2 + $0x110] sm:$0xff] %v7172_v0  ;;  %251 = vst [vmem:[#allocation2 + $0x118] sm:$0x3] %v7172_v0  ;;  %6204 = vmatpush3.bf16.msra.mxu0 %v6825_v20  ;;  %v5311_v37 = vld [vmem:[%s8248_s0 + $0x11] ss:$2 sm:$0xff]  ;;  %v5923_v41 = vpack.c.bf16 %v370_v39, %v370_v39  ;;  %v466_v47 = vld [vmem:[#allocation2 + $0x2] sm:$0xff] }
  0x21   :  { %252 = vst [vmem:[#allocation2 + $0x120] sm:$0xff] %v7172_v0  ;;  %253 = vst [vmem:[#allocation2 + $0x128] sm:$0x3] %v7172_v0  ;;  %6268 = vmatpush3.bf16.msra.mxu1 %v6826_v21  ;;  %6205 = vmatprep.subr.bf16.mxu0 %v6827_v22  ;;  %v184_v40 = vmax.f32 %v5295_v36, %v5311_v37  ;;  %v5264_v42 = vld [vmem:[%s8248_s0 + $0x20] ss:$2 sm:$0xff]  ;;  %v5939_v50 = vpack.c.bf16 %v466_v47, %v466_v47 }
  0x22   :  { %254 = vst [vmem:[#allocation2 + $0x130] sm:$0xff] %v7172_v0  ;;  %255 = vst [vmem:[#allocation2 + $0x138] sm:$0x3] %v7172_v0  ;;  %6269 = vmatprep.subr.bf16.mxu1 %v6828_v23  ;;  %v5280_v43 = vld [vmem:[%s8248_s0 + $0x21] ss:$2 sm:$0xff] }
  0x23   :  { %2712 = vst [vmem:[#allocation3 + $0xa0] sm:$0xff] %v7172_v0  ;;  %2713 = vst [vmem:[#allocation3 + $0xa8] sm:$0x3] %v7172_v0  ;;  %v5296_v44 = vld [vmem:[%s8248_s0 + $0x30] ss:$2 sm:$0xff]  ;;  %v169_v46 = vmax.f32 %v5264_v42, %v5280_v43  ;;  %v200_v48 = vmax.f32 %v168_v38, %v184_v40 }
  0x24   :  { %2715 = vst [vmem:[#allocation3 + $0x90] sm:$0xff] %v7172_v0  ;;  %2716 = vst [vmem:[#allocation3 + $0x98] sm:$0x3] %v7172_v0  ;;  %6206 = vmatpush3.bf16.msra.mxu0 %v6829_v24  ;;  %v5312_v45 = vld [vmem:[%s8248_s0 + $0x31] ss:$2 sm:$0xff] }
  0x25   :  { %2717 = vst [vmem:[#allocation3 + $0x130] sm:$0xff] %v7172_v0  ;;  %2718 = vst [vmem:[#allocation3 + $0x138] sm:$0x3] %v7172_v0  ;;  %6270 = vmatpush3.bf16.msra.mxu1 %v6830_v25  ;;  %6207 = vmatprep.subr.bf16.mxu0 %v6831_v26  ;;  %v185_v49 = vmax.f32 %v5296_v44, %v5312_v45  ;;  %v5265_v53 = vld [vmem:[%s8248_s0 + $0x40] ss:$2 sm:$0xff] }
  0x26   :  { %2720 = vst [vmem:[#allocation3 + $0x10] sm:$0x1] %v7172_v0  ;;  %2721 = vst [vmem:[#allocation3 + $0x20] sm:$0x1] %v7172_v0  ;;  %6271 = vmatprep.subr.bf16.mxu1 %v6832_v27  ;;  %v5281_v54 = vld [vmem:[%s8248_s0 + $0x41] ss:$2 sm:$0xff] }
  0x27   :  { %2722 = vst [vmem:[#allocation3 + $0x30] sm:$0x1] %v7172_v0  ;;  %2723 = vst [vmem:[#allocation3 + $0x40] sm:$0x1] %v7172_v0  ;;  %v201_v52 = vmax.f32 %v169_v46, %v185_v49  ;;  %v5297_v55 = vld [vmem:[%s8248_s0 + $0x50] ss:$2 sm:$0xff]  ;;  %v170_v57 = vmax.f32 %v5265_v53, %v5281_v54 }
  0x28   :  { %2724 = vst [vmem:[#allocation3 + $0x50] sm:$0x1] %v7172_v0  ;;  %2725 = vst [vmem:[#allocation3 + $0x60] sm:$0x1] %v7172_v0  ;;  %6208 = vmatpush3.bf16.msra.mxu0 %v6833_v28  ;;  %v5313_v56 = vld [vmem:[%s8248_s0 + $0x51] ss:$2 sm:$0xff] }
  0x29   :  { %2726 = vst [vmem:[#allocation3 + $0x70] sm:$0x1] %v7172_v0  ;;  %2727 = vst [vmem:[#allocation3 + $0x80] sm:$0x1] %v7172_v0  ;;  %6272 = vmatpush3.bf16.msra.mxu1 %v6834_v29  ;;  %6209 = vmatprep.subr.bf16.mxu0 %v6835_v30  ;;  %v5266_v58 = vld [vmem:[%s8248_s0 + $0x60] ss:$2 sm:$0xff]  ;;  %v186_v59 = vmax.f32 %v5297_v55, %v5313_v56 }
  0x2a   :  { %2730 = vst [vmem:[#allocation3 + $0xb0] sm:$0x1] %v7172_v0  ;;  %2731 = vst [vmem:[#allocation3 + $0xc0] sm:$0x1] %v7172_v0  ;;  %6273 = vmatprep.subr.bf16.mxu1 %v6836_v31  ;;  %v5282_v60 = vld [vmem:[%s8248_s0 + $0x61] ss:$2 sm:$0xff] }
  0x2b   :  { %2732 = vst [vmem:[#allocation3 + $0xd0] sm:$0x1] %v7172_v0  ;;  %2733 = vst [vmem:[#allocation3 + $0xe0] sm:$0x1] %v7172_v0  ;;  %v5298_v61 = vld [vmem:[%s8248_s0 + $0x70] ss:$2 sm:$0xff]  ;;  %v171_v63 = vmax.f32 %v5266_v58, %v5282_v60 }
  0x2c   :  { %2734 = vst [vmem:[#allocation3 + $0xf0] sm:$0x1] %v7172_v0  ;;  %2735 = vst [vmem:[#allocation3 + $0x100] sm:$0x1] %v7172_v0  ;;  %6210 = vmatpush3.bf16.msra.mxu0 %v6837_v32  ;;  %v5314_v62 = vld [vmem:[%s8248_s0 + $0x71] ss:$2 sm:$0xff] }
  0x2d   :  { %2736 = vst [vmem:[#allocation3 + $0x110] sm:$0x1] %v7172_v0  ;;  %2737 = vst [vmem:[#allocation3 + $0x120] sm:$0x1] %v7172_v0  ;;  %6274 = vmatpush3.bf16.msra.mxu1 %v6838_v33  ;;  %6323 = vmatprep.subr.bf16.mxu0 %v6843_v51  ;;  %v5267_v3 = vld [vmem:[%s8248_s0 + $0x80] ss:$2 sm:$0xff] }
  0x2e   :  { %2740 = vst [vmem:[#allocation3 + $0x19] sm:$0x1] %v7172_v0  ;;  %2741 = vst [vmem:[#allocation3 + $0x29] sm:$0x1] %v7172_v0  ;;  %v5283_v4 = vld [vmem:[%s8248_s0 + $0x81] ss:$2 sm:$0xff] }
  0x2f   :  { %2742 = vst [vmem:[#allocation3 + $0x39] sm:$0x1] %v7172_v0  ;;  %2743 = vst [vmem:[#allocation3 + $0x49] sm:$0x1] %v7172_v0  ;;  %v5299_v5 = vld [vmem:[%s8248_s0 + $0x90] ss:$2 sm:$0xff]  ;;  %v172_v7 = vmax.f32 %v5267_v3, %v5283_v4 }
  0x30   :  { %2744 = vst [vmem:[#allocation3 + $0x59] sm:$0x1] %v7172_v0  ;;  %2745 = vst [vmem:[#allocation3 + $0x69] sm:$0x1] %v7172_v0  ;;  %v5315_v6 = vld [vmem:[%s8248_s0 + $0x91] ss:$2 sm:$0xff] }
  0x31   :  { %2746 = vst [vmem:[#allocation3 + $0x79] sm:$0x1] %v7172_v0  ;;  %2747 = vst [vmem:[#allocation3 + $0x89] sm:$0x1] %v7172_v0  ;;  %v5268_v8 = vld [vmem:[%s8248_s0 + $0xa0] ss:$2 sm:$0xff]  ;;  %v188_v12 = vmax.f32 %v5299_v5, %v5315_v6 }
  0x32   :  { %2750 = vst [vmem:[#allocation3 + $0xb9] sm:$0x1] %v7172_v0  ;;  %2751 = vst [vmem:[#allocation3 + $0xc9] sm:$0x1] %v7172_v0  ;;  %v5284_v17 = vld [vmem:[%s8248_s0 + $0xa1] ss:$2 sm:$0xff] }
  0x33   :  { %2752 = vst [vmem:[#allocation3 + $0xd9] sm:$0x1] %v7172_v0  ;;  %2753 = vst [vmem:[#allocation3 + $0xe9] sm:$0x1] %v7172_v0  ;;  %v5300_v18 = vld [vmem:[%s8248_s0 + $0xb0] ss:$2 sm:$0xff]  ;;  %v204_v23 = vmax.f32 %v172_v7, %v188_v12  ;;  %v173_v24 = vmax.f32 %v5268_v8, %v5284_v17 }
  0x34   :  { %2754 = vst [vmem:[#allocation3 + $0xf9] sm:$0x1] %v7172_v0  ;;  %2755 = vst [vmem:[#allocation3 + $0x109] sm:$0x1] %v7172_v0  ;;  %v5316_v19 = vld [vmem:[%s8248_s0 + $0xb1] ss:$2 sm:$0xff] }
  0x35   :  { %2756 = vst [vmem:[#allocation3 + $0x119] sm:$0x1] %v7172_v0  ;;  %2757 = vst [vmem:[#allocation3 + $0x129] sm:$0x1] %v7172_v0  ;;  %v189_v25 = vmax.f32 %v5300_v18, %v5316_v19  ;;  %v7482_v26 = vld [vmem:[#allocation3 + $0x1] sm:$0xff]  ;;  %v6850_v56 = vld [vmem:[%s8249_s1 + $0x170] sm:$0xff]  }
  0x36   :  { %2719 = vst [vmem:[#allocation3] sm:$0x1] %v7172_v0  ;;  %2739 = vst [vmem:[#allocation3 + $0x9] sm:$0x1] %v7172_v0  ;;  %v5269_v32 = vld [vmem:[%s8248_s0 + $0xc0] ss:$2 sm:$0xff]  ;;  %v6067_v37 = vpack.c.bf16 %v7482_v26, %v7482_v26 }
  0x37   :  { %2728 = vst [vmem:[#allocation3 + $0x90] sm:$0x1] %v7172_v0  ;;  %2729 = vst [vmem:[#allocation3 + $0xa0] sm:$0x1] %v7172_v0  ;;  %v205_v31 = vmax.f32 %v173_v24, %v189_v25  ;;  %v5285_v33 = vld [vmem:[%s8248_s0 + $0xc1] ss:$2 sm:$0xff] }
  0x38   :  { %2738 = vst [vmem:[#allocation3 + $0x130] sm:$0x1] %v7172_v0  ;;  %2748 = vst [vmem:[#allocation3 + $0x99] sm:$0x1] %v7172_v0  ;;  %v5301_v34 = vld [vmem:[%s8248_s0 + $0xd0] ss:$2 sm:$0xff]  ;;  %v174_v47 = vmax.f32 %v5269_v32, %v5285_v33 }
  0x39   :  { %2749 = vst [vmem:[#allocation3 + $0xa9] sm:$0x1] %v7172_v0  ;;  %2758 = vst [vmem:[#allocation3 + $0x139] sm:$0x1] %v7172_v0  ;;  %v187_v0 = vmax.f32 %v5298_v61, %v5314_v62  ;;  %v5270_v53 = vld [vmem:[%s8248_s0 + $0xe0] ss:$2 sm:$0xff] }
  0x3a   :  { %354 = vst [vmem:[#allocation4] sm:$0xf] %v7173_v1  ;;  %362 = vst [vmem:[#allocation4 + $0x120] sm:$0xf] %v7173_v1  ;;  %v5286_v54 = vld [vmem:[%s8248_s0 + $0xe1] ss:$2 sm:$0xff] }
  0x3b   :  { %938 = vst [vmem:[#allocation4 + $0x114] sm:$0xf] %v7173_v1  ;;  %946 = vst [vmem:[#allocation4 + $0x234] sm:$0xf] %v7173_v1  ;;  %v202_v1 = vmax.f32 %v170_v57, %v186_v59  ;;  %v203_v2 = vmax.f32 %v171_v63, %v187_v0  ;;  %v5302_v58 = vld [vmem:[%s8248_s0 + $0xf0] ss:$2 sm:$0xff]  ;;  %v175_v60 = vmax.f32 %v5270_v53, %v5286_v54 }
  0x3c   :  { %450 = vst [vmem:[#allocation4 + $0x4] sm:$0xf] %v5923_v41  ;;  %258 = vst.msk [vmem:[#allocation2 + $0x11] sm:$0xff] %vm257_vm0, %v200_v48  ;;  %v6844_v48 = vld [vmem:[%s8249_s1 + $0x138] sm:$0xff]   ;;  %v6851_v8 = vld [vmem:[%s8249_s1 + $0x130] sm:$0xff]  }
  0x3d   :  { %546 = vst [vmem:[#allocation4 + $0x8] sm:$0xf] %v5939_v50  ;;  %259 = vst.msk [vmem:[#allocation2 + $0x21] sm:$0xff] %vm257_vm0, %v201_v52  ;;  %v7471_v15 = vld [vmem:[#allocation3] sm:$0xff]  ;;  %v5317_v52 = vld [vmem:[%s8248_s0 + $0xd1] ss:$2 sm:$0xff] }
  0x3e   :  { %260 = vst.msk [vmem:[#allocation2 + $0x31] sm:$0xff] %vm257_vm0, %v202_v1  ;;  %261 = vst.msk [vmem:[#allocation2 + $0x41] sm:$0xff] %vm257_vm0, %v203_v2  ;;  %v7484_v30 = vld [vmem:[#allocation3 + $0x2] sm:$0xff]  ;;  %v6051_v36 = vpack.c.bf16 %v7471_v15, %v7471_v15  ;;  %v190_v57 = vmax.f32 %v5301_v34, %v5317_v52  ;;  %v5318_v59 = vld [vmem:[%s8248_s0 + $0xf1] ss:$2 sm:$0xff] }
  0x3f   :  { %262 = vst.msk [vmem:[#allocation2 + $0x51] sm:$0xff] %vm257_vm0, %v204_v23  ;;  %263 = vst.msk [vmem:[#allocation2 + $0x61] sm:$0xff] %vm257_vm0, %v205_v31  ;;  %v6083_v55 = vpack.c.bf16 %v7484_v30, %v7484_v30  ;;  %v191_v0 = vmax.f32 %v5302_v58, %v5318_v59  ;;  %v5303_v30 = vld [vmem:[%s8248_s0 + $0x110] ss:$2 sm:$0xff]  ;;  %v5319_v32 = vld [vmem:[%s8248_s0 + $0x111] ss:$2 sm:$0xff] }
  0x40   :  { %v206_v5 = vmax.f32 %v174_v47, %v190_v57  ;;  %v378_v34 = vld [vmem:[#allocation2 + $0xa1] sm:$0xff]  ;;  %v5304_v53 = vld [vmem:[%s8248_s0 + $0x130] ss:$2 sm:$0xff] }
  0x41   :  { %v207_v12 = vmax.f32 %v175_v60, %v191_v0  ;;  %v5288_v52 = vld [vmem:[%s8248_s0 + $0x121] ss:$2 sm:$0xff]  ;;  %v6872_v0 = vld [vmem:[%s8249_s1 + $0x1f8] sm:$0xff]  }
  0x42   :  { %264 = vst.msk [vmem:[#allocation2 + $0x71] sm:$0xff] %vm257_vm0, %v206_v5  ;;  %v474_v58 = vld [vmem:[#allocation2 + $0xa2] sm:$0xff]  ;;  %6387 = vmatprep.subr.bf16.mxu1 %v6872_v0 }
  0x43   :  { %v275_v9 = vld [vmem:[#allocation2 + $0x10] sm:$0xff]  ;;  %v1139_v35 = vld [vmem:[#allocation4] sm:$0xff]  ;;  %265 = vst.msk [vmem:[#allocation2 + $0x81] sm:$0xff] %vm257_vm0, %v207_v12  ;;  %v5947_v60 = vpack.c.bf16 %v474_v58, %v474_v58 }
  0x44   :  { %v371_v10 = vld [vmem:[#allocation2 + $0x11] sm:$0xff]  ;;  %v5908_v13 = vpack.c.bf16 %v275_v9, %v275_v9  ;;  %v563_v20 = vld [vmem:[#allocation2 + $0x20] sm:$0xff]  ;;  %2856 = vst [vmem:[#allocation4] sm:$0xf] %v6051_v36 }
  0x45   :  { %v467_v11 = vld [vmem:[#allocation2 + $0x12] sm:$0xff]  ;;  %v5924_v14 = vpack.c.bf16 %v371_v10, %v371_v10  ;;  %v372_v21 = vld [vmem:[#allocation2 + $0x21] sm:$0xff]  ;;  %v5956_v27 = vpack.c.bf16 %v563_v20, %v563_v20  ;;  %554 = vst [vmem:[#allocation4 + $0x128] sm:$0xf] %v5947_v60 }
  0x46   :  { %v5940_v16 = vpack.c.bf16 %v467_v11, %v467_v11  ;;  %v468_v22 = vld [vmem:[#allocation2 + $0x22] sm:$0xff]  ;;  %355 = vst [vmem:[#allocation4 + $0x24] sm:$0xf] %v5908_v13  ;;  %642 = vst [vmem:[#allocation4 + $0xc] sm:$0xf] %v5908_v13  ;;  %v5925_v28 = vpack.c.bf16 %v372_v21, %v372_v21  ;;  %v277_v38 = vld [vmem:[#allocation2 + $0x30] sm:$0xff] }
  0x47   :  { %451 = vst [vmem:[#allocation4 + $0x28] sm:$0xf] %v5924_v14  ;;  %v5941_v29 = vpack.c.bf16 %v468_v22, %v468_v22  ;;  %643 = vst [vmem:[#allocation4 + $0x30] sm:$0xf] %v5956_v27  ;;  %v373_v39 = vld [vmem:[#allocation2 + $0x31] sm:$0xff]  ;;  %v5910_v41 = vpack.c.bf16 %v277_v38, %v277_v38  ;;  %v565_v44 = vld [vmem:[#allocation2 + $0x40] sm:$0xff] }
  0x48   :  { %547 = vst [vmem:[#allocation4 + $0x2c] sm:$0xf] %v5940_v16  ;;  %356 = vst [vmem:[#allocation4 + $0x48] sm:$0xf] %v5956_v27  ;;  %v469_v40 = vld [vmem:[#allocation2 + $0x32] sm:$0xff]  ;;  %v5926_v42 = vpack.c.bf16 %v373_v39, %v373_v39  ;;  %v374_v45 = vld [vmem:[#allocation2 + $0x41] sm:$0xff]  ;;  %v5958_v49 = vpack.c.bf16 %v565_v44, %v565_v44  ;;  %v192_v39 = vmax.f32 %v5303_v30, %v5319_v32 }
  0x49   :  { %452 = vst [vmem:[#allocation4 + $0x4c] sm:$0xf] %v5925_v28  ;;  %548 = vst [vmem:[#allocation4 + $0x50] sm:$0xf] %v5941_v29  ;;  %v5942_v43 = vpack.c.bf16 %v469_v40, %v469_v40  ;;  %v470_v46 = vld [vmem:[#allocation2 + $0x42] sm:$0xff]  ;;  %v5927_v50 = vpack.c.bf16 %v374_v45, %v374_v45  ;;  %v279_v2 = vld [vmem:[#allocation2 + $0x50] sm:$0xff]  ;;  %v5931_v40 = vpack.c.bf16 %v378_v34, %v378_v34 }
  0x4a   :  { %739 = vst [vmem:[#allocation4 + $0x34] sm:$0xf] %v5925_v28  ;;  %835 = vst [vmem:[#allocation4 + $0x38] sm:$0xf] %v5941_v29  ;;  %v5943_v51 = vpack.c.bf16 %v470_v46, %v470_v46  ;;  %v375_v3 = vld [vmem:[#allocation2 + $0x51] sm:$0xff]  ;;  %v5912_v9 = vpack.c.bf16 %v279_v2, %v279_v2  ;;  %v567_v14 = vld [vmem:[#allocation2 + $0x60] sm:$0xff] }
  0x4b   :  { %1027 = vst [vmem:[#allocation4 + $0x1c] sm:$0xf] %v5925_v28  ;;  %357 = vst [vmem:[#allocation4 + $0x6c] sm:$0xf] %v5910_v41  ;;  %v471_v4 = vld [vmem:[#allocation2 + $0x52] sm:$0xff]  ;;  %v5928_v10 = vpack.c.bf16 %v375_v3, %v375_v3  ;;  %v376_v15 = vld [vmem:[#allocation2 + $0x61] sm:$0xff]  ;;  %v5960_v18 = vpack.c.bf16 %v567_v14, %v567_v14 }
  0x4c   :  { %453 = vst [vmem:[#allocation4 + $0x70] sm:$0xf] %v5926_v42  ;;  %549 = vst [vmem:[#allocation4 + $0x74] sm:$0xf] %v5942_v43  ;;  %v5944_v11 = vpack.c.bf16 %v471_v4, %v471_v4  ;;  %v472_v16 = vld [vmem:[#allocation2 + $0x62] sm:$0xff]  ;;  %v5929_v19 = vpack.c.bf16 %v376_v15, %v376_v15  ;;  %v377_v36 = vld [vmem:[#allocation2 + $0x71] sm:$0xff] }
  0x4d   :  { %644 = vst [vmem:[#allocation4 + $0x54] sm:$0xf] %v5910_v41  ;;  %932 = vst [vmem:[#allocation4 + $0x3c] sm:$0xf] %v5910_v41  ;;  %v1140_v63 = vld [vmem:[#allocation4 + $0x8] sm:$0xff]  ;;  %v5945_v20 = vpack.c.bf16 %v472_v16, %v472_v16  ;;  %v6864_v28 = vld [vmem:[%s8249_s1 + $0x160] sm:$0xff]   ;;  %v5930_v44 = vpack.c.bf16 %v377_v36, %v377_v36 }
  0x4e   :  { %1028 = vst [vmem:[#allocation4 + $0x40] sm:$0xf] %v5926_v42  ;;  %836 = vst [vmem:[#allocation4 + $0x5c] sm:$0xf] %v5942_v43  ;;  %v1144_v61 = vld [vmem:[#allocation4 + $0x24] sm:$0xff]  ;;  %v6873_v15 = vld [vmem:[%s8249_s1 + $0x1b8] sm:$0xff]  }
  0x4f   :  { %v6839_v62 = vld [vmem:[#allocation4 + $0x4] ss:$36 sps:$4 sm:$0xff]   ;;  %645 = vst [vmem:[#allocation4 + $0x78] sm:$0xf] %v5958_v49  ;;  %358 = vst [vmem:[#allocation4 + $0x90] sm:$0xf] %v5958_v49  ;;  %v5471_v1 = vcombine.low %v1139_v35, %v1144_v61 }
  0x50   :  { %454 = vst [vmem:[#allocation4 + $0x94] sm:$0xf] %v5927_v50  ;;  %550 = vst [vmem:[#allocation4 + $0x98] sm:$0xf] %v5943_v51  ;;  %2195 = vmatprep.mubr.bf16.mxu0 %v6839_v62  ;;  %v1145_v6 = vld [vmem:[#allocation4 + $0x2c] sm:$0xff]  ;;  %v6865_v38 = vld [vmem:[%s8249_s1 + $0x120] sm:$0xff]  }
  0x51   :  { %741 = vst [vmem:[#allocation4 + $0x7c] sm:$0xf] %v5927_v50  ;;  %837 = vst [vmem:[#allocation4 + $0x80] sm:$0xf] %v5943_v51  ;;  %v6841_v7 = vld [vmem:[#allocation4 + $0xc] ss:$36 sps:$4 sm:$0xff]   ;;  %2196 = vmatmul.mubr.bf16.vlgmr.msra.gmra.mxu0 %v5471_v1  ;;  %v5473_v13 = vcombine.low %v1140_v63, %v1145_v6 }
  0x52   :  { %1029 = vst [vmem:[#allocation4 + $0x64] sm:$0xf] %v5927_v50  ;;  %2952 = vst [vmem:[#allocation4 + $0x4] sm:$0xf] %v6067_v37  ;;  %2292 = vmatprep.mubr.bf16.mxu1 %v6841_v7  ;;  %6324 = vmatpush3.bf16.msra.mxu0 %v6844_v48  ;;  %v1149_v17 = vld [vmem:[#allocation4 + $0x48] sm:$0xff]  ;;  %v281_v35 = vld [vmem:[#allocation2 + $0x70] sm:$0xff] }
  0x53   :  { %3048 = vst [vmem:[#allocation4 + $0x8] sm:$0xf] %v6083_v55  ;;  %359 = vst [vmem:[#allocation4 + $0xb4] sm:$0xf] %v5912_v9  ;;  %2293 = vmatmul.mubr.bf16.vlgmr.msra.gmra.mxu1 %v5473_v13  ;;  %6325 = vmatprep.subr.bf16.mxu0 %v6850_v56  ;;  %v6857_v21 = vld [vmem:[%s8249_s1 + $0x168] sm:$0xff]   ;;  %v473_v37 = vld [vmem:[#allocation2 + $0x72] sm:$0xff]  ;;  %v5914_v43 = vpack.c.bf16 %v281_v35, %v281_v35 }
  0x54   :  { %455 = vst [vmem:[#allocation4 + $0xb8] sm:$0xf] %v5928_v10  ;;  %551 = vst [vmem:[#allocation4 + $0xbc] sm:$0xf] %v5944_v11  ;;  %v5271_v22 = vld [vmem:[%s8248_s0 + $0x100] ss:$2 sm:$0xff]  ;;  %v5946_v45 = vpack.c.bf16 %v473_v37, %v473_v37  ;;  %6388 = vmatpush3.bf16.msra.mxu1 %v6873_v15 }
  0x55   :  { %646 = vst [vmem:[#allocation4 + $0x9c] sm:$0xf] %v5912_v9  ;;  %934 = vst [vmem:[#allocation4 + $0x84] sm:$0xf] %v5912_v9  ;;  %v1154_v23 = vld [vmem:[#allocation4 + $0x6c] sm:$0xff]  ;;  %v569_v47 = vld [vmem:[#allocation2 + $0x80] sm:$0xff] }
  0x56   :  { %1030 = vst [vmem:[#allocation4 + $0x88] sm:$0xf] %v5928_v10  ;;  %742 = vst [vmem:[#allocation4 + $0xa0] sm:$0xf] %v5928_v10  ;;  %v6845_v24 = vld [vmem:[#allocation4 + $0x4c] ss:$36 sps:$4 sm:$0xff]   ;;  %v5480_v26 = vcombine.low %v1149_v17, %v1154_v23  ;;  %6326 = vmatpush3.bf16.msra.mxu0 %v6851_v8  ;;  %v5962_v51 = vpack.c.bf16 %v569_v47, %v569_v47 }
  0x57   :  { %838 = vst [vmem:[#allocation4 + $0xa4] sm:$0xf] %v5944_v11  ;;  %647 = vst [vmem:[#allocation4 + $0xc0] sm:$0xf] %v5960_v18  ;;  %v6847_v25 = vld [vmem:[#allocation4 + $0x54] ss:$36 sps:$4 sm:$0xff]   ;;  %2203 = vmatprep.mubr.bf16.mxu0 %v6845_v24  ;;  %6327 = vmatprep.subr.bf16.mxu0 %v6857_v21 }
  0x58   :  { %360 = vst [vmem:[#allocation4 + $0xd8] sm:$0xf] %v5960_v18  ;;  %456 = vst [vmem:[#allocation4 + $0xdc] sm:$0xf] %v5929_v19  ;;  %v6858_v27 = vld [vmem:[%s8249_s1 + $0x128] sm:$0xff]   ;;  %2300 = vmatprep.mubr.bf16.mxu1 %v6847_v25  ;;  %v1159_v41 = vld [vmem:[#allocation4 + $0x90] sm:$0xff] }
  0x59   :  { %552 = vst [vmem:[#allocation4 + $0xe0] sm:$0xf] %v5945_v20  ;;  %743 = vst [vmem:[#allocation4 + $0xc4] sm:$0xf] %v5929_v19  ;;  %v5287_v29 = vld [vmem:[%s8248_s0 + $0x101] ss:$2 sm:$0xff]  ;;  %2204 = vmatmul.mubr.bf16.gmra.mxu0 %v5480_v26 }
  0x5a   :  { %839 = vst [vmem:[#allocation4 + $0xc8] sm:$0xf] %v5945_v20  ;;  %935 = vst [vmem:[#allocation4 + $0xa8] sm:$0xf] %v5960_v18  ;;  %v6849_v31 = vld [vmem:[#allocation4 + $0x50] ss:$36 sps:$4 sm:$0xff]   ;;  %v176_v33 = vmax.f32 %v5271_v22, %v5287_v29  ;;  %6328 = vmatpush3.bf16.msra.mxu0 %v6858_v27 }
  0x5b   :  { %1031 = vst [vmem:[#allocation4 + $0xac] sm:$0xf] %v5929_v19  ;;  %v6852_v42 = vld [vmem:[#allocation4 + $0x94] ss:$36 sps:$4 sm:$0xff]   ;;  %458 = vst [vmem:[#allocation4 + $0x124] sm:$0xf] %v5931_v40  ;;  %2301 = vmatmul.mubr.bf16.gmra.mxu1 %v6849_v31  ;;  %6329 = vmatprep.subr.bf16.mxu0 %v6864_v28 }
  0x5c   :  { %v1164_v46 = vld [vmem:[#allocation4 + $0xb4] sm:$0xff]  ;;  %v208_v48 = vmax.f32 %v176_v33, %v192_v39  ;;  %v5272_v49 = vld [vmem:[%s8248_s0 + $0x120] ss:$2 sm:$0xff]  ;;  %2211 = vmatprep.mubr.bf16.mxu0 %v6852_v42  ;;  %361 = vst [vmem:[#allocation4 + $0xfc] sm:$0xf] %v5914_v43 }
  0x5d   :  { %457 = vst [vmem:[#allocation4 + $0x100] sm:$0xf] %v5930_v44  ;;  %553 = vst [vmem:[#allocation4 + $0x104] sm:$0xf] %v5946_v45  ;;  %v5489_v54 = vcombine.low %v1159_v41, %v1164_v46  ;;  %v6856_v55 = vld [vmem:[#allocation4 + $0x98] ss:$36 sps:$4 sm:$0xff]   ;;  %v177_v57 = vmax.f32 %v5272_v49, %v5288_v52 }
  0x5e   :  { %v6854_v50 = vld [vmem:[#allocation4 + $0x9c] ss:$36 sps:$4 sm:$0xff]   ;;  %648 = vst [vmem:[#allocation4 + $0xe4] sm:$0xf] %v5914_v43  ;;  %936 = vst [vmem:[#allocation4 + $0xcc] sm:$0xf] %v5914_v43  ;;  %6330 = vmatpush3.bf16.msra.mxu0 %v6865_v38 }
  0x5f   :  { %1032 = vst [vmem:[#allocation4 + $0xd0] sm:$0xf] %v5930_v44  ;;  %744 = vst [vmem:[#allocation4 + $0xe8] sm:$0xf] %v5930_v44  ;;  %2308 = vmatprep.mubr.bf16.mxu1 %v6854_v50  ;;  %v5320_v56 = vld [vmem:[%s8248_s0 + $0x131] ss:$2 sm:$0xff] }
  0x60   :  { %840 = vst [vmem:[#allocation4 + $0xec] sm:$0xf] %v5946_v45  ;;  %266 = vst.msk [vmem:[#allocation2 + $0xb1] sm:$0xff] %vm257_vm0, %v208_v48  ;;  %v193_v59 = vmax.f32 %v5304_v53, %v5320_v56  ;;  %v6870_v61 = vld [vmem:[%s8249_s1 + $0x158] sm:$0xff]   ;;  %v2784_v10 = vld [vmem:[#allocation3 + $0xa0] sm:$0xff] }
  0x61   :  { %649 = vst [vmem:[#allocation4 + $0x108] sm:$0xf] %v5962_v51  ;;  %937 = vst [vmem:[#allocation4 + $0xf0] sm:$0xf] %v5962_v51  ;;  %v6871_v62 = vld [vmem:[%s8249_s1 + $0x118] sm:$0xff]   ;;  %6331 = vmatprep.subr.bf16.mxu0 %v6870_v61  ;;  %2212 = vmatmul.mubr.bf16.gmra.mxu0 %v5489_v54  ;;  %v2880_v11 = vld [vmem:[#allocation3 + $0xa1] sm:$0xff]  ;;  %v6059_v28 = vpack.c.bf16 %v2784_v10, %v2784_v10 }
  0x62   :  { %v209_v63 = vmax.f32 %v177_v57, %v193_v59  ;;  %v1169_v1 = vld [vmem:[#allocation4 + $0xd8] sm:$0xff]  ;;  %6332 = vmatpush3.bf16.msra.mxu0 %v6871_v62  ;;  %v6874_v16 = vld [vmem:[%s8249_s1 + $0x1f0] sm:$0xff]   ;;  %v5273_v17 = vld [vmem:[%s8248_s0 + $0x140] ss:$2 sm:$0xff]  ;;  %v6075_v29 = vpack.c.bf16 %v2880_v11, %v2880_v11 }
  0x63   :  { %2309 = vmatmul.mubr.bf16.gmra.mxu1 %v6856_v55  ;;  %v5289_v18 = vld [vmem:[%s8248_s0 + $0x141] ss:$2 sm:$0xff]  ;;  %v5305_v19 = vld [vmem:[%s8248_s0 + $0x150] ss:$2 sm:$0xff]  ;;  %v5321_v20 = vld [vmem:[%s8248_s0 + $0x151] ss:$2 sm:$0xff]  ;;  %6389 = vmatprep.subr.bf16.mxu1 %v6874_v16 }
  0x64   :  { %v1174_v2 = vld [vmem:[#allocation4 + $0xfc] sm:$0xff]  ;;  %267 = vst.msk [vmem:[#allocation2 + $0xc1] sm:$0xff] %vm257_vm0, %v209_v63  ;;  %v178_v21 = vmax.f32 %v5273_v17, %v5289_v18  ;;  %v194_v23 = vmax.f32 %v5305_v19, %v5321_v20  ;;  %v6879_v39 = vld [vmem:[%s8249_s1 + $0x1b0] sm:$0xff]   ;;  %v6883_v47 = vld [vmem:[%s8249_s1 + $0x1e8] sm:$0xff]  }
  0x65   :  { %v6859_v3 = vld [vmem:[#allocation4 + $0xdc] ss:$36 sps:$4 sm:$0xff]   ;;  %v5498_v13 = vcombine.low %v1169_v1, %v1174_v2  ;;  %v6881_v41 = vld [vmem:[%s8249_s1 + $0x150] sm:$0xff]   ;;  %6390 = vmatpush3.bf16.msra.mxu1 %v6879_v39  ;;  %v6884_v49 = vld [vmem:[%s8249_s1 + $0x1a8] sm:$0xff]  }
  0x66   :  { %2219 = vmatprep.mubr.bf16.mxu0 %v6859_v3  ;;  %v6863_v14 = vld [vmem:[#allocation4 + $0xe0] ss:$36 sps:$4 sm:$0xff]   ;;  %v5306_v25 = vld [vmem:[%s8248_s0 + $0x170] ss:$2 sm:$0xff]  ;;  %v5322_v26 = vld [vmem:[%s8248_s0 + $0x171] ss:$2 sm:$0xff]  ;;  %v210_v36 = vmax.f32 %v178_v21, %v194_v23  ;;  %6333 = vmatprep.subr.bf16.mxu0 %v6881_v41 }
  0x67   :  { %v283_v4 = vld [vmem:[#allocation2 + $0xb0] sm:$0xff]  ;;  %v5274_v22 = vld [vmem:[%s8248_s0 + $0x160] ss:$2 sm:$0xff]  ;;  %v5290_v24 = vld [vmem:[%s8248_s0 + $0x161] ss:$2 sm:$0xff]  ;;  %v195_v33 = vmax.f32 %v5306_v25, %v5322_v26  ;;  %6391 = vmatprep.subr.bf16.mxu1 %v6883_v47 }
  0x68   :  { %v379_v5 = vld [vmem:[#allocation2 + $0xb1] sm:$0xff]  ;;  %v6861_v7 = vld [vmem:[#allocation4 + $0xe4] ss:$36 sps:$4 sm:$0xff]   ;;  %v5916_v8 = vpack.c.bf16 %v283_v4, %v283_v4  ;;  %v179_v32 = vmax.f32 %v5274_v22, %v5290_v24  ;;  %268 = vst.msk [vmem:[#allocation2 + $0xd1] sm:$0xff] %vm257_vm0, %v210_v36 }
  0x69   :  { %v475_v6 = vld [vmem:[#allocation2 + $0xb2] sm:$0xff]  ;;  %v5932_v9 = vpack.c.bf16 %v379_v5, %v379_v5  ;;  %2316 = vmatprep.mubr.bf16.mxu1 %v6861_v7  ;;  %2220 = vmatmul.mubr.bf16.gmra.mxu0 %v5498_v13  ;;  %v1179_v27 = vld [vmem:[#allocation4 + $0x120] sm:$0xff]  ;;  %v6892_v17 = vld [vmem:[%s8249_s1 + $0x148] sm:$0xff]  }
  0x6a   :  { %v5948_v12 = vpack.c.bf16 %v475_v6, %v475_v6  ;;  %363 = vst [vmem:[#allocation4 + $0x144] sm:$0xf] %v5916_v8  ;;  %650 = vst [vmem:[#allocation4 + $0x12c] sm:$0xf] %v5916_v8  ;;  %v211_v40 = vmax.f32 %v179_v32, %v195_v33  ;;  %v6882_v42 = vld [vmem:[%s8249_s1 + $0x110] sm:$0xff]   ;;  %v2976_v45 = vld [vmem:[#allocation3 + $0xa2] sm:$0xff]  ;;  %6392 = vmatpush3.bf16.msra.mxu1 %v6884_v49 }
  0x6b   :  { %459 = vst [vmem:[#allocation4 + $0x148] sm:$0xf] %v5932_v9  ;;  %746 = vst [vmem:[#allocation4 + $0x130] sm:$0xf] %v5932_v9  ;;  %v571_v30 = vld [vmem:[#allocation2 + $0xc0] sm:$0xff]  ;;  %2317 = vmatmul.mubr.bf16.gmra.mxu1 %v6863_v14  ;;  %6334 = vmatpush3.bf16.msra.mxu0 %v6882_v42  ;;  %v6091_v50 = vpack.c.bf16 %v2976_v45, %v2976_v45  ;;  %v6893_v19 = vld [vmem:[%s8249_s1 + $0x108] sm:$0xff]  }
  0x6c   :  { %555 = vst [vmem:[#allocation4 + $0x14c] sm:$0xf] %v5948_v12  ;;  %842 = vst [vmem:[#allocation4 + $0x134] sm:$0xf] %v5948_v12  ;;  %v380_v31 = vld [vmem:[#allocation2 + $0xc1] sm:$0xff]  ;;  %v5964_v35 = vpack.c.bf16 %v571_v30, %v571_v30  ;;  %6335 = vmatprep.subr.bf16.mxu0 %v6892_v17  ;;  %v6894_v21 = vld [vmem:[%s8249_s1 + $0x1d8] sm:$0xff]  }
  0x6d   :  { %v476_v34 = vld [vmem:[#allocation2 + $0xc2] sm:$0xff]  ;;  %v5933_v37 = vpack.c.bf16 %v380_v31, %v380_v31  ;;  %269 = vst.msk [vmem:[#allocation2 + $0xe1] sm:$0xff] %vm257_vm0, %v211_v40  ;;  %2864 = vst [vmem:[#allocation4 + $0x120] sm:$0xf] %v6059_v28  ;;  %v5307_v54 = vld [vmem:[%s8248_s0 + $0x190] ss:$2 sm:$0xff] }
  0x6e   :  { %v5949_v38 = vpack.c.bf16 %v476_v34, %v476_v34  ;;  %651 = vst [vmem:[#allocation4 + $0x150] sm:$0xf] %v5964_v35  ;;  %364 = vst [vmem:[#allocation4 + $0x168] sm:$0xf] %v5964_v35  ;;  %v6885_v51 = vld [vmem:[%s8249_s1 + $0x1e0] sm:$0xff]   ;;  %v6895_v22 = vld [vmem:[%s8249_s1 + $0x198] sm:$0xff]  }
  0x6f   :  { %460 = vst [vmem:[#allocation4 + $0x16c] sm:$0xf] %v5933_v37  ;;  %747 = vst [vmem:[#allocation4 + $0x154] sm:$0xf] %v5933_v37  ;;  %v5275_v52 = vld [vmem:[%s8248_s0 + $0x180] ss:$2 sm:$0xff]  ;;  %6393 = vmatprep.subr.bf16.mxu1 %v6885_v51  ;;  %6336 = vmatpush3.bf16.msra.mxu0 %v6893_v19 }
  0x70   :  { %556 = vst [vmem:[#allocation4 + $0x170] sm:$0xf] %v5949_v38  ;;  %843 = vst [vmem:[#allocation4 + $0x158] sm:$0xf] %v5949_v38  ;;  %v5291_v53 = vld [vmem:[%s8248_s0 + $0x181] ss:$2 sm:$0xff] }
  0x71   :  { %939 = vst [vmem:[#allocation4 + $0x138] sm:$0xf] %v5964_v35  ;;  %1035 = vst [vmem:[#allocation4 + $0x13c] sm:$0xf] %v5933_v37  ;;  %v1180_v48 = vld [vmem:[#allocation4 + $0x128] sm:$0xff]  ;;  %v180_v56 = vmax.f32 %v5275_v52, %v5291_v53  ;;  %v285_v61 = vld [vmem:[#allocation2 + $0xd0] sm:$0xff] }
  0x72   :  { %v1184_v43 = vld [vmem:[#allocation4 + $0x144] sm:$0xff]  ;;  %v5323_v55 = vld [vmem:[%s8248_s0 + $0x191] ss:$2 sm:$0xff]  ;;  %3056 = vst [vmem:[#allocation4 + $0x128] sm:$0xf] %v6091_v50  ;;  %v5918_v0 = vpack.c.bf16 %v285_v61, %v285_v61 }
  0x73   :  { %v6866_v44 = vld [vmem:[#allocation4 + $0x124] ss:$36 sps:$4 sm:$0xff]   ;;  %v5507_v46 = vcombine.low %v1179_v27, %v1184_v43  ;;  %v196_v62 = vmax.f32 %v5307_v54, %v5323_v55  ;;  %v381_v1 = vld [vmem:[#allocation2 + $0xd1] sm:$0xff] }
  0x74   :  { %2960 = vst [vmem:[#allocation4 + $0x124] sm:$0xf] %v6075_v29  ;;  %2227 = vmatprep.mubr.bf16.mxu0 %v6866_v44  ;;  %v5276_v57 = vld [vmem:[%s8248_s0 + $0x1a0] ss:$2 sm:$0xff]  ;;  %v5292_v58 = vld [vmem:[%s8248_s0 + $0x1a1] ss:$2 sm:$0xff]  ;;  %v5934_v3 = vpack.c.bf16 %v381_v1, %v381_v1 }
  0x75   :  { %2228 = vmatmul.mubr.bf16.gmra.mxu0 %v5507_v46  ;;  %v1185_v59 = vld [vmem:[#allocation4 + $0x14c] sm:$0xff]  ;;  %v573_v5 = vld [vmem:[#allocation2 + $0xe0] sm:$0xff]  ;;  %v212_v6 = vmax.f32 %v180_v56, %v196_v62  ;;  %v181_v9 = vmax.f32 %v5276_v57, %v5292_v58  ;;  %365 = vst [vmem:[#allocation4 + $0x18c] sm:$0xf] %v5918_v0  ;;  %652 = vst [vmem:[#allocation4 + $0x174] sm:$0xf] %v5918_v0 }
  0x76   :  { %v6868_v60 = vld [vmem:[#allocation4 + $0x12c] ss:$36 sps:$4 sm:$0xff]   ;;  %v5509_v63 = vcombine.low %v1180_v48, %v1185_v59  ;;  %v382_v7 = vld [vmem:[#allocation2 + $0xe1] sm:$0xff]  ;;  %v5966_v10 = vpack.c.bf16 %v573_v5, %v573_v5  ;;  %940 = vst [vmem:[#allocation4 + $0x15c] sm:$0xf] %v5918_v0 }
  0x77   :  { %v477_v2 = vld [vmem:[#allocation2 + $0xd2] sm:$0xff]  ;;  %2324 = vmatprep.mubr.bf16.mxu1 %v6868_v60  ;;  %v5935_v11 = vpack.c.bf16 %v382_v7, %v382_v7  ;;  %v478_v13 = vld [vmem:[#allocation2 + $0xe2] sm:$0xff]  ;;  %461 = vst [vmem:[#allocation4 + $0x190] sm:$0xf] %v5934_v3  ;;  %270 = vst.msk [vmem:[#allocation2 + $0xf1] sm:$0xff] %vm257_vm0, %v212_v6 }
  0x78   :  { %v5950_v4 = vpack.c.bf16 %v477_v2, %v477_v2  ;;  %v5308_v8 = vld [vmem:[%s8248_s0 + $0x1b0] ss:$2 sm:$0xff]  ;;  %2325 = vmatmul.mubr.bf16.gmra.mxu1 %v5509_v63  ;;  %v5324_v12 = vld [vmem:[%s8248_s0 + $0x1b1] ss:$2 sm:$0xff]  ;;  %v5951_v15 = vpack.c.bf16 %v478_v13, %v478_v13  ;;  %v6890_v16 = vld [vmem:[%s8249_s1 + $0x1a0] sm:$0xff]  }
  0x79   :  { %v197_v14 = vmax.f32 %v5308_v8, %v5324_v12  ;;  %1036 = vst [vmem:[#allocation4 + $0x160] sm:$0xf] %v5934_v3  ;;  %748 = vst [vmem:[#allocation4 + $0x178] sm:$0xf] %v5934_v3  ;;  %6394 = vmatpush3.bf16.msra.mxu1 %v6890_v16  ;;  %v1189_v20 = vld [vmem:[#allocation4 + $0x168] sm:$0xff]  ;;  %v6896_v23 = vld [vmem:[%s8249_s1 + $0x1d0] sm:$0xff]  }
  0x7a   :  { %557 = vst [vmem:[#allocation4 + $0x194] sm:$0xf] %v5950_v4  ;;  %844 = vst [vmem:[#allocation4 + $0x17c] sm:$0xf] %v5950_v4  ;;  %6395 = vmatprep.subr.bf16.mxu1 %v6894_v21  ;;  %v5277_v24 = vld [vmem:[%s8248_s0 + $0x1c0] ss:$2 sm:$0xff] }
  0x7b   :  { %653 = vst [vmem:[#allocation4 + $0x198] sm:$0xf] %v5966_v10  ;;  %366 = vst [vmem:[#allocation4 + $0x1b0] sm:$0xf] %v5966_v10  ;;  %v213_v18 = vmax.f32 %v181_v9, %v197_v14  ;;  %v5293_v25 = vld [vmem:[%s8248_s0 + $0x1c1] ss:$2 sm:$0xff] }
  0x7c   :  { %462 = vst [vmem:[#allocation4 + $0x1b4] sm:$0xf] %v5935_v11  ;;  %749 = vst [vmem:[#allocation4 + $0x19c] sm:$0xf] %v5935_v11  ;;  %v5309_v26 = vld [vmem:[%s8248_s0 + $0x1d0] ss:$2 sm:$0xff]  ;;  %v182_v36 = vmax.f32 %v5277_v24, %v5293_v25 }
  0x7d   :  { %941 = vst [vmem:[#allocation4 + $0x180] sm:$0xf] %v5966_v10  ;;  %1037 = vst [vmem:[#allocation4 + $0x184] sm:$0xf] %v5935_v11  ;;  %6396 = vmatpush3.bf16.msra.mxu1 %v6895_v22  ;;  %v5325_v39 = vld [vmem:[%s8248_s0 + $0x1d1] ss:$2 sm:$0xff] }
  0x7e   :  { %558 = vst [vmem:[#allocation4 + $0x1b8] sm:$0xf] %v5951_v15  ;;  %845 = vst [vmem:[#allocation4 + $0x1a0] sm:$0xf] %v5951_v15  ;;  %v1194_v27 = vld [vmem:[#allocation4 + $0x18c] sm:$0xff]  ;;  %6397 = vmatprep.subr.bf16.mxu1 %v6896_v23  ;;  %v198_v43 = vmax.f32 %v5309_v26, %v5325_v39  ;;  %v6903_v55 = vld [vmem:[%s8249_s1 + $0x140] sm:$0xff]  }
  0x7f   :  { %271 = vst.msk [vmem:[#allocation2 + $0x101] sm:$0xff] %vm257_vm0, %v213_v18  ;;  %v6875_v28 = vld [vmem:[#allocation4 + $0x16c] ss:$36 sps:$4 sm:$0xff]   ;;  %v5516_v31 = vcombine.low %v1189_v20, %v1194_v27  ;;  %v6904_v58 = vld [vmem:[%s8249_s1 + $0x100] sm:$0xff]   ;;  %6337 = vmatprep.subr.bf16.mxu0 %v6903_v55  ;;  %v6912_v16 = vld [vmem:[%s8249_s1 + $0x238] sm:$0xff]  }
  0x80   :  { %v287_v29 = vld [vmem:[#allocation2 + $0xf0] sm:$0xff]  ;;  %2235 = vmatprep.mubr.bf16.mxu0 %v6875_v28  ;;  %v5278_v40 = vld [vmem:[%s8248_s0 + $0x1e0] ss:$2 sm:$0xff]  ;;  %v5294_v41 = vld [vmem:[%s8248_s0 + $0x1e1] ss:$2 sm:$0xff]  ;;  %v214_v51 = vmax.f32 %v182_v36, %v198_v43  ;;  %6338 = vmatpush3.bf16.msra.mxu0 %v6904_v58 }
  0x81   :  { %v6880_v32 = vld [vmem:[#allocation4 + $0x170] ss:$36 sps:$4 sm:$0xff]   ;;  %v5920_v33 = vpack.c.bf16 %v287_v29, %v287_v29  ;;  %2236 = vmatmul.mubr.bf16.gmra.mxu0 %v5516_v31  ;;  %v183_v46 = vmax.f32 %v5278_v40, %v5294_v41  ;;  %v6905_v59 = vld [vmem:[%s8249_s1 + $0x1c8] sm:$0xff]   ;;  %v6907_v61 = vld [vmem:[%s8249_s1 + $0x1c0] sm:$0xff]   ;;  %6739 = vmatprep.subr.bf16.mxu0 %v6912_v16 }
  0x82   :  { %v6877_v30 = vld [vmem:[#allocation4 + $0x174] ss:$36 sps:$4 sm:$0xff]   ;;  %272 = vst.msk [vmem:[#allocation2 + $0x111] sm:$0xff] %vm257_vm0, %v214_v51  ;;  %v6906_v60 = vld [vmem:[%s8249_s1 + $0x188] sm:$0xff]   ;;  %v6910_v12 = vld [vmem:[%s8249_s1 + $0x180] sm:$0xff]  }
  0x83   :  { %v383_v34 = vld [vmem:[#allocation2 + $0xf1] sm:$0xff]  ;;  %2332 = vmatprep.mubr.bf16.mxu1 %v6877_v30  ;;  %367 = vst [vmem:[#allocation4 + $0x1d4] sm:$0xf] %v5920_v33  ;;  %654 = vst [vmem:[#allocation4 + $0x1bc] sm:$0xf] %v5920_v33  ;;  %v851_v17 = vld [vmem:[#allocation2 + $0x20] sm:$0xff] }
  0x84   :  { %v479_v35 = vld [vmem:[#allocation2 + $0xf2] sm:$0xff]  ;;  %v5936_v37 = vpack.c.bf16 %v383_v34, %v383_v34  ;;  %942 = vst [vmem:[#allocation4 + $0x1a4] sm:$0xf] %v5920_v33  ;;  %2333 = vmatmul.mubr.bf16.gmra.mxu1 %v6880_v32  ;;  %v6003_v18 = vpack.c.bf16 %v851_v17, %v851_v17  ;;  %v853_v21 = vld [vmem:[#allocation2 + $0x40] sm:$0xff] }
  0x85   :  { %v5952_v38 = vpack.c.bf16 %v479_v35, %v479_v35  ;;  %v5310_v45 = vld [vmem:[%s8248_s0 + $0x1f0] ss:$2 sm:$0xff]  ;;  %v5326_v49 = vld [vmem:[%s8248_s0 + $0x1f1] ss:$2 sm:$0xff]  ;;  %v6005_v22 = vpack.c.bf16 %v853_v21, %v853_v21  ;;  %v665_v31 = vld [vmem:[#allocation2 + $0x81] sm:$0xff] }
  0x86   :  { %v575_v42 = vld [vmem:[#allocation2 + $0x100] sm:$0xff]  ;;  %463 = vst [vmem:[#allocation4 + $0x1d8] sm:$0xf] %v5936_v37  ;;  %1038 = vst [vmem:[#allocation4 + $0x1a8] sm:$0xf] %v5936_v37  ;;  %v199_v52 = vmax.f32 %v5310_v45, %v5326_v49  ;;  %v6901_v54 = vld [vmem:[%s8249_s1 + $0x190] sm:$0xff]   ;;  %v5978_v34 = vpack.c.bf16 %v665_v31, %v665_v31 }
  0x87   :  { %v384_v44 = vld [vmem:[#allocation2 + $0x101] sm:$0xff]  ;;  %559 = vst [vmem:[#allocation4 + $0x1dc] sm:$0xf] %v5952_v38  ;;  %v5968_v47 = vpack.c.bf16 %v575_v42, %v575_v42  ;;  %750 = vst [vmem:[#allocation4 + $0x1c0] sm:$0xf] %v5936_v37  ;;  %v1199_v56 = vld [vmem:[#allocation4 + $0x1b0] sm:$0xff]  ;;  %6398 = vmatpush3.bf16.msra.mxu1 %v6901_v54 }
  0x88   :  { %v5937_v48 = vpack.c.bf16 %v384_v44, %v384_v44  ;;  %v480_v50 = vld [vmem:[#allocation2 + $0x102] sm:$0xff]  ;;  %846 = vst [vmem:[#allocation4 + $0x1c4] sm:$0xf] %v5952_v38  ;;  %v215_v57 = vmax.f32 %v183_v46, %v199_v52  ;;  %6399 = vmatprep.subr.bf16.mxu1 %v6905_v59  ;;  %v658_v0 = vld [vmem:[#allocation2 + $0x11] sm:$0xff]  ;;  %931 = vst [vmem:[#allocation4 + $0x18] sm:$0xf] %v6003_v18 }
  0x89   :  { %v5953_v53 = vpack.c.bf16 %v480_v50, %v480_v50  ;;  %655 = vst [vmem:[#allocation4 + $0x1e0] sm:$0xf] %v5968_v47  ;;  %368 = vst [vmem:[#allocation4 + $0x1f8] sm:$0xf] %v5968_v47  ;;  %v5971_v2 = vpack.c.bf16 %v658_v0, %v658_v0  ;;  %v754_v3 = vld [vmem:[#allocation2 + $0x12] sm:$0xff]  ;;  %v761_v32 = vld [vmem:[#allocation2 + $0x82] sm:$0xff] }
  0x8a   :  { %464 = vst [vmem:[#allocation4 + $0x1fc] sm:$0xf] %v5937_v48  ;;  %751 = vst [vmem:[#allocation4 + $0x1e4] sm:$0xf] %v5937_v48  ;;  %v5987_v6 = vpack.c.bf16 %v754_v3, %v754_v3  ;;  %v289_v7 = vld [vmem:[#allocation2 + $0x110] sm:$0xff]  ;;  %v5994_v35 = vpack.c.bf16 %v761_v32, %v761_v32  ;;  %v6926_v44 = vld [vmem:[%s8249_s1 + $0x228] sm:$0xff]  }
  0x8b   :  { %943 = vst [vmem:[#allocation4 + $0x1c8] sm:$0xf] %v5968_v47  ;;  %1039 = vst [vmem:[#allocation4 + $0x1cc] sm:$0xf] %v5937_v48  ;;  %6400 = vmatpush3.bf16.msra.mxu1 %v6906_v60  ;;  %v385_v8 = vld [vmem:[#allocation2 + $0x111] sm:$0xff]  ;;  %v5922_v9 = vpack.c.bf16 %v289_v7, %v289_v7  ;;  %v6933_v50 = vld [vmem:[%s8249_s1 + $0x220] sm:$0xff]  }
  0x8c   :  { %560 = vst [vmem:[#allocation4 + $0x200] sm:$0xf] %v5953_v53  ;;  %847 = vst [vmem:[#allocation4 + $0x1e8] sm:$0xf] %v5953_v53  ;;  %6401 = vmatprep.subr.bf16.mxu1 %v6907_v61  ;;  %v5938_v10 = vpack.c.bf16 %v385_v8, %v385_v8  ;;  %v481_v11 = vld [vmem:[#allocation2 + $0x112] sm:$0xff]  ;;  %v1043_v0 = vld [vmem:[#allocation2 + $0x22] sm:$0xff] }
  0x8d   :  { %1135 = vst [vmem:[#allocation4 + $0x1d0] sm:$0xf] %v5953_v53  ;;  %273 = vst.msk [vmem:[#allocation2 + $0x121] sm:$0xff] %vm257_vm0, %v215_v57  ;;  %v1204_v62 = vld [vmem:[#allocation4 + $0x1d4] sm:$0xff]  ;;  %v5954_v13 = vpack.c.bf16 %v481_v11, %v481_v11  ;;  %v6913_v30 = vld [vmem:[#allocation4 + $0x1c] ss:$36 sps:$4 sm:$0xff]  }
  0x8e   :  { %v6886_v63 = vld [vmem:[#allocation4 + $0x1b4] ss:$36 sps:$4 sm:$0xff]   ;;  %v5525_v1 = vcombine.low %v1199_v56, %v1204_v62  ;;  %738 = vst [vmem:[#allocation4 + $0x10] sm:$0xf] %v5971_v2  ;;  %834 = vst [vmem:[#allocation4 + $0x14] sm:$0xf] %v5987_v6 }
  0x8f   :  { %2243 = vmatprep.mubr.bf16.mxu0 %v6886_v63  ;;  %v6891_v5 = vld [vmem:[#allocation4 + $0x1b8] ss:$36 sps:$4 sm:$0xff]   ;;  %369 = vst [vmem:[#allocation4 + $0x21c] sm:$0xf] %v5922_v9  ;;  %465 = vst [vmem:[#allocation4 + $0x220] sm:$0xf] %v5938_v10  ;;  %6402 = vmatpush3.bf16.msra.mxu1 %v6910_v12 }
  0x90   :  { %v6888_v4 = vld [vmem:[#allocation4 + $0x1bc] ss:$36 sps:$4 sm:$0xff]   ;;  %2244 = vmatmul.mubr.bf16.gmra.mxu0 %v5525_v1  ;;  %656 = vst [vmem:[#allocation4 + $0x204] sm:$0xf] %v5922_v9  ;;  %944 = vst [vmem:[#allocation4 + $0x1ec] sm:$0xf] %v5922_v9 }
  0x91   :  { %2340 = vmatprep.mubr.bf16.mxu1 %v6888_v4  ;;  %1040 = vst [vmem:[#allocation4 + $0x1f0] sm:$0xf] %v5938_v10  ;;  %752 = vst [vmem:[#allocation4 + $0x208] sm:$0xf] %v5938_v10  ;;  %v660_v19 = vld [vmem:[#allocation2 + $0x31] sm:$0xff]  ;;  %v1045_v2 = vld [vmem:[#allocation2 + $0x42] sm:$0xff]  ;;  %v6035_v4 = vpack.c.bf16 %v1043_v0, %v1043_v0 }
  0x92   :  { %2341 = vmatmul.mubr.bf16.gmra.mxu1 %v6891_v5  ;;  %561 = vst [vmem:[#allocation4 + $0x224] sm:$0xf] %v5954_v13  ;;  %848 = vst [vmem:[#allocation4 + $0x20c] sm:$0xf] %v5954_v13  ;;  %v5973_v20 = vpack.c.bf16 %v660_v19, %v660_v19  ;;  %v1209_v23 = vld [vmem:[#allocation4 + $0x1f8] sm:$0xff]  ;;  %v6919_v37 = vld [vmem:[%s8249_s1 + $0x230] sm:$0xff]   ;;  %v6037_v7 = vpack.c.bf16 %v1045_v2, %v1045_v2 }
  0x93   :  { %1136 = vst [vmem:[#allocation4 + $0x1f4] sm:$0xf] %v5954_v13  ;;  %933 = vst [vmem:[#allocation4 + $0x60] sm:$0xf] %v6005_v22  ;;  %v6916_v36 = vld [vmem:[#allocation4 + $0x5c] ss:$36 sps:$4 sm:$0xff]  }
  0x94   :  { %v577_v14 = vld [vmem:[#allocation2 + $0x120] sm:$0xff]  ;;  %740 = vst [vmem:[#allocation4 + $0x58] sm:$0xf] %v5973_v20  ;;  %v954_v38 = vld [vmem:[#allocation2 + $0x91] sm:$0xff]  ;;  %745 = vst [vmem:[#allocation4 + $0x10c] sm:$0xf] %v5978_v34 }
  0x95   :  { %v5970_v15 = vpack.c.bf16 %v577_v14, %v577_v14  ;;  %v6908_v24 = vld [vmem:[#allocation4 + $0x14] ss:$36 sps:$4 sm:$0xff]   ;;  %841 = vst [vmem:[#allocation4 + $0x110] sm:$0xf] %v5994_v35  ;;  %v6026_v40 = vpack.c.bf16 %v954_v38, %v954_v38  ;;  %1033 = vst [vmem:[#allocation4 + $0xf4] sm:$0xf] %v5978_v34 }
  0x96   :  { %v1214_v25 = vld [vmem:[#allocation4 + $0x21c] sm:$0xff]  ;;  %v6911_v33 = vld [vmem:[#allocation4 + $0x10] ss:$36 sps:$4 sm:$0xff]   ;;  %1129 = vst [vmem:[#allocation4 + $0xf8] sm:$0xf] %v5994_v35  ;;  %v6953_v10 = vld [vmem:[%s8249_s1 + $0x208] sm:$0xff]  }
  0x97   :  { %657 = vst [vmem:[#allocation4 + $0x228] sm:$0xf] %v5970_v15  ;;  %945 = vst [vmem:[#allocation4 + $0x210] sm:$0xf] %v5970_v15  ;;  %v6897_v26 = vld [vmem:[#allocation4 + $0x1fc] ss:$36 sps:$4 sm:$0xff]   ;;  %v5534_v27 = vcombine.low %v1209_v23, %v1214_v25 }
  0x98   :  { %2251 = vmatprep.mubr.bf16.mxu0 %v6897_v26  ;;  %v6915_v39 = vld [vmem:[#allocation4 + $0x18] ss:$36 sps:$4 sm:$0xff]   ;;  %v6920_v41 = vld [vmem:[#allocation4 + $0x64] ss:$36 sps:$4 sm:$0xff]   ;;  %1034 = vst [vmem:[#allocation4 + $0x118] sm:$0xf] %v6026_v40 }
  0x99   :  { %v6902_v29 = vld [vmem:[#allocation4 + $0x200] ss:$36 sps:$4 sm:$0xff]   ;;  %2252 = vmatmul.mubr.bf16.gmra.mxu0 %v5534_v27  ;;  %v3360_v42 = vld [vmem:[#allocation3 + $0x90] sm:$0xff]  ;;  %v6939_v54 = vld [vmem:[%s8249_s1 + $0x218] sm:$0xff]   ;;  %1123 = vst [vmem:[#allocation4 + $0x20] sm:$0xf] %v6035_v4 }
  0x9a   :  { %2389 = vmatprep.mubr.bf16.mxu0 %v6908_v24  ;;  %v3456_v43 = vld [vmem:[#allocation3 + $0x91] sm:$0xff]  ;;  %v6154_v46 = vpack.c.bf16 %v3360_v42, %v3360_v42  ;;  %v6923_v48 = vld [vmem:[#allocation4 + $0xa4] ss:$36 sps:$4 sm:$0xff]   ;;  %1125 = vst [vmem:[#allocation4 + $0x68] sm:$0xf] %v6037_v7 }
  0x9b   :  { %v6918_v45 = vld [vmem:[#allocation4 + $0x58] ss:$36 sps:$4 sm:$0xff]   ;;  %v6170_v47 = vpack.c.bf16 %v3456_v43, %v3456_v43  ;;  %v6922_v49 = vld [vmem:[#allocation4 + $0x60] ss:$36 sps:$4 sm:$0xff]   ;;  %v6927_v51 = vld [vmem:[#allocation4 + $0xac] ss:$36 sps:$4 sm:$0xff]  }
  0x9c   :  { %3440 = vst [vmem:[#allocation4 + $0x114] sm:$0xf] %v6154_v46  ;;  %v6925_v53 = vld [vmem:[#allocation4 + $0xa0] ss:$36 sps:$4 sm:$0xff]   ;;  %v6929_v57 = vld [vmem:[#allocation4 + $0xa8] ss:$36 sps:$4 sm:$0xff]  }
  0x9d   :  { %v673_v55 = vld [vmem:[#allocation2 + $0x121] sm:$0xff]  ;;  %v6930_v60 = vld [vmem:[#allocation4 + $0xec] ss:$36 sps:$4 sm:$0xff]   ;;  %v6936_v32 = vld [vmem:[#allocation4 + $0x134] ss:$36 sps:$4 sm:$0xff]  }
  0x9e   :  { %v6899_v28 = vld [vmem:[#allocation4 + $0x204] ss:$36 sps:$4 sm:$0xff]   ;;  %v5986_v58 = vpack.c.bf16 %v673_v55, %v673_v55  ;;  %v6946_v61 = vld [vmem:[%s8249_s1 + $0x210] sm:$0xff]   ;;  %v6942_v43 = vld [vmem:[#allocation4 + $0x138] ss:$36 sps:$4 sm:$0xff]  }
  0x9f   :  { %2348 = vmatprep.mubr.bf16.mxu1 %v6899_v28  ;;  %v7729_v52 = vld [vmem:[#allocation4 + $0xf4] ss:$36 sps:$4 sm:$0xff]   ;;  %v769_v56 = vld [vmem:[#allocation2 + $0x122] sm:$0xff] }
  0xa0   :  { %2349 = vmatmul.mubr.bf16.gmra.mxu1 %v6902_v29  ;;  %3536 = vst [vmem:[#allocation4 + $0x118] sm:$0xf] %v6170_v47  ;;  %v6002_v59 = vpack.c.bf16 %v769_v56, %v769_v56  ;;  %v962_v62 = vld [vmem:[#allocation2 + $0x131] sm:$0xff]  ;;  %753 = vst [vmem:[#allocation4 + $0x22c] sm:$0xf] %v5986_v58  ;;  %v1047_v8 = vld [vmem:[#allocation2 + $0x62] sm:$0xff] }
  0xa1   :  { %2486 = vmatprep.mubr.bf16.mxu1 %v6913_v30  ;;  %2390 = vmatmul.mubr.bf16.vlgmr.msra.gmra.mxu0 %v6911_v33  ;;  %v6034_v63 = vpack.c.bf16 %v962_v62, %v962_v62  ;;  %1041 = vst [vmem:[#allocation4 + $0x214] sm:$0xf] %v5986_v58  ;;  %v1044_v1 = vld [vmem:[#allocation2 + $0x32] sm:$0xff]  ;;  %v6039_v13 = vpack.c.bf16 %v1047_v8, %v1047_v8  ;;  %v1051_v17 = vld [vmem:[#allocation2 + $0xc2] sm:$0xff] }
  0xa2   :  { %6740 = vmatpush3.bf16.msra.mxu0 %v6912_v16  ;;  %2397 = vmatprep.mubr.bf16.mxu0 %v6916_v36  ;;  %849 = vst [vmem:[#allocation4 + $0x230] sm:$0xf] %v6002_v59  ;;  %1137 = vst [vmem:[#allocation4 + $0x218] sm:$0xf] %v6002_v59  ;;  %v3368_v3 = vld [vmem:[#allocation3 + $0x130] sm:$0xff]  ;;  %v6036_v5 = vpack.c.bf16 %v1044_v1, %v1044_v1  ;;  %v1053_v19 = vld [vmem:[#allocation2 + $0xe2] sm:$0xff]  ;;  %v6043_v21 = vpack.c.bf16 %v1051_v17, %v1051_v17 }
  0xa3   :  { %6741 = vmatprep.subr.bf16.mxu0 %v6919_v37  ;;  %v1046_v6 = vld [vmem:[#allocation2 + $0x52] sm:$0xff]  ;;  %1042 = vst [vmem:[#allocation4 + $0x238] sm:$0xf] %v6034_v63  ;;  %v6932_v20 = vld [vmem:[#allocation4 + $0xe8] ss:$36 sps:$4 sm:$0xff]   ;;  %v6045_v24 = vpack.c.bf16 %v1053_v19, %v1053_v19  ;;  %v6162_v29 = vpack.c.bf16 %v3368_v3, %v3368_v3  ;;  %v6960_v35 = vld [vmem:[%s8249_s1 + $0x200] sm:$0xff]  }
  0xa4   :  { %v1048_v9 = vld [vmem:[#allocation2 + $0x72] sm:$0xff]  ;;  %v6038_v12 = vpack.c.bf16 %v1046_v6, %v1046_v6  ;;  %1124 = vst [vmem:[#allocation4 + $0x44] sm:$0xf] %v6036_v5  ;;  %1127 = vst [vmem:[#allocation4 + $0xb0] sm:$0xf] %v6039_v13  ;;  %v6975_v7 = vld [vmem:[#allocation5 + $0x68] sm:$0xff]  }
  0xa5   :  { %v3464_v11 = vld [vmem:[#allocation3 + $0x131] sm:$0xff]  ;;  %v6040_v14 = vpack.c.bf16 %v1048_v9, %v1048_v9  ;;  %1131 = vst [vmem:[#allocation4 + $0x140] sm:$0xf] %v6043_v21  ;;  %1133 = vst [vmem:[#allocation4 + $0x188] sm:$0xf] %v6045_v24  ;;  %v6976_v8 = vld [vmem:[#allocation5 + $0x28] sm:$0xff]  }
  0xa6   :  { %6742 = vmatpush3.bf16.msra.mxu0 %v6919_v37  ;;  %v1050_v15 = vld [vmem:[#allocation2 + $0x92] sm:$0xff]  ;;  %1126 = vst [vmem:[#allocation4 + $0x8c] sm:$0xf] %v6038_v12  ;;  %v6178_v30 = vpack.c.bf16 %v3464_v11, %v3464_v11  ;;  %v6940_v36 = vld [vmem:[#allocation4 + $0x13c] ss:$36 sps:$4 sm:$0xff]  }
  0xa7   :  { %6743 = vmatprep.subr.bf16.mxu0 %v6926_v44  ;;  %v6042_v16 = vpack.c.bf16 %v1050_v15, %v1050_v15  ;;  %v1052_v18 = vld [vmem:[#allocation2 + $0xd2] sm:$0xff]  ;;  %1128 = vst [vmem:[#allocation4 + $0xd4] sm:$0xf] %v6040_v14  ;;  %3448 = vst [vmem:[#allocation4 + $0x234] sm:$0xf] %v6162_v29 }
  0xa8   :  { %2487 = vmatmul.mubr.bf16.vlgmr.msra.gmra.mxu1 %v6915_v39  ;;  %v6044_v22 = vpack.c.bf16 %v1052_v18, %v1052_v18  ;;  %v1054_v23 = vld [vmem:[#allocation2 + $0xf2] sm:$0xff]  ;;  %v6959_v56 = vld [vmem:[#allocation4 + $0x208] ss:$36 sps:$4 sm:$0xff]  }
  0xa9   :  { %2494 = vmatprep.mubr.bf16.mxu1 %v6920_v41  ;;  %2398 = vmatmul.mubr.bf16.gmra.mxu0 %v6918_v45  ;;  %v1172_v25 = vld [vmem:[#allocation4 + $0xf0] sm:$0xff]  ;;  %1130 = vst [vmem:[#allocation4 + $0x11c] sm:$0xf] %v6042_v16  ;;  %v6046_v27 = vpack.c.bf16 %v1054_v23, %v1054_v23  ;;  %v6947_v45 = vld [vmem:[#allocation4 + $0x184] ss:$36 sps:$4 sm:$0xff]   ;;  %v6971_v0 = vld [vmem:[#allocation5 + $0x78] sm:$0xff]  }
  0xaa   :  { %2405 = vmatprep.mubr.bf16.mxu0 %v6923_v48  ;;  %6744 = vmatpush3.bf16.msra.mxu0 %v6926_v44  ;;  %v1177_v26 = vld [vmem:[#allocation4 + $0x114] sm:$0xff]  ;;  %1132 = vst [vmem:[#allocation4 + $0x164] sm:$0xf] %v6044_v22  ;;  %v6943_v44 = vld [vmem:[#allocation4 + $0x17c] ss:$36 sps:$4 sm:$0xff]  }
  0xab   :  { %6745 = vmatprep.subr.bf16.mxu0 %v6933_v50  ;;  %v1058_v28 = vld [vmem:[#allocation2 + $0x132] sm:$0xff]  ;;  %1134 = vst [vmem:[#allocation4 + $0x1ac] sm:$0xf] %v6046_v27  ;;  %v5504_v34 = vcombine.low %v1172_v25, %v1177_v26  ;;  %v6950_v48 = vld [vmem:[#allocation4 + $0x1c4] ss:$36 sps:$4 sm:$0xff]   ;;  %6467 = vmatprep.subr.bf16.mxu1 %v6971_v0 }
  0xac   :  { %v6050_v31 = vpack.c.bf16 %v1058_v28, %v1058_v28  ;;  %v3552_v33 = vld [vmem:[#allocation3 + $0x92] sm:$0xff]  ;;  %v6977_v22 = vld [vmem:[#allocation5 + $0x60] sm:$0xff]  }
  0xad   :  { %v6961_v37 = vld [vmem:[#allocation4 + $0x214] ss:$36 sps:$4 sm:$0xff]   ;;  %v6186_v38 = vpack.c.bf16 %v3552_v33, %v3552_v33  ;;  %v6964_v59 = vld [vmem:[#allocation4 + $0x68] ss:$36 sps:$4 sm:$0xff]   ;;  %v6978_v23 = vld [vmem:[#allocation5 + $0x20] sm:$0xff]  }
  0xae   :  { %6746 = vmatpush3.bf16.msra.mxu0 %v6933_v50  ;;  %1138 = vst [vmem:[#allocation4 + $0x23c] sm:$0xf] %v6050_v31  ;;  %3544 = vst [vmem:[#allocation4 + $0x238] sm:$0xf] %v6178_v30  ;;  %v3560_v39 = vld [vmem:[#allocation3 + $0x132] sm:$0xff] }
  0xaf   :  { %6747 = vmatprep.subr.bf16.mxu0 %v6939_v54  ;;  %v6938_v40 = vld [vmem:[#allocation4 + $0x130] ss:$36 sps:$4 sm:$0xff]   ;;  %v6194_v42 = vpack.c.bf16 %v3560_v39, %v3560_v39  ;;  %v6945_v47 = vld [vmem:[#allocation4 + $0x178] ss:$36 sps:$4 sm:$0xff]  }
  0xb0   :  { %2495 = vmatmul.mubr.bf16.gmra.mxu1 %v6922_v49  ;;  %v6966_v41 = vld [vmem:[#allocation4 + $0xf8] ss:$36 sps:$4 sm:$0xff]   ;;  %v6949_v49 = vld [vmem:[#allocation4 + $0x180] ss:$36 sps:$4 sm:$0xff]   ;;  %v6954_v50 = vld [vmem:[#allocation4 + $0x1cc] ss:$36 sps:$4 sm:$0xff]  }
  0xb1   :  { %2502 = vmatprep.mubr.bf16.mxu1 %v6927_v51  ;;  %2406 = vmatmul.mubr.bf16.gmra.mxu0 %v6925_v53  ;;  %3632 = vst [vmem:[#allocation4 + $0x11c] sm:$0xf] %v6186_v38  ;;  %v6952_v51 = vld [vmem:[#allocation4 + $0x1c0] ss:$36 sps:$4 sm:$0xff]   ;;  %v6956_v53 = vld [vmem:[#allocation4 + $0x1c8] ss:$36 sps:$4 sm:$0xff]  }
  0xb2   :  { %2413 = vmatprep.mubr.bf16.mxu0 %v6930_v60  ;;  %6748 = vmatpush3.bf16.msra.mxu0 %v6939_v54  ;;  %v1212_v54 = vld [vmem:[#allocation4 + $0x210] sm:$0xff]  ;;  %v6968_v62 = vld [vmem:[#allocation4 + $0x188] ss:$36 sps:$4 sm:$0xff]   ;;  %v6972_v1 = vld [vmem:[#allocation5 + $0x38] sm:$0xff]  }
  0xb3   :  { %6749 = vmatprep.subr.bf16.mxu0 %v6946_v61  ;;  %v6965_v60 = vld [vmem:[#allocation4 + $0xb0] ss:$36 sps:$4 sm:$0xff]   ;;  %6468 = vmatpush3.bf16.msra.mxu1 %v6972_v1 }
  0xb4   :  { %v6969_v63 = vld [vmem:[#allocation4 + $0x1d0] ss:$36 sps:$4 sm:$0xff]  }
  0xb5   :  { %v6970_v46 = vld [vmem:[#allocation4 + $0x218] ss:$36 sps:$4 sm:$0xff]   ;;  %v6973_v2 = vld [vmem:[#allocation5 + $0x70] sm:$0xff]  }
  0xb6   :  { %6750 = vmatpush3.bf16.msra.mxu0 %v6946_v61  ;;  %3640 = vst [vmem:[#allocation4 + $0x23c] sm:$0xf] %v6194_v42  ;;  %v1217_v55 = vld [vmem:[#allocation4 + $0x234] sm:$0xff]  ;;  %v6967_v61 = vld [vmem:[#allocation4 + $0x140] ss:$36 sps:$4 sm:$0xff]   ;;  %6469 = vmatprep.subr.bf16.mxu1 %v6973_v2 }
  0xb7   :  { %6751 = vmatprep.subr.bf16.mxu0 %v6953_v10  ;;  %v5540_v58 = vcombine.low %v1212_v54, %v1217_v55  ;;  %v6974_v3 = vld [vmem:[#allocation5 + $0x30] sm:$0xff]   ;;  %v6981_v42 = vld [vmem:[#allocation5 + $0xf8] sm:$0xff]  }
  0xb8   :  { %2503 = vmatmul.mubr.bf16.gmra.mxu1 %v6929_v57  ;;  %v6963_v57 = vld [vmem:[#allocation4 + $0x20] ss:$36 sps:$4 sm:$0xff]  }
  0xb9   :  { %2510 = vmatprep.mubr.bf16.mxu1 %v7729_v52  ;;  %2414 = vmatmul.mubr.bf16.gmra.mxu0 %v6932_v20  ;;  %v6957_v52 = vld [vmem:[#allocation4 + $0x20c] ss:$36 sps:$4 sm:$0xff]  }
  0xba   :  { %2421 = vmatprep.mubr.bf16.mxu0 %v6936_v32  ;;  %6752 = vmatpush3.bf16.msra.mxu0 %v6953_v10 }
  0xbb   :  { %6753 = vmatprep.subr.bf16.mxu0 %v6960_v35  ;;  %6470 = vmatpush3.bf16.msra.mxu1 %v6974_v3 }
  0xbc   :  { %6471 = vmatprep.subr.bf16.mxu1 %v6975_v7 }
  0xbe   :  { %6754 = vmatpush3.bf16.msra.mxu0 %v6960_v35 }
  0xbf   :  { %6472 = vmatpush3.bf16.msra.mxu1 %v6976_v8  ;;  %6531 = vmatprep.subr.bf16.mxu0 %v6981_v42  ;;  %v6980_v8 = vld [vmem:[#allocation5 + $0x18] sm:$0xff]  }
  0xc0   :  { %2511 = vmatmul.mubr.bf16.gmra.mxu1 %v5504_v34  ;;  %6473 = vmatprep.subr.bf16.mxu1 %v6977_v22 }
  0xc1   :  { %2518 = vmatprep.mubr.bf16.mxu1 %v6940_v36  ;;  %2422 = vmatmul.mubr.bf16.gmra.mxu0 %v6938_v40 }
  0xc2   :  { %2429 = vmatprep.mubr.bf16.mxu0 %v6943_v44  ;;  %v6982_v44 = vld [vmem:[#allocation5 + $0xb8] sm:$0xff]  }
  0xc3   :  { %6474 = vmatpush3.bf16.msra.mxu1 %v6978_v23  ;;  %v6989_v23 = vld [vmem:[#allocation5 + $0x48] sm:$0xff]  }
  0xc8   :  { %2519 = vmatmul.mubr.bf16.gmra.mxu1 %v6942_v43 }
  0xc9   :  { %2526 = vmatprep.mubr.bf16.mxu1 %v6947_v45  ;;  %2430 = vmatmul.mubr.bf16.gmra.mxu0 %v6945_v47 }
  0xca   :  { %2437 = vmatprep.mubr.bf16.mxu0 %v6950_v48 }
  0xd0   :  { %2527 = vmatmul.mubr.bf16.gmra.mxu1 %v6949_v49 }
  0xd1   :  { %2534 = vmatprep.mubr.bf16.mxu1 %v6954_v50  ;;  %2438 = vmatmul.mubr.bf16.gmra.mxu0 %v6952_v51  ;;  %v6984_v51 = vld [vmem:[#allocation5 + $0xf0] sm:$0xff]  }
  0xd2   :  { %2445 = vmatprep.mubr.bf16.mxu0 %v6957_v52 }
  0xd8   :  { %2535 = vmatmul.mubr.bf16.gmra.mxu1 %v6956_v53  ;;  %v6986_v53 = vld [vmem:[#allocation5 + $0xb0] sm:$0xff]  }
  0xd9   :  { %2542 = vmatprep.mubr.bf16.mxu1 %v6961_v37  ;;  %2446 = vmatmul.mubr.bf16.gmra.mxu0 %v6959_v56 }
  0xda   :  { %6755 = vmatprep.mubr.bf16.mxu0 %v6963_v57 }
  0xe0   :  { %2543 = vmatmul.mubr.bf16.gmra.mxu1 %v5540_v58 }
  0xe1   :  { %6756 = vmatmul.mubr.bf16.vlgmr.msra.gmra.mxu0 %v6964_v59 }
  0xe2   :  { %6759 = vmatprep.mubr.bf16.mxu0 %v6965_v60  ;;  %6532 = vmatpush3.bf16.msra.mxu0 %v6982_v44  ;;  %v6987_v60 = vld [vmem:[#allocation5 + $0xe8] sm:$0xff]  }
  0xe3   :  { %6533 = vmatprep.subr.bf16.mxu0 %v6984_v51 }
  0xe6   :  { %6534 = vmatpush3.bf16.msra.mxu0 %v6986_v53 }
  0xe7   :  { %6535 = vmatprep.subr.bf16.mxu0 %v6987_v60 }
  0xe9   :  { %6760 = vmatmul.mubr.bf16.gmra.mxu0 %v6966_v41 }
  0xea   :  { %6763 = vmatprep.mubr.bf16.mxu0 %v6967_v61 }
  0xf1   :  { %6764 = vmatmul.mubr.bf16.gmra.mxu0 %v6968_v62  ;;  %v6988_v62 = vld [vmem:[#allocation5 + $0xa8] sm:$0xff]  }
  0xf2   :  { %6767 = vmatprep.mubr.bf16.mxu0 %v6969_v63  ;;  %6536 = vmatpush3.bf16.msra.mxu0 %v6988_v62 }
  0xf9   :  { %6768 = vmatmul.mubr.bf16.gmra.mxu0 %v6970_v46 }
 0x111   :  { %v6211_v4 = vpop.f32.mrf.mxu0 }
 0x113   :  { %v6275_v5 = vpop.f32.mrf.mxu1  ;;  %v6212_v6 = vpop.f32.mrf.mxu0 }
 0x114   :  { %v6213_v9 = vadd.f32 %v6212_v6, %v6211_v4  ;;  %v6990_v6 = vld [vmem:[#allocation5 + $0xe0] sm:$0xff]  }
 0x115   :  { %v6276_v10 = vpop.f32.mrf.mxu1  ;;  %v6214_v11 = vpop.f32.mrf.mxu0  ;;  %6537 = vmatprep.subr.bf16.mxu0 %v6990_v6  ;;  %v7005_v6 = vld [vmem:[#allocation5 + $0x178] sm:$0xff]  }
 0x116   :  { %v6277_v12 = vadd.f32 %v6276_v10, %v6275_v5  ;;  %v6979_v5 = vld [vmem:[#allocation5 + $0x58] sm:$0xff]  }
 0x117   :  { %v6278_v13 = vpop.f32.mrf.mxu1  ;;  %v6215_v14 = vpop.f32.mrf.mxu0  ;;  %6475 = vmatprep.subr.bf16.mxu1 %v6979_v5 }
 0x118   :  { %v7744_v15 = vadd.f32 %v6277_v12, %v6213_v9  ;;  %v6216_v16 = vadd.f32 %v6215_v14, %v6214_v11  ;;  %v6992_v9 = vld [vmem:[#allocation5 + $0xa0] sm:$0xff]   ;;  %6476 = vmatpush3.bf16.msra.mxu1 %v6980_v8  ;;  %v6983_v14 = vld [vmem:[#allocation5 + $0x50] sm:$0xff]  }
 0x119   :  { %v6279_v17 = vpop.f32.mrf.mxu1  ;;  %v6217_v18 = vpop.f32.mrf.mxu0  ;;  %6538 = vmatpush3.bf16.msra.mxu0 %v6992_v9  ;;  %6477 = vmatprep.subr.bf16.mxu1 %v6983_v14 }
 0x11a   :  { %v6280_v19 = vadd.f32 %v6279_v17, %v6278_v13 }
 0x11b   :  { %v6281_v20 = vpop.f32.mrf.mxu1  ;;  %v6218_v21 = vpop.f32.mrf.mxu0 }
 0x11c   :  { %v7746_v24 = vadd.f32 %v6280_v19, %v6216_v16  ;;  %v6219_v25 = vadd.f32 %v6218_v21, %v6217_v18  ;;  %v6993_v16 = vld [vmem:[#allocation5 + $0xd8] sm:$0xff]   ;;  %v6985_v18 = vld [vmem:[#allocation5 + $0x10] sm:$0xff]  }
 0x11d   :  { %v6282_v26 = vpop.f32.mrf.mxu1  ;;  %v6220_v27 = vpop.f32.mrf.mxu0  ;;  %v6994_v19 = vld [vmem:[#allocation5 + $0x98] sm:$0xff]   ;;  %6539 = vmatprep.subr.bf16.mxu0 %v6993_v16  ;;  %6478 = vmatpush3.bf16.msra.mxu1 %v6985_v18 }
 0x11e   :  { %v6283_v28 = vadd.f32 %v6282_v26, %v6281_v20  ;;  %6540 = vmatpush3.bf16.msra.mxu0 %v6994_v19  ;;  %6479 = vmatprep.subr.bf16.mxu1 %v6989_v23  ;;  %v7037_v18 = vld [vmem:[#allocation5 + $0x1f8] sm:$0xff]  }
 0x11f   :  { %v6284_v29 = vpop.f32.mrf.mxu1  ;;  %v6221_v30 = vpop.f32.mrf.mxu0 }
 0x120   :  { %v7748_v31 = vadd.f32 %v6283_v28, %v6219_v25  ;;  %v6222_v32 = vadd.f32 %v6221_v30, %v6220_v27  ;;  %v6996_v25 = vld [vmem:[#allocation5 + $0xd0] sm:$0xff]   ;;  %v6991_v27 = vld [vmem:[#allocation5 + $0x8] sm:$0xff]  }
 0x121   :  { %v6285_v33 = vpop.f32.mrf.mxu1  ;;  %v6223_v34 = vpop.f32.mrf.mxu0  ;;  %v6998_v28 = vld [vmem:[#allocation5 + $0x90] sm:$0xff]   ;;  %6541 = vmatprep.subr.bf16.mxu0 %v6996_v25  ;;  %6480 = vmatpush3.bf16.msra.mxu1 %v6991_v27 }
 0x122   :  { %v6286_v35 = vadd.f32 %v6285_v33, %v6284_v29  ;;  %6542 = vmatpush3.bf16.msra.mxu0 %v6998_v28 }
 0x123   :  { %v6287_v36 = vpop.f32.mrf.mxu1  ;;  %v6224_v37 = vpop.f32.mrf.mxu0 }
 0x124   :  { %v7750_v38 = vadd.f32 %v6286_v35, %v6222_v32  ;;  %v6225_v39 = vadd.f32 %v6224_v37, %v6223_v34  ;;  %v6995_v34 = vld [vmem:[#allocation5 + $0x40] sm:$0xff]   ;;  %v6999_v35 = vld [vmem:[#allocation5 + $0xc8] sm:$0xff]  }
 0x125   :  { %v6288_v40 = vpop.f32.mrf.mxu1  ;;  %v6226_v41 = vpop.f32.mrf.mxu0  ;;  %v7000_v37 = vld [vmem:[#allocation5 + $0x88] sm:$0xff]   ;;  %6481 = vmatprep.subr.bf16.mxu1 %v6995_v34  ;;  %6543 = vmatprep.subr.bf16.mxu0 %v6999_v35 }
 0x126   :  { %v6289_v43 = vadd.f32 %v6288_v40, %v6287_v36  ;;  %v6997_v36 = vld [vmem:[#allocation5] sm:$0xff]   ;;  %6544 = vmatpush3.bf16.msra.mxu0 %v7000_v37 }
 0x127   :  { %v6290_v45 = vpop.f32.mrf.mxu1  ;;  %v6227_v46 = vpop.f32.mrf.mxu0  ;;  %6482 = vmatpush3.bf16.msra.mxu1 %v6997_v36 }
 0x128   :  { %v7752_v47 = vadd.f32 %v6289_v43, %v6225_v39  ;;  %v6228_v48 = vadd.f32 %v6227_v46, %v6226_v41  ;;  %v7004_v41 = vld [vmem:[#allocation5 + $0xc0] sm:$0xff]   ;;  %6595 = vmatprep.subr.bf16.mxu1 %v7005_v6 }
 0x129   :  { %v6291_v49 = vpop.f32.mrf.mxu1  ;;  %v6229_v50 = vpop.f32.mrf.mxu0  ;;  %v7006_v43 = vld [vmem:[#allocation5 + $0x80] sm:$0xff]   ;;  %6545 = vmatprep.subr.bf16.mxu0 %v7004_v41 }
 0x12a   :  { %8256 = vst [vmem:[#allocation8_spill] sm:$0xff] %v7752_v47  ;;  %v6292_v52 = vadd.f32 %v6291_v49, %v6290_v45  ;;  %6546 = vmatpush3.bf16.msra.mxu0 %v7006_v43 }
 0x12b   :  { %v6293_v54 = vpop.f32.mrf.mxu1  ;;  %v6230_v55 = vpop.f32.mrf.mxu0  ;;  %6659 = vmatprep.subr.bf16.mxu0 %v7037_v18 }
 0x12c   :  { %v7754_v56 = vadd.f32 %v6292_v52, %v6228_v48  ;;  %v6231_v57 = vadd.f32 %v6230_v55, %v6229_v50 }
 0x12d   :  { %v6294_v58 = vpop.f32.mrf.mxu1  ;;  %v6232_v59 = vpop.f32.mrf.mxu0 }
 0x12e   :  { %8257 = vst [vmem:[#allocation9_spill] sm:$0xff] %v7754_v56  ;;  %v6295_v61 = vadd.f32 %v6294_v58, %v6293_v54 }
 0x12f   :  { %v6296_v63 = vpop.f32.mrf.mxu1  ;;  %v6233_v0 = vpop.f32.mrf.mxu0 }
 0x130   :  { %v7756_v1 = vadd.f32 %v6295_v61, %v6231_v57  ;;  %v6234_v2 = vadd.f32 %v6233_v0, %v6232_v59 }
 0x131   :  { %v6297_v3 = vpop.f32.mrf.mxu1 }
 0x132   :  { %8258 = vst [vmem:[#allocation10_spill] sm:$0xff] %v7756_v1  ;;  %v6298_v7 = vadd.f32 %v6297_v3, %v6296_v63 }
 0x134   :  { %v7758_v11 = vadd.f32 %v6298_v7, %v6234_v2 }
 0x135   :  { %v6235_v4 = vpop.f32.mrf.mxu0 }
 0x136   :  { %8259 = vst [vmem:[#allocation11_spill] sm:$0xff] %v7758_v11 }
 0x137   :  { %v6236_v10 = vpop.f32.mrf.mxu0 }
 0x138   :  { %v6237_v12 = vadd.f32 %v6236_v10, %v6235_v4  ;;  %v6299_v17 = vpop.f32.mrf.mxu1 }
 0x139   :  { %v6238_v13 = vpop.f32.mrf.mxu0 }
 0x13a   :  { %v6300_v20 = vpop.f32.mrf.mxu1 }
 0x13b   :  { %v6239_v21 = vpop.f32.mrf.mxu0  ;;  %v6301_v22 = vadd.f32 %v6300_v20, %v6299_v17 }
 0x13c   :  { %v6302_v26 = vpop.f32.mrf.mxu1  ;;  %v6240_v30 = vadd.f32 %v6239_v21, %v6238_v13 }
 0x13d   :  { %v7760_v29 = vadd.f32 %v6301_v22, %v6237_v12 }
 0x13e   :  { %v6303_v32 = vpop.f32.mrf.mxu1 }
 0x13f   :  { %8260 = vst [vmem:[#allocation12_spill] sm:$0xff] %v7760_v29  ;;  %v6304_v33 = vadd.f32 %v6303_v32, %v6302_v26 }
 0x141   :  { %v7762_v39 = vadd.f32 %v6304_v33, %v6240_v30  ;;  %v6241_v40 = vpop.f32.mrf.mxu0 }
 0x143   :  { %8261 = vst [vmem:[#allocation13_spill] sm:$0xff] %v7762_v39  ;;  %v6242_v44 = vpop.f32.mrf.mxu0 }
 0x144   :  { %v6305_v42 = vpop.f32.mrf.mxu1  ;;  %v6243_v45 = vadd.f32 %v6242_v44, %v6241_v40 }
 0x145   :  { %v6244_v49 = vpop.f32.mrf.mxu0 }
 0x146   :  { %v6306_v46 = vpop.f32.mrf.mxu1 }
 0x147   :  { %v6307_v48 = vadd.f32 %v6306_v46, %v6305_v42  ;;  %v6245_v52 = vpop.f32.mrf.mxu0 }
 0x148   :  { %v6308_v50 = vpop.f32.mrf.mxu1  ;;  %v6246_v53 = vadd.f32 %v6245_v52, %v6244_v49 }
 0x149   :  { %v7764_v51 = vadd.f32 %v6307_v48, %v6243_v45 }
 0x14a   :  { %v6309_v54 = vpop.f32.mrf.mxu1 }
 0x14b   :  { %8262 = vst [vmem:[#allocation14_spill] sm:$0xff] %v7764_v51  ;;  %v6310_v55 = vadd.f32 %v6309_v54, %v6308_v50 }
 0x14d   :  { %v7766_v57 = vadd.f32 %v6310_v55, %v6246_v53 }
 0x14f   :  { %8263 = vst [vmem:[#allocation15_spill] sm:$0xff] %v7766_v57 }
 0x150   :  { %v6247_v58 = vpop.f32.mrf.mxu0 }
 0x152   :  { %v6311_v59 = vpop.f32.mrf.mxu1  ;;  %v6248_v60 = vpop.f32.mrf.mxu0 }
 0x153   :  { %v6249_v61 = vadd.f32 %v6248_v60, %v6247_v58 }
 0x154   :  { %v6312_v62 = vpop.f32.mrf.mxu1  ;;  %v6250_v63 = vpop.f32.mrf.mxu0 }
 0x155   :  { %v6313_v0 = vadd.f32 %v6312_v62, %v6311_v59 }
 0x156   :  { %v6314_v2 = vpop.f32.mrf.mxu1  ;;  %v6251_v3 = vpop.f32.mrf.mxu0 }
 0x157   :  { %v7768_v4 = vadd.f32 %v6313_v0, %v6249_v61  ;;  %v6252_v5 = vadd.f32 %v6251_v3, %v6250_v63 }
 0x158   :  { %v6315_v7 = vpop.f32.mrf.mxu1 }
 0x159   :  { %8264 = vst [vmem:[#allocation16_spill] sm:$0xff] %v7768_v4  ;;  %v6316_v8 = vadd.f32 %v6315_v7, %v6314_v2  ;;  %v6253_v10 = vpop.f32.mrf.mxu0 }
 0x15b   :  { %v7770_v9 = vadd.f32 %v6316_v8, %v6252_v5  ;;  %v6254_v13 = vpop.f32.mrf.mxu0 }
 0x15c   :  { %v7774_v14 = vadd.f32 %v6254_v13, %v6253_v10 }
 0x15d   :  { %8265 = vst [vmem:[#allocation17_spill] sm:$0xff] %v7770_v9  ;;  %v6256_v17 = vpop.f32.mrf.mxu0 }
 0x15f   :  { %v6257_v20 = vpop.f32.mrf.mxu0 }
 0x160   :  { %v7772_v12 = vpop.f32.mrf.mxu1  ;;  %v6258_v1 = vadd.f32 %v6257_v20, %v6256_v17 }
 0x161   :  { %v6339_v22 = vpop.f32.mrf.mxu0 }
 0x162   :  { %v6318_v16 = vpop.f32.mrf.mxu1 }
 0x163   :  { %v6340_v23 = vpop.f32.mrf.mxu0 }
 0x164   :  { %v6320_v19 = vpop.f32.mrf.mxu1  ;;  %v6341_v56 = vadd.f32 %v6340_v23, %v6339_v22 }
 0x165   :  { %v6342_v26 = vpop.f32.mrf.mxu0 }
 0x166   :  { %v6321_v21 = vpop.f32.mrf.mxu1 }
 0x167   :  { %v6343_v28 = vpop.f32.mrf.mxu0 }
 0x168   :  { %v7776_v25 = vpop.f32.mrf.mxu1 }
 0x169   :  { %v6345_v32 = vpop.f32.mrf.mxu0 }
 0x16a   :  { %v7778_v27 = vpop.f32.mrf.mxu1 }
 0x16b   :  { %v6346_v34 = vpop.f32.mrf.mxu0  ;;  %v6405_v20 = vadd.f32 %v7778_v27, %v7776_v25  ;;  %v8280_v27 = vld [vmem:[#allocation9_spill] sm:$0xff] }
 0x16c   :  { %v7780_v30 = vpop.f32.mrf.mxu1 }
 0x16d   :  { %v6348_v36 = vpop.f32.mrf.mxu0 }
 0x16e   :  { %v7782_v33 = vpop.f32.mrf.mxu1 }
 0x16f   :  { %v6349_v40 = vpop.f32.mrf.mxu0  ;;  %v6408_v23 = vadd.f32 %v7782_v33, %v7780_v30 }
 0x170   :  { %v6409_v35 = vpop.f32.mrf.mxu1 }
 0x171   :  { %v6351_v42 = vpop.f32.mrf.mxu0 }
 0x172   :  { %v6410_v37 = vpop.f32.mrf.mxu1 }
 0x173   :  { %v6352_v44 = vpop.f32.mrf.mxu0 }
 0x174   :  { %v7784_v41 = vpop.f32.mrf.mxu1 }
 0x175   :  { %v6354_v46 = vpop.f32.mrf.mxu0 }
 0x176   :  { %v7786_v43 = vpop.f32.mrf.mxu1 }
 0x177   :  { %v6355_v49 = vpop.f32.mrf.mxu0 }
 0x178   :  { %v7788_v45 = vpop.f32.mrf.mxu1 }
 0x179   :  { %8266 = vst [vmem:[#allocation18_spill] sm:$0xff] %v7788_v45  ;;  %v6357_v52 = vpop.f32.mrf.mxu0 }
 0x17a   :  { %v6416_v48 = vpop.f32.mrf.mxu1 }
 0x17b   :  { %v6358_v54 = vpop.f32.mrf.mxu0 }
 0x17c   :  { %v6418_v50 = vpop.f32.mrf.mxu1 }
 0x17d   :  { %v6360_v58 = vpop.f32.mrf.mxu0 }
 0x17e   :  { %v6419_v53 = vpop.f32.mrf.mxu1 }
 0x17f   :  { %v6361_v60 = vpop.f32.mrf.mxu0 }
 0x180   :  { %v6421_v55 = vpop.f32.mrf.mxu1 }
 0x181   :  { %v6363_v62 = vpop.f32.mrf.mxu0 }
 0x182   :  { %v6422_v59 = vpop.f32.mrf.mxu1 }
 0x183   :  { %v6364_v0 = vpop.f32.mrf.mxu0 }
 0x184   :  { %v6424_v61 = vpop.f32.mrf.mxu1 }
 0x185   :  { %v6366_v3 = vpop.f32.mrf.mxu0 }
 0x186   :  { %v6425_v63 = vpop.f32.mrf.mxu1 }
 0x187   :  { %v6367_v6 = vpop.f32.mrf.mxu0 }
 0x188   :  { %v6427_v2 = vpop.f32.mrf.mxu1 }
 0x189   :  { %v7792_v8 = vpop.f32.mrf.mxu0 }
 0x18a   :  { %v6428_v5 = vpop.f32.mrf.mxu1  ;;  %8268 = vst [vmem:[#allocation20_spill] sm:$0xff] %v7792_v8  ;;  %v6347_v8 = vadd.f32 %v6346_v34, %v6345_v32  ;;  %v6356_v34 = vadd.f32 %v6355_v49, %v6354_v46  ;;  %v7856_v49 = vld [vmem:[%s8251_s3] ss:$0 sm:$0xff] }
 0x18b   :  { %v7796_v13 = vpop.f32.mrf.mxu0  ;;  %v6429_v46 = vadd.f32 %v6428_v5, %v6427_v2 }
 0x18c   :  { %v7790_v7 = vpop.f32.mrf.mxu1  ;;  %8270 = vst [vmem:[#allocation22_spill] sm:$0xff] %v7796_v13  ;;  %v6319_v13 = vadd.f32 %v6318_v16, %v7772_v12  ;;  %v6359_v12 = vadd.f32 %v6358_v54, %v6357_v52 }
 0x18d   :  { %8267 = vst [vmem:[#allocation19_spill] sm:$0xff] %v7790_v7  ;;  %v6372_v9 = vpop.f32.mrf.mxu0 }
 0x18e   :  { %v7794_v10 = vpop.f32.mrf.mxu1  ;;  %v7823_v32 = vadd.f32 %v6319_v13, %v7774_v14  ;;  %v6365_v14 = vadd.f32 %v6364_v0, %v6363_v62  ;;  %v8286_v13 = vld [vmem:[#allocation13_spill] sm:$0xff] }
 0x18f   :  { %8269 = vst [vmem:[#allocation21_spill] sm:$0xff] %v7794_v10  ;;  %v6373_v57 = vpop.f32.mrf.mxu0 }
 0x190   :  { %v7798_v18 = vpop.f32.mrf.mxu1  ;;  %v6374_v62 = vadd.f32 %v6373_v57, %v6372_v9 }
 0x191   :  { %8271 = vst [vmem:[#allocation23_spill] sm:$0xff] %v7798_v18  ;;  %v7802_v51 = vpop.f32.mrf.mxu0 }
 0x192   :  { %v7800_v4 = vpop.f32.mrf.mxu1  ;;  %8273 = vst [vmem:[#allocation25_spill] sm:$0xff] %v7802_v51  ;;  %v6344_v51 = vadd.f32 %v6343_v28, %v6342_v26 }
 0x193   :  { %8272 = vst [vmem:[#allocation24_spill] sm:$0xff] %v7800_v4  ;;  %v7806_v29 = vpop.f32.mrf.mxu0  ;;  %v6322_v4 = vadd.f32 %v6321_v21, %v6320_v19  ;;  %v2392_v19 = vadd.f32 %v6341_v56, %v7744_v15  ;;  %v8278_v15 = vld [vmem:[#allocation8_spill] sm:$0xff] }
 0x194   :  { %v7804_v39 = vpop.f32.mrf.mxu1  ;;  %8275 = vst [vmem:[#allocation27_spill] sm:$0xff] %v7806_v29  ;;  %v6411_v29 = vadd.f32 %v6410_v37, %v6409_v35  ;;  %v2395_v22 = vadd.f32 %v6344_v51, %v7746_v24  ;;  %v6420_v37 = vadd.f32 %v6419_v53, %v6418_v50  ;;  %v8281_v24 = vld [vmem:[#allocation10_spill] sm:$0xff] }
 0x195   :  { %8274 = vst [vmem:[#allocation26_spill] sm:$0xff] %v7804_v39  ;;  %v7808_v11 = vpop.f32.mrf.mxu0  ;;  %v2400_v39 = vadd.f32 %v6347_v8, %v7748_v31  ;;  %v7827_v17 = vadd.f32 %v6322_v4, %v6258_v1  ;;  %v6362_v31 = vadd.f32 %v6361_v60, %v6360_v58  ;;  %v6414_v1 = vadd.f32 %v7786_v43, %v7784_v41  ;;  %v8279_v4 = vld [vmem:[#allocation18_spill] sm:$0xff]  ;;  %v8283_v43 = vld [vmem:[#allocation12_spill] sm:$0xff] }
 0x196   :  { %8276 = vst [vmem:[#allocation28_spill] sm:$0xff] %v7808_v11  ;;  %v7810_v7 = vpop.f32.mrf.mxu1  ;;  %v6350_v11 = vadd.f32 %v6349_v40, %v6348_v36  ;;  %v6417_v25 = vadd.f32 %v6416_v48, %v8279_v4  ;;  %v2411_v36 = vadd.f32 %v6356_v34, %v8280_v27  ;;  %v2416_v51 = vadd.f32 %v6359_v12, %v8281_v24  ;;  %v8285_v60 = vld [vmem:[#allocation22_spill] sm:$0xff]  ;;  %v8287_v12 = vld [vmem:[#allocation19_spill] sm:$0xff] }
 0x197   :  { %8277 = vst [vmem:[#allocation29_spill] sm:$0xff] %v7810_v7  ;;  %v7812_v10 = vpop.f32.mrf.mxu0  ;;  %v6353_v7 = vadd.f32 %v6352_v44, %v6351_v42  ;;  %v2497_v28 = vadd.f32 %v6411_v29, %v2400_v39  ;;  %v6423_v40 = vadd.f32 %v6422_v59, %v6421_v55  ;;  %v7847_v29 = vld [vmem:[%s8250_s2] ss:$0 sm:$0xff]  ;;  %v6426_v39 = vadd.f32 %v6425_v63, %v6424_v61 }
 0x198   :  { %v7817_v45 = vpop.f32.mrf.mxu1  ;;  %v2403_v35 = vadd.f32 %v6350_v11, %v7750_v38  ;;  %v8282_v38 = vld [vmem:[#allocation11_spill] sm:$0xff]  ;;  %v2489_v42 = vadd.f32 %v6405_v20, %v2392_v19  ;;  %v2424_v44 = vadd.f32 %v6365_v14, %v8283_v43  ;;  %v6368_v48 = vadd.f32 %v6367_v6, %v6366_v3  ;;  %v8284_v59 = vld [vmem:[#allocation20_spill] sm:$0xff]  ;;  %v8288_v19 = vld [vmem:[#allocation21_spill] sm:$0xff] }
 0x199   :  { %v7815_v18 = vpop.f32.mrf.mxu0  ;;  %v2408_v56 = vadd.f32 %v6353_v7, %v8278_v15  ;;  %v2419_v11 = vadd.f32 %v6362_v31, %v8282_v38  ;;  %v2492_v52 = vadd.f32 %v6408_v23, %v2395_v22  ;;  %v6371_v61 = vadd.f32 %v8285_v60, %v8284_v59  ;;  %v8289_v31 = vld [vmem:[#allocation25_spill] sm:$0xff]  ;;  %v8291_v15 = vld [vmem:[#allocation14_spill] sm:$0xff]  ;;  %v8292_v4 = vld [vmem:[#allocation23_spill] sm:$0xff] }
 0x19a   :  { %v6440_v21 = vpop.f32.mrf.mxu1  ;;  %v2500_v55 = vadd.f32 %v6414_v1, %v2403_v35  ;;  %v2513_v0 = vadd.f32 %v6423_v40, %v2416_v51  ;;  %v7861_v2 = vadd.f32 %v6420_v37, %v2411_v36  ;;  %v2427_v34 = vadd.f32 %v6368_v48, %v8286_v13  ;;  %v8294_v36 = vld [vmem:[#allocation15_spill] sm:$0xff]  ;;  %v8297_v43 = vld [vmem:[#allocation16_spill] sm:$0xff]  ;;  %v8299_v13 = vld [vmem:[#allocation17_spill] sm:$0xff] }
 0x19b   :  { %v7820_v47 = vpop.f32.mrf.mxu0  ;;  %v2505_v58 = vadd.f32 %v6417_v25, %v2408_v56  ;;  %v2516_v8 = vadd.f32 %v6426_v39, %v2419_v11  ;;  %v6432_v20 = vadd.f32 %v8288_v19, %v8287_v12  ;;  %v8290_v22 = vld [vmem:[#allocation27_spill] sm:$0xff]  ;;  %v7872_v23 = vadd.f32 %v6429_v46, %v2424_v44  ;;  %v8293_v25 = vld [vmem:[#allocation24_spill] sm:$0xff] }
 0x19c   :  { %v7850_v33 = vpop.f32.mrf.mxu1  ;;  %v6377_v57 = vadd.f32 %v8290_v22, %v8289_v31  ;;  %v2432_v56 = vadd.f32 %v6371_v61, %v8291_v15  ;;  %v6435_v27 = vadd.f32 %v8293_v25, %v8292_v4  ;;  %v2435_v37 = vadd.f32 %v6374_v62, %v8294_v36  ;;  %v8295_v24 = vld [vmem:[#allocation26_spill] sm:$0xff] }
 0x19d   :  { %v7825_v16 = vpop.f32.mrf.mxu0  ;;  %v6441_v46 = vadd.f32 %v6440_v21, %v7817_v45  ;;  %v8298_v48 = vld [vmem:[#allocation28_spill] sm:$0xff]  ;;  %v6383_v61 = vadd.f32 %v7820_v47, %v7815_v18 }
 0x19e   :  { %v7863_v3 = vpop.f32.mrf.mxu1  ;;  %v8296_v51 = vld [vmem:[#allocation29_spill] sm:$0xff]  ;;  %v2440_v44 = vadd.f32 %v6377_v57, %v8297_v43  ;;  %v2529_v21 = vadd.f32 %v6435_v27, %v2432_v56 }
 0x19f   :  { %v7835_v26 = vpop.f32.mrf.mxu0  ;;  %v6438_v40 = vadd.f32 %v8296_v51, %v8295_v24  ;;  %v7908_v22 = vadd.f32 %v7863_v3, %v7850_v33  ;;  %v2448_v57 = vadd.f32 %v6383_v61, %v7823_v32 }
 0x1a0   :  { %v6445_v38 = vpop.f32.mrf.mxu1  ;;  %v7901_v19 = vadd.f32 %v6441_v46, %v2440_v44  ;;  %v6386_v33 = vadd.f32 %v7835_v26, %v7825_v16 }
 0x1a1   :  { %v6757_v30 = vpop.f32.mrf.mxu0  ;;  %v7899_v12 = vadd.f32 %v6438_v40, %v2435_v37 }
 0x1a2   :  { %v2594_v41 = vadd.f32 %v6757_v30, %v2497_v28 }
 0x1a3   :  { %v2585_v50 = vpop.f32.mrf.mxu0 }
 0x1a4   :  { %v2657_v53 = vmul.f32 %v7847_v29, %v2594_v41  ;;  %v2586_v54 = vadd.f32 %v2585_v50, %v2489_v42  ;;  %v6380_v50 = vadd.f32 %v7812_v10, %v8298_v48  ;;  %v6446_v10 = vpop.f32.mrf.mxu1 }
 0x1a5   :  { %v6758_v63 = vpop.f32.mrf.mxu0 }
 0x1a6   :  { %v2680_v5 = vadd.f32 %v7856_v49, %v2657_v53  ;;  %v2655_v6 = vmul.f32 %v7847_v29, %v2586_v54  ;;  %v2597_v7 = vadd.f32 %v6758_v63, %v2500_v55  ;;  %v7892_v63 = vadd.f32 %v6432_v20, %v2427_v34  ;;  %v7911_v15 = vpop.f32.mrf.mxu1 }
 0x1a7   :  { %v2588_v9 = vpop.f32.mrf.mxu0 }
 0x1a8   :  { %v2696_v14 = vmax.f32 %v2680_v5, 0.0  ;;  %v2678_v28 = vadd.f32 %v7856_v49, %v2655_v6  ;;  %v2658_v35 = vmul.f32 %v7847_v29, %v2597_v7  ;;  %v2589_v1 = vadd.f32 %v2588_v9, %v2492_v52  ;;  %v6449_v44 = vpop.f32.mrf.mxu1 }
 0x1a9   :  { %v6761_v30 = vpop.f32.mrf.mxu0  ;;  %v6447_v9 = vadd.f32 %v6446_v10, %v6445_v38  ;;  %v6450_v10 = vadd.f32 %v6449_v44, %v7911_v15 }
 0x1aa   :  { %2762 = vst [vmem:[#allocation3 + $0x31] sm:$0xff] %v2696_v14  ;;  %v6070_v11 = vpack.c.bf16 %v2696_v14, %v2696_v14  ;;  %v2694_v39 = vmax.f32 %v2678_v28, 0.0  ;;  %v2681_v41 = vadd.f32 %v7856_v49, %v2658_v35  ;;  %v2656_v42 = vmul.f32 %v7847_v29, %v2589_v1 }
 0x1ab   :  { %v2610_v52 = vadd.f32 %v6761_v30, %v2513_v0  ;;  %v2601_v53 = vpop.f32.mrf.mxu0  ;;  %v2545_v43 = vadd.f32 %v6447_v9, %v2448_v57 }
 0x1ac   :  { %2955 = vst [vmem:[#allocation4 + $0x70] sm:$0xf] %v6070_v11  ;;  %3242 = vst [vmem:[#allocation4 + $0x58] sm:$0xf] %v6070_v11  ;;  %v6068_v54 = vpack.c.bf16 %v2694_v39, %v2694_v39  ;;  %v2697_v55 = vmax.f32 %v2681_v41, 0.0  ;;  %v2679_v59 = vadd.f32 %v7856_v49, %v2656_v42  ;;  %v2602_v60 = vadd.f32 %v2601_v53, %v2505_v58 }
 0x1ad   :  { %3530 = vst [vmem:[#allocation4 + $0x40] sm:$0xf] %v6070_v11  ;;  %2760 = vst [vmem:[#allocation3 + $0x11] sm:$0xff] %v2694_v39  ;;  %v2661_v62 = vmul.f32 %v7847_v29, %v2610_v52  ;;  %v6762_v45 = vpop.f32.mrf.mxu0  ;;  %v7896_v58 = vadd.f32 %v6380_v50, %v8299_v13  ;;  %v7922_v53 = vadd.f32 %v6386_v33, %v7827_v17 }
 0x1ae   :  { %2953 = vst [vmem:[#allocation4 + $0x28] sm:$0xf] %v6068_v54  ;;  %3240 = vst [vmem:[#allocation4 + $0x10] sm:$0xf] %v6068_v54  ;;  %v6071_v0 = vpack.c.bf16 %v2697_v55, %v2697_v55  ;;  %v2695_v5 = vmax.f32 %v2679_v59, 0.0  ;;  %v2659_v6 = vmul.f32 %v7847_v29, %v2602_v60  ;;  %v2613_v7 = vadd.f32 %v6762_v45, %v2516_v8 }
 0x1af   :  { %2763 = vst [vmem:[#allocation3 + $0x41] sm:$0xff] %v2697_v55  ;;  %v2684_v47 = vadd.f32 %v7856_v49, %v2661_v62  ;;  %v2604_v18 = vpop.f32.mrf.mxu0 }
 0x1b0   :  { %2956 = vst [vmem:[#allocation4 + $0x94] sm:$0xf] %v6071_v0  ;;  %3243 = vst [vmem:[#allocation4 + $0x7c] sm:$0xf] %v6071_v0  ;;  %v6069_v34 = vpack.c.bf16 %v2695_v5, %v2695_v5  ;;  %v2682_v20 = vadd.f32 %v7856_v49, %v2659_v6  ;;  %v2662_v31 = vmul.f32 %v7847_v29, %v2613_v7 }
 0x1b1   :  { %3531 = vst [vmem:[#allocation4 + $0x64] sm:$0xf] %v6071_v0  ;;  %2761 = vst [vmem:[#allocation3 + $0x21] sm:$0xff] %v2695_v5  ;;  %v2605_v8 = vadd.f32 %v2604_v18, %v7861_v2  ;;  %v2779_v14 = vld [vmem:[#allocation3 + $0x30] sm:$0xff]  ;;  %v2700_v35 = vmax.f32 %v2684_v47, 0.0  ;;  %v6765_v1 = vpop.f32.mrf.mxu0 }
 0x1b2   :  { %v2971_v28 = vld [vmem:[#allocation3 + $0x32] sm:$0xff]  ;;  %v6054_v56 = vpack.c.bf16 %v2779_v14, %v2779_v14  ;;  %2954 = vst [vmem:[#allocation4 + $0x4c] sm:$0xf] %v6069_v34  ;;  %3241 = vst [vmem:[#allocation4 + $0x34] sm:$0xf] %v6069_v34  ;;  %v2698_v25 = vmax.f32 %v2682_v20, 0.0  ;;  %v2685_v2 = vadd.f32 %v7856_v49, %v2662_v31  ;;  %v2626_v37 = vadd.f32 %v6765_v1, %v2529_v21 }
 0x1b3   :  { %v6086_v4 = vpack.c.bf16 %v2971_v28, %v2971_v28  ;;  %3529 = vst [vmem:[#allocation4 + $0x1c] sm:$0xf] %v6069_v34  ;;  %2766 = vst [vmem:[#allocation3 + $0x71] sm:$0xff] %v2700_v35  ;;  %v6074_v27 = vpack.c.bf16 %v2700_v35, %v2700_v35  ;;  %v2660_v36 = vmul.f32 %v7847_v29, %v2605_v8  ;;  %v2617_v24 = vpop.f32.mrf.mxu0 }
 0x1b4   :  { %v2777_v3 = vld [vmem:[#allocation3 + $0x10] sm:$0xff]  ;;  %2859 = vst [vmem:[#allocation4 + $0x6c] sm:$0xf] %v6054_v56  ;;  %3146 = vst [vmem:[#allocation4 + $0x54] sm:$0xf] %v6054_v56  ;;  %v6072_v30 = vpack.c.bf16 %v2698_v25, %v2698_v25  ;;  %v2701_v38 = vmax.f32 %v2685_v2, 0.0  ;;  %v2665_v39 = vmul.f32 %v7847_v29, %v2626_v37  ;;  %v2618_v41 = vadd.f32 %v2617_v24, %v7872_v23 }
 0x1b5   :  { %v2969_v32 = vld [vmem:[#allocation3 + $0x12] sm:$0xff]  ;;  %3051 = vst [vmem:[#allocation4 + $0x74] sm:$0xf] %v6086_v4  ;;  %3338 = vst [vmem:[#allocation4 + $0x5c] sm:$0xf] %v6086_v4  ;;  %v6052_v51 = vpack.c.bf16 %v2777_v3, %v2777_v3  ;;  %v2683_v11 = vadd.f32 %v7856_v49, %v2660_v36  ;;  %v6766_v42 = vpop.f32.mrf.mxu0  ;;  %v7934_v34 = vadd.f32 %v7908_v22, %v7896_v58 }
 0x1b6   :  { %3434 = vst [vmem:[#allocation4 + $0x3c] sm:$0xf] %v6054_v56  ;;  %3626 = vst [vmem:[#allocation4 + $0x44] sm:$0xf] %v6086_v4  ;;  %v6084_v40 = vpack.c.bf16 %v2969_v32, %v2969_v32  ;;  %v2780_v16 = vld [vmem:[#allocation3 + $0x40] sm:$0xff]  ;;  %v6122_v50 = vpack.c.bf16 %v2701_v38, %v2701_v38  ;;  %v2629_v52 = vadd.f32 %v6766_v42, %v7899_v12  ;;  %v7937_v4 = vld [vmem:[#allocation5 + $0x138] sm:$0xff]  }
 0x1b7   :  { %2764 = vst [vmem:[#allocation3 + $0x51] sm:$0xff] %v2698_v25  ;;  %v2972_v26 = vld [vmem:[#allocation3 + $0x42] sm:$0xff]  ;;  %2959 = vst [vmem:[#allocation4 + $0x100] sm:$0xf] %v6074_v27  ;;  %v6055_v46 = vpack.c.bf16 %v2780_v16, %v2780_v16  ;;  %v2699_v55 = vmax.f32 %v2683_v11, 0.0  ;;  %v2688_v59 = vadd.f32 %v7856_v49, %v2665_v39  ;;  %v2663_v60 = vmul.f32 %v7847_v29, %v2618_v41  ;;  %v2620_v61 = vpop.f32.mrf.mxu0 }
 0x1b8   :  { %3246 = vst [vmem:[#allocation4 + $0xe8] sm:$0xf] %v6074_v27  ;;  %3534 = vst [vmem:[#allocation4 + $0xd0] sm:$0xf] %v6074_v27  ;;  %v6087_v48 = vpack.c.bf16 %v2972_v26, %v2972_v26  ;;  %v2778_v23 = vld [vmem:[#allocation3 + $0x20] sm:$0xff]  ;;  %v2666_v17 = vmul.f32 %v7847_v29, %v2629_v52  ;;  %v2621_v21 = vadd.f32 %v2620_v61, %v7892_v63  ;;  %v7942_v27 = vld [vmem:[#allocation5 + $0x170] sm:$0xff]  }
 0x1b9   :  { %2857 = vst [vmem:[#allocation4 + $0x24] sm:$0xf] %v6052_v51  ;;  %3049 = vst [vmem:[#allocation4 + $0x2c] sm:$0xf] %v6084_v40  ;;  %v2970_v54 = vld [vmem:[#allocation3 + $0x22] sm:$0xff]  ;;  %v6053_v62 = vpack.c.bf16 %v2778_v23, %v2778_v23  ;;  %v6073_v0 = vpack.c.bf16 %v2699_v55, %v2699_v55  ;;  %v2704_v5 = vmax.f32 %v2688_v59, 0.0  ;;  %v2686_v6 = vadd.f32 %v7856_v49, %v2663_v60  ;;  %v6769_v7 = vpop.f32.mrf.mxu0 }
 0x1ba   :  { %3144 = vst [vmem:[#allocation4 + $0xc] sm:$0xf] %v6052_v51  ;;  %3336 = vst [vmem:[#allocation4 + $0x14] sm:$0xf] %v6084_v40  ;;  %v6085_v45 = vpack.c.bf16 %v2970_v54, %v2970_v54  ;;  %v2783_v13 = vld [vmem:[#allocation3 + $0x70] sm:$0xff]  ;;  %v2689_v18 = vadd.f32 %v7856_v49, %v2666_v17  ;;  %v2664_v63 = vmul.f32 %v7847_v29, %v2621_v21  ;;  %v7953_v61 = vld [vmem:[#allocation5 + $0x1b8] sm:$0xff]  }
 0x1bb   :  { %2957 = vst [vmem:[#allocation4 + $0xb8] sm:$0xf] %v6072_v30  ;;  %3244 = vst [vmem:[#allocation4 + $0xa0] sm:$0xf] %v6072_v30  ;;  %v2975_v47 = vld [vmem:[#allocation3 + $0x72] sm:$0xff]  ;;  %v2642_v12 = vadd.f32 %v6769_v7, %v2545_v43  ;;  %v6058_v20 = vpack.c.bf16 %v2783_v13, %v2783_v13  ;;  %v6078_v9 = vpack.c.bf16 %v2704_v5, %v2704_v5  ;;  %v2702_v14 = vmax.f32 %v2686_v6, 0.0  ;;  %v2633_v28 = vpop.f32.mrf.mxu0 }
 0x1bc   :  { %3532 = vst [vmem:[#allocation4 + $0x88] sm:$0xf] %v6072_v30  ;;  %2767 = vst [vmem:[#allocation3 + $0x81] sm:$0xff] %v2701_v38  ;;  %v6090_v31 = vpack.c.bf16 %v2975_v47, %v2975_v47  ;;  %v2705_v15 = vmax.f32 %v2689_v18, 0.0  ;;  %v2687_v56 = vadd.f32 %v7856_v49, %v2664_v63  ;;  %v2634_v33 = vadd.f32 %v2633_v28, %v7901_v19  ;;  %v7003_v30 = vld [vmem:[#allocation4 + $0x4] ss:$36 sps:$4 sm:$0xff]  }
 0x1bd   :  { %3627 = vst [vmem:[#allocation4 + $0x68] sm:$0xf] %v6087_v48  ;;  %2860 = vst [vmem:[#allocation4 + $0x90] sm:$0xf] %v6055_v46  ;;  %v6076_v25 = vpack.c.bf16 %v2702_v14, %v2702_v14  ;;  %v2669_v2 = vmul.f32 %v7847_v29, %v2642_v12  ;;  %v2548_v3 = vadd.f32 %v6450_v10, %v7922_v53  ;;  %v6770_v32 = vpop.f32.mrf.mxu0  ;;  %4697 = vmatprep.mubr.bf16.mxu1 %v7003_v30  ;;  %v7019_v43 = vld [vmem:[#allocation5 + $0x130] sm:$0xff]   ;;  %v7948_v53 = vld [vmem:[#allocation5 + $0x168] sm:$0xff]  }
 0x1be   :  { %3052 = vst [vmem:[#allocation4 + $0x98] sm:$0xf] %v6087_v48  ;;  %3147 = vst [vmem:[#allocation4 + $0x78] sm:$0xf] %v6055_v46  ;;  %v2781_v8 = vld [vmem:[#allocation3 + $0x50] sm:$0xff]  ;;  %v6079_v24 = vpack.c.bf16 %v2705_v15, %v2705_v15  ;;  %v2703_v51 = vmax.f32 %v2687_v56, 0.0  ;;  %v2667_v38 = vmul.f32 %v7847_v29, %v2634_v33 }
 0x1bf   :  { %3339 = vst [vmem:[#allocation4 + $0x80] sm:$0xf] %v6087_v48  ;;  %3435 = vst [vmem:[#allocation4 + $0x60] sm:$0xf] %v6055_v46  ;;  %v2973_v57 = vld [vmem:[#allocation3 + $0x52] sm:$0xff]  ;;  %v6056_v35 = vpack.c.bf16 %v2781_v8, %v2781_v8  ;;  %v2692_v19 = vadd.f32 %v7856_v49, %v2669_v2  ;;  %v2645_v16 = vadd.f32 %v6770_v32, %v2548_v3  ;;  %v2636_v26 = vpop.f32.mrf.mxu0  ;;  %v7958_v47 = vld [vmem:[#allocation5 + $0x128] sm:$0xff]  }
 0x1c0   :  { %3247 = vst [vmem:[#allocation4 + $0x10c] sm:$0xf] %v6122_v50  ;;  %3535 = vst [vmem:[#allocation4 + $0xf4] sm:$0xf] %v6122_v50  ;;  %v6088_v1 = vpack.c.bf16 %v2973_v57, %v2973_v57  ;;  %v7001_v40 = vld [vmem:[#allocation4] ss:$36 sps:$4 sm:$0xff]   ;;  %v6077_v41 = vpack.c.bf16 %v2703_v51, %v2703_v51  ;;  %v2637_v42 = vadd.f32 %v2636_v26, %v7934_v34 }
 0x1c1   :  { %2765 = vst [vmem:[#allocation3 + $0x61] sm:$0xff] %v2699_v55  ;;  %2858 = vst [vmem:[#allocation4 + $0x48] sm:$0xf] %v6053_v62  ;;  %v2708_v48 = vmax.f32 %v2692_v19, 0.0  ;;  %v2690_v50 = vadd.f32 %v7856_v49, %v2667_v38  ;;  %4698 = vmatmul.mubr.bf16.vlgmr.msra.gmra.mxu1 %v7001_v40  ;;  %v7008_v52 = vld [vmem:[#allocation4 + $0x4c] ss:$36 sps:$4 sm:$0xff]   ;;  %v2670_v55 = vmul.f32 %v7847_v29, %v2645_v16 }
 0x1c2   :  { %3050 = vst [vmem:[#allocation4 + $0x50] sm:$0xf] %v6085_v45  ;;  %3145 = vst [vmem:[#allocation4 + $0x30] sm:$0xf] %v6053_v62  ;;  %v2668_v59 = vmul.f32 %v7847_v29, %v2637_v42  ;;  %6596 = vmatpush3.bf16.msra.mxu1 %v7937_v4  ;;  %v7010_v60 = vld [vmem:[#allocation4 + $0x8] ss:$36 sps:$4 sm:$0xff]   ;;  %4705 = vmatprep.mubr.bf16.mxu1 %v7008_v52 }
 0x1c3   :  { %3337 = vst [vmem:[#allocation4 + $0x38] sm:$0xf] %v6085_v45  ;;  %3433 = vst [vmem:[#allocation4 + $0x18] sm:$0xf] %v6053_v62  ;;  %v3071_v58 = vld [vmem:[#allocation3 + $0x80] sm:$0xff]  ;;  %v6082_v17 = vpack.c.bf16 %v2708_v48, %v2708_v48  ;;  %v2706_v21 = vmax.f32 %v2690_v50, 0.0  ;;  %6597 = vmatprep.subr.bf16.mxu1 %v7942_v27  ;;  %v2693_v6 = vadd.f32 %v7856_v49, %v2670_v55 }
 0x1c4   :  { %3625 = vst [vmem:[#allocation4 + $0x20] sm:$0xf] %v6085_v45  ;;  %2958 = vst [vmem:[#allocation4 + $0xdc] sm:$0xf] %v6073_v0  ;;  %v3263_v22 = vld [vmem:[#allocation3 + $0x82] sm:$0xff]  ;;  %v6106_v36 = vpack.c.bf16 %v3071_v58, %v3071_v58  ;;  %v7047_v29 = vld [vmem:[#allocation5 + $0x1f0] sm:$0xff]   ;;  %v2691_v7 = vadd.f32 %v7856_v49, %v2668_v59 }
 0x1c5   :  { %3245 = vst [vmem:[#allocation4 + $0xc4] sm:$0xf] %v6073_v0  ;;  %3533 = vst [vmem:[#allocation4 + $0xac] sm:$0xf] %v6073_v0  ;;  %v6138_v37 = vpack.c.bf16 %v3263_v22, %v3263_v22  ;;  %v7013_v13 = vld [vmem:[#allocation4 + $0x54] ss:$36 sps:$4 sm:$0xff]  }
 0x1c6   :  { %2770 = vst [vmem:[#allocation3 + $0xd1] sm:$0xff] %v2704_v5  ;;  %2863 = vst [vmem:[#allocation4 + $0xfc] sm:$0xf] %v6058_v20  ;;  %v2709_v8 = vmax.f32 %v2693_v6, 0.0  ;;  %v2707_v57 = vmax.f32 %v2691_v7, 0.0  ;;  %6598 = vmatpush3.bf16.msra.mxu1 %v7019_v43  ;;  %v7050_v28 = vld [vmem:[#allocation5 + $0x1b0] sm:$0xff]  }
 0x1c7   :  { %3055 = vst [vmem:[#allocation4 + $0x104] sm:$0xf] %v6090_v31  ;;  %3150 = vst [vmem:[#allocation4 + $0xe4] sm:$0xf] %v6058_v20  ;;  %6599 = vmatprep.subr.bf16.mxu1 %v7948_v53  ;;  %v7017_v22 = vld [vmem:[#allocation4 + $0x94] ss:$36 sps:$4 sm:$0xff]  }
 0x1c8   :  { %3342 = vst [vmem:[#allocation4 + $0xec] sm:$0xf] %v6090_v31  ;;  %3438 = vst [vmem:[#allocation4 + $0xcc] sm:$0xf] %v6058_v20  ;;  %v2782_v11 = vld [vmem:[#allocation3 + $0x60] sm:$0xff]  ;;  %v6080_v20 = vpack.c.bf16 %v2706_v21, %v2706_v21  ;;  %v6130_v4 = vpack.c.bf16 %v2709_v8, %v2709_v8  ;;  %v6081_v58 = vpack.c.bf16 %v2707_v57, %v2707_v57  ;;  %v7057_v2 = vld [vmem:[#allocation5 + $0x1e8] sm:$0xff]  }
 0x1c9   :  { %3630 = vst [vmem:[#allocation4 + $0xd4] sm:$0xf] %v6090_v31  ;;  %2963 = vst [vmem:[#allocation4 + $0x190] sm:$0xf] %v6078_v9  ;;  %v2974_v39 = vld [vmem:[#allocation3 + $0x62] sm:$0xff]  ;;  %v6057_v44 = vpack.c.bf16 %v2782_v11, %v2782_v11  ;;  %v7045_v30 = vld [vmem:[#allocation5 + $0x118] sm:$0xff]  }
 0x1ca   :  { %3250 = vst [vmem:[#allocation4 + $0x178] sm:$0xf] %v6078_v9  ;;  %3538 = vst [vmem:[#allocation4 + $0x160] sm:$0xf] %v6078_v9  ;;  %v6089_v46 = vpack.c.bf16 %v2974_v39, %v2974_v39  ;;  %v7012_v10 = vld [vmem:[#allocation4 + $0xc] ss:$36 sps:$4 sm:$0xff]   ;;  %6600 = vmatpush3.bf16.msra.mxu1 %v7958_v47 }
 0x1cb   :  { %2768 = vst [vmem:[#allocation3 + $0xb1] sm:$0xff] %v2702_v14  ;;  %3628 = vst [vmem:[#allocation4 + $0x8c] sm:$0xf] %v6088_v1  ;;  %4794 = vmatprep.mubr.bf16.mxu0 %v7012_v10  ;;  %v7015_v9 = vld [vmem:[#allocation4 + $0x48] ss:$36 sps:$4 sm:$0xff]   ;;  %v7032_v14 = vld [vmem:[#allocation5 + $0x160] sm:$0xff]  }
 0x1cc   :  { %2861 = vst [vmem:[#allocation4 + $0xb4] sm:$0xf] %v6056_v35  ;;  %3053 = vst [vmem:[#allocation4 + $0xbc] sm:$0xf] %v6088_v1  ;;  %4795 = vmatmul.mubr.bf16.vlgmr.msra.gmra.mxu0 %v7010_v60  ;;  %4706 = vmatmul.mubr.bf16.gmra.mxu1 %v7015_v9  ;;  %v7020_v40 = vld [vmem:[#allocation4 + $0x50] ss:$36 sps:$4 sm:$0xff]  }
 0x1cd   :  { %3148 = vst [vmem:[#allocation4 + $0x9c] sm:$0xf] %v6056_v35  ;;  %3340 = vst [vmem:[#allocation4 + $0xa4] sm:$0xf] %v6088_v1  ;;  %v2787_v23 = vld [vmem:[#allocation3 + $0xd0] sm:$0xff]  ;;  %4802 = vmatprep.mubr.bf16.mxu0 %v7013_v13  ;;  %6660 = vmatpush3.bf16.msra.mxu0 %v7953_v61  ;;  %v7063_v11 = vld [vmem:[#allocation5 + $0x1e0] sm:$0xff]  }
 0x1ce   :  { %3436 = vst [vmem:[#allocation4 + $0x84] sm:$0xf] %v6056_v35  ;;  %2771 = vst [vmem:[#allocation3 + $0xe1] sm:$0xff] %v2705_v15  ;;  %v2979_v54 = vld [vmem:[#allocation3 + $0xd2] sm:$0xff]  ;;  %v6062_v62 = vpack.c.bf16 %v2787_v23, %v2787_v23  ;;  %6661 = vmatprep.subr.bf16.mxu0 %v7047_v29  ;;  %4713 = vmatprep.mubr.bf16.mxu1 %v7017_v22  ;;  %v7025_v53 = vld [vmem:[#allocation4 + $0xdc] ss:$36 sps:$4 sm:$0xff]  }
 0x1cf   :  { %2961 = vst [vmem:[#allocation4 + $0x148] sm:$0xf] %v6076_v25  ;;  %3248 = vst [vmem:[#allocation4 + $0x130] sm:$0xf] %v6076_v25  ;;  %v6094_v45 = vpack.c.bf16 %v2979_v54, %v2979_v54  ;;  %v7035_v25 = vld [vmem:[#allocation5 + $0x120] sm:$0xff]   ;;  %6601 = vmatprep.subr.bf16.mxu1 %v7032_v14  ;;  %v7052_v26 = vld [vmem:[#allocation5 + $0x150] sm:$0xff]  }
 0x1d0   :  { %3151 = vst [vmem:[#allocation4 + $0x108] sm:$0xf] %v6106_v36  ;;  %3343 = vst [vmem:[#allocation4 + $0x110] sm:$0xf] %v6138_v37  ;;  %6602 = vmatpush3.bf16.msra.mxu1 %v7035_v25  ;;  %v7069_v54 = vld [vmem:[#allocation5 + $0x1d8] sm:$0xff]   ;;  %v7055_v55 = vld [vmem:[#allocation5 + $0x110] sm:$0xff]  }
 0x1d1   :  { %3439 = vst [vmem:[#allocation4 + $0xf0] sm:$0xf] %v6106_v36  ;;  %3631 = vst [vmem:[#allocation4 + $0xf8] sm:$0xf] %v6138_v37  ;;  %v7042_v36 = vld [vmem:[#allocation5 + $0x158] sm:$0xff]   ;;  %v7060_v37 = vld [vmem:[#allocation5 + $0x1a8] sm:$0xff]   ;;  %6662 = vmatpush3.bf16.msra.mxu0 %v7050_v28 }
 0x1d2   :  { %2964 = vst [vmem:[#allocation4 + $0x1b4] sm:$0xf] %v6079_v24  ;;  %3251 = vst [vmem:[#allocation4 + $0x19c] sm:$0xf] %v6079_v24  ;;  %v2785_v0 = vld [vmem:[#allocation3 + $0xb0] sm:$0xff]  ;;  %6663 = vmatprep.subr.bf16.mxu0 %v7057_v2  ;;  %6603 = vmatprep.subr.bf16.mxu1 %v7042_v36  ;;  %v7062_v59 = vld [vmem:[#allocation5 + $0x148] sm:$0xff]  }
 0x1d3   :  { %3539 = vst [vmem:[#allocation4 + $0x184] sm:$0xf] %v6079_v24  ;;  %2769 = vst [vmem:[#allocation3 + $0xc1] sm:$0xff] %v2703_v51  ;;  %v2977_v5 = vld [vmem:[#allocation3 + $0xb2] sm:$0xff]  ;;  %v6060_v18 = vpack.c.bf16 %v2785_v0, %v2785_v0  ;;  %v7074_v10 = vld [vmem:[#allocation5 + $0x140] sm:$0xff]  }
 0x1d4   :  { %2962 = vst [vmem:[#allocation4 + $0x16c] sm:$0xf] %v6077_v41  ;;  %3249 = vst [vmem:[#allocation4 + $0x154] sm:$0xf] %v6077_v41  ;;  %v6092_v63 = vpack.c.bf16 %v2977_v5, %v2977_v5  ;;  %4803 = vmatmul.mubr.bf16.gmra.mxu0 %v7020_v40  ;;  %v7023_v39 = vld [vmem:[#allocation4 + $0x90] ss:$36 sps:$4 sm:$0xff]   ;;  %6604 = vmatpush3.bf16.msra.mxu1 %v7045_v30 }
 0x1d5   :  { %3537 = vst [vmem:[#allocation4 + $0x13c] sm:$0xf] %v6077_v41  ;;  %2862 = vst [vmem:[#allocation4 + $0xd8] sm:$0xf] %v6057_v44  ;;  %v2788_v12 = vld [vmem:[#allocation3 + $0xe0] sm:$0xff]  ;;  %6664 = vmatpush3.bf16.msra.mxu0 %v7060_v37  ;;  %4714 = vmatmul.mubr.bf16.gmra.mxu1 %v7023_v39  ;;  %v7072_v60 = vld [vmem:[#allocation5 + $0x198] sm:$0xff]  }
 0x1d6   :  { %3054 = vst [vmem:[#allocation4 + $0xe0] sm:$0xf] %v6089_v46  ;;  %3149 = vst [vmem:[#allocation4 + $0xc0] sm:$0xf] %v6057_v44  ;;  %v2980_v34 = vld [vmem:[#allocation3 + $0xe2] sm:$0xff]  ;;  %v6063_v49 = vpack.c.bf16 %v2788_v12, %v2788_v12  ;;  %6665 = vmatprep.subr.bf16.mxu0 %v7063_v11  ;;  %4721 = vmatprep.mubr.bf16.mxu1 %v7025_v53  ;;  %v7080_v29 = vld [vmem:[#allocation5 + $0x190] sm:$0xff]  }
 0x1d7   :  { %3341 = vst [vmem:[#allocation4 + $0xc8] sm:$0xf] %v6089_v46  ;;  %3437 = vst [vmem:[#allocation4 + $0xa8] sm:$0xf] %v6057_v44  ;;  %v6095_v31 = vpack.c.bf16 %v2980_v34, %v2980_v34  ;;  %v7067_v41 = vld [vmem:[#allocation5 + $0x1a0] sm:$0xff]   ;;  %6605 = vmatprep.subr.bf16.mxu1 %v7052_v26  ;;  %v7082_v5 = vld [vmem:[#allocation5 + $0x1c8] sm:$0xff]  }
 0x1d8   :  { %3629 = vst [vmem:[#allocation4 + $0xb0] sm:$0xf] %v6089_v46  ;;  %2774 = vst [vmem:[#allocation3 + $0x111] sm:$0xff] %v2708_v48  ;;  %v7028_v61 = vld [vmem:[#allocation4 + $0x98] ss:$36 sps:$4 sm:$0xff]   ;;  %6606 = vmatpush3.bf16.msra.mxu1 %v7055_v55  ;;  %v7076_v6 = vld [vmem:[#allocation5 + $0x100] sm:$0xff]  }
 0x1d9   :  { %2867 = vst [vmem:[#allocation4 + $0x18c] sm:$0xf] %v6062_v62  ;;  %3059 = vst [vmem:[#allocation4 + $0x194] sm:$0xf] %v6094_v45  ;;  %6666 = vmatpush3.bf16.msra.mxu0 %v7067_v41  ;;  %6607 = vmatprep.subr.bf16.mxu1 %v7062_v59  ;;  %v7033_v0 = vld [vmem:[#allocation4 + $0x124] ss:$36 sps:$4 sm:$0xff]  }
 0x1da   :  { %3154 = vst [vmem:[#allocation4 + $0x174] sm:$0xf] %v6062_v62  ;;  %3346 = vst [vmem:[#allocation4 + $0x17c] sm:$0xf] %v6094_v45  ;;  %v2786_v35 = vld [vmem:[#allocation3 + $0xc0] sm:$0xff]  ;;  %6667 = vmatprep.subr.bf16.mxu0 %v7069_v54  ;;  %v7088_v7 = vld [vmem:[#allocation5 + $0x238] sm:$0xff]  }
 0x1db   :  { %3442 = vst [vmem:[#allocation4 + $0x15c] sm:$0xf] %v6062_v62  ;;  %3634 = vst [vmem:[#allocation4 + $0x164] sm:$0xf] %v6094_v45  ;;  %v2978_v1 = vld [vmem:[#allocation3 + $0xc2] sm:$0xff]  ;;  %v6061_v15 = vpack.c.bf16 %v2786_v35, %v2786_v35  ;;  %v7075_v62 = vld [vmem:[#allocation5 + $0x1d0] sm:$0xff]  }
 0x1dc   :  { %2967 = vst [vmem:[#allocation4 + $0x220] sm:$0xf] %v6082_v17  ;;  %3254 = vst [vmem:[#allocation4 + $0x208] sm:$0xf] %v6082_v17  ;;  %v6093_v56 = vpack.c.bf16 %v2978_v1, %v2978_v1  ;;  %v7029_v45 = vld [vmem:[#allocation4 + $0xe4] ss:$36 sps:$4 sm:$0xff]  }
 0x1dd   :  { %3542 = vst [vmem:[#allocation4 + $0x1f0] sm:$0xf] %v6082_v17  ;;  %2772 = vst [vmem:[#allocation3 + $0xf1] sm:$0xff] %v2706_v21  ;;  %v7021_v16 = vld [vmem:[#allocation4 + $0x9c] ss:$36 sps:$4 sm:$0xff]   ;;  %v7066_v17 = vld [vmem:[#allocation5 + $0x108] sm:$0xff]   ;;  %6668 = vmatpush3.bf16.msra.mxu0 %v7072_v60 }
 0x1de   :  { %2865 = vst [vmem:[#allocation4 + $0x144] sm:$0xf] %v6060_v18  ;;  %3057 = vst [vmem:[#allocation4 + $0x14c] sm:$0xf] %v6092_v63  ;;  %4810 = vmatprep.mubr.bf16.mxu0 %v7021_v16  ;;  %v7031_v21 = vld [vmem:[#allocation4 + $0xd8] ss:$36 sps:$4 sm:$0xff]   ;;  %6669 = vmatprep.subr.bf16.mxu0 %v7075_v62 }
 0x1df   :  { %3152 = vst [vmem:[#allocation4 + $0x12c] sm:$0xf] %v6060_v18  ;;  %3344 = vst [vmem:[#allocation4 + $0x134] sm:$0xf] %v6092_v63  ;;  %v2791_v33 = vld [vmem:[#allocation3 + $0x110] sm:$0xff]  ;;  %4811 = vmatmul.mubr.bf16.gmra.mxu0 %v7028_v61  ;;  %4722 = vmatmul.mubr.bf16.gmra.mxu1 %v7031_v21  ;;  %v7083_v47 = vld [vmem:[#allocation5 + $0x188] sm:$0xff]  }
 0x1e0   :  { %2965 = vst [vmem:[#allocation4 + $0x1d8] sm:$0xf] %v6080_v20  ;;  %3252 = vst [vmem:[#allocation4 + $0x1c0] sm:$0xf] %v6080_v20  ;;  %v2983_v3 = vld [vmem:[#allocation3 + $0x112] sm:$0xff]  ;;  %v6066_v32 = vpack.c.bf16 %v2791_v33, %v2791_v33  ;;  %4818 = vmatprep.mubr.bf16.mxu0 %v7029_v45  ;;  %4729 = vmatprep.mubr.bf16.mxu1 %v7033_v0  ;;  %v7087_v18 = vld [vmem:[#allocation5 + $0x1c0] sm:$0xff]  }
 0x1e1   :  { %3540 = vst [vmem:[#allocation4 + $0x1a8] sm:$0xf] %v6080_v20  ;;  %2868 = vst [vmem:[#allocation4 + $0x1b0] sm:$0xf] %v6063_v49  ;;  %v6098_v27 = vpack.c.bf16 %v2983_v3, %v2983_v3  ;;  %6608 = vmatpush3.bf16.msra.mxu1 %v7066_v17  ;;  %v7036_v13 = vld [vmem:[#allocation4 + $0xe0] ss:$36 sps:$4 sm:$0xff]   ;;  %6670 = vmatpush3.bf16.msra.mxu0 %v7080_v29 }
 0x1e2   :  { %3060 = vst [vmem:[#allocation4 + $0x1b8] sm:$0xf] %v6095_v31  ;;  %3155 = vst [vmem:[#allocation4 + $0x198] sm:$0xf] %v6063_v49  ;;  %6609 = vmatprep.subr.bf16.mxu1 %v7074_v10  ;;  %6671 = vmatprep.subr.bf16.mxu0 %v7082_v5  ;;  %v7091_v34 = vld [vmem:[#allocation5 + $0x180] sm:$0xff]   ;;  %v7096_v2 = vld [vmem:[#allocation5 + $0x230] sm:$0xff]  }
 0x1e3   :  { %3347 = vst [vmem:[#allocation4 + $0x1a0] sm:$0xf] %v6095_v31  ;;  %3443 = vst [vmem:[#allocation4 + $0x180] sm:$0xf] %v6063_v49  ;;  %v7043_v20 = vld [vmem:[#allocation4 + $0x16c] ss:$36 sps:$4 sm:$0xff]  }
 0x1e4   :  { %3635 = vst [vmem:[#allocation4 + $0x188] sm:$0xf] %v6095_v31  ;;  %2775 = vst [vmem:[#allocation3 + $0x121] sm:$0xff] %v2709_v8  ;;  %v2789_v24 = vld [vmem:[#allocation3 + $0xf0] sm:$0xff]  ;;  %v7086_v22 = vld [vmem:[#allocation4 + $0x1c] ss:$36 sps:$4 sm:$0xff]  }
 0x1e5   :  { %2773 = vst [vmem:[#allocation3 + $0x101] sm:$0xff] %v2707_v57  ;;  %2866 = vst [vmem:[#allocation4 + $0x168] sm:$0xf] %v6061_v15  ;;  %v2981_v51 = vld [vmem:[#allocation3 + $0xf2] sm:$0xff]  ;;  %v6064_v19 = vpack.c.bf16 %v2789_v24, %v2789_v24  ;;  %6610 = vmatpush3.bf16.msra.mxu1 %v7076_v6  ;;  %v7041_v12 = vld [vmem:[#allocation4 + $0x120] ss:$36 sps:$4 sm:$0xff]   ;;  %6672 = vmatpush3.bf16.msra.mxu0 %v7083_v47 }
 0x1e6   :  { %3058 = vst [vmem:[#allocation4 + $0x170] sm:$0xf] %v6093_v56  ;;  %3153 = vst [vmem:[#allocation4 + $0x150] sm:$0xf] %v6061_v15  ;;  %v6096_v38 = vpack.c.bf16 %v2981_v51, %v2981_v51  ;;  %6771 = vmatprep.subr.bf16.mxu1 %v7088_v7  ;;  %6673 = vmatprep.subr.bf16.mxu0 %v7087_v18  ;;  %v7046_v49 = vld [vmem:[#allocation4 + $0x128] ss:$36 sps:$4 sm:$0xff]  }
 0x1e7   :  { %3345 = vst [vmem:[#allocation4 + $0x158] sm:$0xf] %v6093_v56  ;;  %3441 = vst [vmem:[#allocation4 + $0x138] sm:$0xf] %v6061_v15  ;;  %4819 = vmatmul.mubr.bf16.gmra.mxu0 %v7036_v13  ;;  %4730 = vmatmul.mubr.bf16.gmra.mxu1 %v7041_v12  ;;  %v7053_v57 = vld [vmem:[#allocation4 + $0x1b4] ss:$36 sps:$4 sm:$0xff]  }
 0x1e8   :  { %3633 = vst [vmem:[#allocation4 + $0x140] sm:$0xf] %v6093_v56  ;;  %3255 = vst [vmem:[#allocation4 + $0x22c] sm:$0xf] %v6130_v4  ;;  %4737 = vmatprep.mubr.bf16.mxu1 %v7043_v20  ;;  %v7077_v25 = vld [vmem:[#allocation4 + $0x10] ss:$36 sps:$4 sm:$0xff]  }
 0x1e9   :  { %3543 = vst [vmem:[#allocation4 + $0x214] sm:$0xf] %v6130_v4  ;;  %2966 = vst [vmem:[#allocation4 + $0x1fc] sm:$0xf] %v6081_v58  ;;  %6674 = vmatpush3.bf16.msra.mxu0 %v7091_v34  ;;  %v7048_v31 = vld [vmem:[#allocation4 + $0x174] ss:$36 sps:$4 sm:$0xff]  }
 0x1ea   :  { %3253 = vst [vmem:[#allocation4 + $0x1e4] sm:$0xf] %v6081_v58  ;;  %3541 = vst [vmem:[#allocation4 + $0x1cc] sm:$0xf] %v6081_v58  ;;  %v7079_v4 = vld [vmem:[#allocation4 + $0x14] ss:$36 sps:$4 sm:$0xff]  }
 0x1eb   :  { %2871 = vst [vmem:[#allocation4 + $0x21c] sm:$0xf] %v6066_v32  ;;  %3063 = vst [vmem:[#allocation4 + $0x224] sm:$0xf] %v6098_v27  ;;  %v3079_v42 = vld [vmem:[#allocation3 + $0x120] sm:$0xff]  ;;  %v7103_v3 = vld [vmem:[#allocation5 + $0x228] sm:$0xff]  }
 0x1ec   :  { %3158 = vst [vmem:[#allocation4 + $0x204] sm:$0xf] %v6066_v32  ;;  %3350 = vst [vmem:[#allocation4 + $0x20c] sm:$0xf] %v6098_v27  ;;  %v3271_v43 = vld [vmem:[#allocation3 + $0x122] sm:$0xff]  ;;  %v6114_v46 = vpack.c.bf16 %v3079_v42, %v3079_v42  ;;  %v7117_v51 = vld [vmem:[#allocation5 + $0x218] sm:$0xff]  }
 0x1ed   :  { %3446 = vst [vmem:[#allocation4 + $0x1ec] sm:$0xf] %v6066_v32  ;;  %3638 = vst [vmem:[#allocation4 + $0x1f4] sm:$0xf] %v6098_v27  ;;  %v2790_v44 = vld [vmem:[#allocation3 + $0x100] sm:$0xff]  ;;  %v6146_v48 = vpack.c.bf16 %v3271_v43, %v3271_v43  ;;  %v7131_v26 = vld [vmem:[#allocation5 + $0x208] sm:$0xff]  }
 0x1ee   :  { %2869 = vst [vmem:[#allocation4 + $0x1d4] sm:$0xf] %v6064_v19  ;;  %3061 = vst [vmem:[#allocation4 + $0x1dc] sm:$0xf] %v6096_v38  ;;  %v6065_v50 = vpack.c.bf16 %v2790_v44, %v2790_v44  ;;  %v2982_v52 = vld [vmem:[#allocation3 + $0x102] sm:$0xff] }
 0x1ef   :  { %3156 = vst [vmem:[#allocation4 + $0x1bc] sm:$0xf] %v6064_v19  ;;  %3348 = vst [vmem:[#allocation4 + $0x1c4] sm:$0xf] %v6096_v38  ;;  %v6097_v23 = vpack.c.bf16 %v2982_v52, %v2982_v52  ;;  %v7038_v63 = vld [vmem:[#allocation4 + $0x12c] ss:$36 sps:$4 sm:$0xff]  }
 0x1f0   :  { %3444 = vst [vmem:[#allocation4 + $0x1a4] sm:$0xf] %v6064_v19  ;;  %3636 = vst [vmem:[#allocation4 + $0x1ac] sm:$0xf] %v6096_v38  ;;  %4826 = vmatprep.mubr.bf16.mxu0 %v7038_v63  ;;  %v7051_v8 = vld [vmem:[#allocation4 + $0x168] ss:$36 sps:$4 sm:$0xff]  }
 0x1f1   :  { %3159 = vst [vmem:[#allocation4 + $0x228] sm:$0xf] %v6114_v46  ;;  %3351 = vst [vmem:[#allocation4 + $0x230] sm:$0xf] %v6146_v48  ;;  %4827 = vmatmul.mubr.bf16.gmra.mxu0 %v7046_v49  ;;  %4738 = vmatmul.mubr.bf16.gmra.mxu1 %v7051_v8  ;;  %v7056_v9 = vld [vmem:[#allocation4 + $0x170] ss:$36 sps:$4 sm:$0xff]  }
 0x1f2   :  { %3447 = vst [vmem:[#allocation4 + $0x210] sm:$0xf] %v6114_v46  ;;  %3639 = vst [vmem:[#allocation4 + $0x218] sm:$0xf] %v6146_v48  ;;  %4834 = vmatprep.mubr.bf16.mxu0 %v7048_v31  ;;  %4745 = vmatprep.mubr.bf16.mxu1 %v7053_v57  ;;  %v7064_v35 = vld [vmem:[#allocation4 + $0x1fc] ss:$36 sps:$4 sm:$0xff]  }
 0x1f3   :  { %2870 = vst [vmem:[#allocation4 + $0x1f8] sm:$0xf] %v6065_v50  ;;  %3157 = vst [vmem:[#allocation4 + $0x1e0] sm:$0xf] %v6065_v50  ;;  %v7089_v33 = vld [vmem:[#allocation4 + $0x5c] ss:$36 sps:$4 sm:$0xff]  }
 0x1f4   :  { %3445 = vst [vmem:[#allocation4 + $0x1c8] sm:$0xf] %v6065_v50  ;;  %3062 = vst [vmem:[#allocation4 + $0x200] sm:$0xf] %v6097_v23  ;;  %v7084_v32 = vld [vmem:[#allocation4 + $0x18] ss:$36 sps:$4 sm:$0xff]  }
 0x1f5   :  { %3349 = vst [vmem:[#allocation4 + $0x1e8] sm:$0xf] %v6097_v23  ;;  %3637 = vst [vmem:[#allocation4 + $0x1d0] sm:$0xf] %v6097_v23  ;;  %v7061_v28 = vld [vmem:[#allocation4 + $0x1b0] ss:$36 sps:$4 sm:$0xff]  }
 0x1f6   :  { %v7068_v1 = vld [vmem:[#allocation4 + $0x1b8] ss:$36 sps:$4 sm:$0xff]   ;;  %v7094_v27 = vld [vmem:[#allocation4 + $0x64] ss:$36 sps:$4 sm:$0xff]   ;;  %v7101_v30 = vld [vmem:[#allocation4 + $0xac] ss:$36 sps:$4 sm:$0xff]  }
 0x1f7   :  { %v7095_v36 = vld [vmem:[#allocation4 + $0x58] ss:$36 sps:$4 sm:$0xff]   ;;  %v7110_v37 = vld [vmem:[#allocation5 + $0x220] sm:$0xff]   ;;  %v7124_v38 = vld [vmem:[#allocation5 + $0x210] sm:$0xff]  }
 0x1f8   :  { %v7070_v15 = vld [vmem:[#allocation4 + $0x204] ss:$36 sps:$4 sm:$0xff]   ;;  %v7104_v16 = vld [vmem:[#allocation4 + $0xec] ss:$36 sps:$4 sm:$0xff]   ;;  %v7108_v39 = vld [vmem:[#allocation4 + $0xf4] ss:$36 sps:$4 sm:$0xff]  }
 0x1f9   :  { %4835 = vmatmul.mubr.bf16.gmra.mxu0 %v7056_v9  ;;  %4746 = vmatmul.mubr.bf16.gmra.mxu1 %v7061_v28  ;;  %v7097_v24 = vld [vmem:[#allocation4 + $0xa4] ss:$36 sps:$4 sm:$0xff]   ;;  %v7113_v43 = vld [vmem:[#allocation4 + $0x134] ss:$36 sps:$4 sm:$0xff]   ;;  %v7116_v46 = vld [vmem:[#allocation4 + $0x13c] ss:$36 sps:$4 sm:$0xff]  }
 0x1fa   :  { %v7058_v14 = vld [vmem:[#allocation4 + $0x1bc] ss:$36 sps:$4 sm:$0xff]   ;;  %4753 = vmatprep.mubr.bf16.mxu1 %v7064_v35  ;;  %v7099_v11 = vld [vmem:[#allocation4 + $0xa8] ss:$36 sps:$4 sm:$0xff]   ;;  %v7106_v44 = vld [vmem:[#allocation4 + $0xf0] ss:$36 sps:$4 sm:$0xff]  }
 0x1fb   :  { %4842 = vmatprep.mubr.bf16.mxu0 %v7058_v14  ;;  %v7073_v56 = vld [vmem:[#allocation4 + $0x1f8] ss:$36 sps:$4 sm:$0xff]   ;;  %v7081_v58 = vld [vmem:[#allocation4 + $0x200] ss:$36 sps:$4 sm:$0xff]   ;;  %v7109_v41 = vld [vmem:[#allocation4 + $0xe8] ss:$36 sps:$4 sm:$0xff]  }
 0x1fc   :  { %v7092_v40 = vld [vmem:[#allocation4 + $0x60] ss:$36 sps:$4 sm:$0xff]   ;;  %v7111_v48 = vld [vmem:[#allocation4 + $0x130] ss:$36 sps:$4 sm:$0xff]   ;;  %v7114_v52 = vld [vmem:[#allocation4 + $0x138] ss:$36 sps:$4 sm:$0xff]  }
 0x1fd   :  { %v7102_v19 = vld [vmem:[#allocation4 + $0xa0] ss:$36 sps:$4 sm:$0xff]   ;;  %v7118_v23 = vld [vmem:[#allocation4 + $0x178] ss:$36 sps:$4 sm:$0xff]   ;;  %v7130_v59 = vld [vmem:[#allocation4 + $0x1cc] ss:$36 sps:$4 sm:$0xff]  }
 0x1fe   :  { %v7138_v42 = vld [vmem:[#allocation5 + $0x200] sm:$0xff]   ;;  %v7134_v61 = vld [vmem:[#allocation4 + $0x20c] ss:$36 sps:$4 sm:$0xff]   ;;  %v7137_v45 = vld [vmem:[#allocation4 + $0x214] ss:$36 sps:$4 sm:$0xff]  }
 0x1ff   :  { %v7120_v50 = vld [vmem:[#allocation4 + $0x17c] ss:$36 sps:$4 sm:$0xff]   ;;  %v7123_v53 = vld [vmem:[#allocation4 + $0x184] ss:$36 sps:$4 sm:$0xff]   ;;  %v7135_v10 = vld [vmem:[#allocation4 + $0x210] ss:$36 sps:$4 sm:$0xff]  }
 0x200   :  { %v7127_v54 = vld [vmem:[#allocation4 + $0x1c4] ss:$36 sps:$4 sm:$0xff]   ;;  %v7141_v0 = vld [vmem:[#allocation4 + $0xb0] ss:$36 sps:$4 sm:$0xff]   ;;  %v7142_v5 = vld [vmem:[#allocation4 + $0xf8] ss:$36 sps:$4 sm:$0xff]  }
 0x201   :  { %4843 = vmatmul.mubr.bf16.gmra.mxu0 %v7068_v1  ;;  %4754 = vmatmul.mubr.bf16.gmra.mxu1 %v7073_v56  ;;  %v7121_v55 = vld [vmem:[#allocation4 + $0x180] ss:$36 sps:$4 sm:$0xff]   ;;  %v7128_v62 = vld [vmem:[#allocation4 + $0x1c8] ss:$36 sps:$4 sm:$0xff]   ;;  %v7145_v13 = vld [vmem:[#allocation4 + $0x1d0] ss:$36 sps:$4 sm:$0xff]  }
 0x202   :  { %4850 = vmatprep.mubr.bf16.mxu0 %v7070_v15  ;;  %4891 = vmatprep.mubr.bf16.mxu1 %v7079_v4  ;;  %v7125_v60 = vld [vmem:[#allocation4 + $0x1c0] ss:$36 sps:$4 sm:$0xff]   ;;  %v7132_v17 = vld [vmem:[#allocation4 + $0x208] ss:$36 sps:$4 sm:$0xff]   ;;  %v7146_v47 = vld [vmem:[#allocation4 + $0x218] ss:$36 sps:$4 sm:$0xff]  }
 0x203   :  { %v7139_v21 = vld [vmem:[#allocation4 + $0x20] ss:$36 sps:$4 sm:$0xff]   ;;  %v7140_v29 = vld [vmem:[#allocation4 + $0x68] ss:$36 sps:$4 sm:$0xff]  }
 0x204   :  { %v7143_v6 = vld [vmem:[#allocation4 + $0x140] ss:$36 sps:$4 sm:$0xff]  }
 0x209   :  { %4851 = vmatmul.mubr.bf16.gmra.mxu0 %v7081_v58  ;;  %4892 = vmatmul.mubr.bf16.vlgmr.msra.gmra.mxu1 %v7077_v25 }
 0x20a   :  { %4988 = vmatprep.mubr.bf16.mxu0 %v7086_v22  ;;  %4899 = vmatprep.mubr.bf16.mxu1 %v7089_v33 }
 0x20b   :  { %6772 = vmatpush3.bf16.msra.mxu1 %v7088_v7  ;;  %v7144_v7 = vld [vmem:[#allocation4 + $0x188] ss:$36 sps:$4 sm:$0xff]  }
 0x20c   :  { %6773 = vmatprep.subr.bf16.mxu1 %v7096_v2 }
 0x20f   :  { %6774 = vmatpush3.bf16.msra.mxu1 %v7096_v2 }
 0x210   :  { %6775 = vmatprep.subr.bf16.mxu1 %v7103_v3 }
 0x211   :  { %4989 = vmatmul.mubr.bf16.vlgmr.msra.gmra.mxu0 %v7084_v32  ;;  %4900 = vmatmul.mubr.bf16.gmra.mxu1 %v7095_v36 }
 0x212   :  { %4996 = vmatprep.mubr.bf16.mxu0 %v7094_v27  ;;  %4907 = vmatprep.mubr.bf16.mxu1 %v7097_v24 }
 0x213   :  { %6776 = vmatpush3.bf16.msra.mxu1 %v7103_v3 }
 0x214   :  { %6777 = vmatprep.subr.bf16.mxu1 %v7110_v37 }
 0x217   :  { %6778 = vmatpush3.bf16.msra.mxu1 %v7110_v37 }
 0x218   :  { %6779 = vmatprep.subr.bf16.mxu1 %v7117_v51 }
 0x219   :  { %4997 = vmatmul.mubr.bf16.gmra.mxu0 %v7092_v40  ;;  %4908 = vmatmul.mubr.bf16.gmra.mxu1 %v7102_v19 }
 0x21a   :  { %5004 = vmatprep.mubr.bf16.mxu0 %v7101_v30  ;;  %4915 = vmatprep.mubr.bf16.mxu1 %v7104_v16 }
 0x21b   :  { %6780 = vmatpush3.bf16.msra.mxu1 %v7117_v51 }
 0x21c   :  { %6781 = vmatprep.subr.bf16.mxu1 %v7124_v38 }
 0x21f   :  { %6782 = vmatpush3.bf16.msra.mxu1 %v7124_v38 }
 0x220   :  { %6783 = vmatprep.subr.bf16.mxu1 %v7131_v26 }
 0x221   :  { %5005 = vmatmul.mubr.bf16.gmra.mxu0 %v7099_v11  ;;  %4916 = vmatmul.mubr.bf16.gmra.mxu1 %v7109_v41 }
 0x222   :  { %5012 = vmatprep.mubr.bf16.mxu0 %v7108_v39  ;;  %4923 = vmatprep.mubr.bf16.mxu1 %v7113_v43 }
 0x223   :  { %6784 = vmatpush3.bf16.msra.mxu1 %v7131_v26 }
 0x224   :  { %6785 = vmatprep.subr.bf16.mxu1 %v7138_v42 }
 0x227   :  { %6786 = vmatpush3.bf16.msra.mxu1 %v7138_v42 }
 0x229   :  { %5013 = vmatmul.mubr.bf16.gmra.mxu0 %v7106_v44  ;;  %4924 = vmatmul.mubr.bf16.gmra.mxu1 %v7111_v48 }
 0x22a   :  { %5020 = vmatprep.mubr.bf16.mxu0 %v7116_v46  ;;  %4931 = vmatprep.mubr.bf16.mxu1 %v7120_v50 }
 0x231   :  { %5021 = vmatmul.mubr.bf16.gmra.mxu0 %v7114_v52  ;;  %4932 = vmatmul.mubr.bf16.gmra.mxu1 %v7118_v23 }
 0x232   :  { %5028 = vmatprep.mubr.bf16.mxu0 %v7123_v53  ;;  %4939 = vmatprep.mubr.bf16.mxu1 %v7127_v54 }
 0x239   :  { %5029 = vmatmul.mubr.bf16.gmra.mxu0 %v7121_v55  ;;  %4940 = vmatmul.mubr.bf16.gmra.mxu1 %v7125_v60 }
 0x23a   :  { %5036 = vmatprep.mubr.bf16.mxu0 %v7130_v59  ;;  %4947 = vmatprep.mubr.bf16.mxu1 %v7134_v61 }
 0x241   :  { %5037 = vmatmul.mubr.bf16.gmra.mxu0 %v7128_v62  ;;  %4948 = vmatmul.mubr.bf16.gmra.mxu1 %v7132_v17 }
 0x242   :  { %5044 = vmatprep.mubr.bf16.mxu0 %v7137_v45  ;;  %6787 = vmatprep.mubr.bf16.mxu1 %v7139_v21 }
 0x249   :  { %5045 = vmatmul.mubr.bf16.gmra.mxu0 %v7135_v10  ;;  %6788 = vmatmul.mubr.bf16.vlgmr.msra.gmra.mxu1 %v7140_v29 }
 0x24a   :  { %6791 = vmatprep.mubr.bf16.mxu1 %v7141_v0 }
 0x251   :  { %6792 = vmatmul.mubr.bf16.gmra.mxu1 %v7142_v5 }
 0x252   :  { %6795 = vmatprep.mubr.bf16.mxu1 %v7143_v6 }
 0x259   :  { %6796 = vmatmul.mubr.bf16.gmra.mxu1 %v7144_v7 }
 0x25a   :  { %6799 = vmatprep.mubr.bf16.mxu1 %v7145_v13 }
 0x261   :  { %6800 = vmatmul.mubr.bf16.gmra.mxu1 %v7146_v47 }
 0x281   :  { %v6483_v18 = vpop.f32.mrf.mxu1 }
 0x283   :  { %v6484_v63 = vpop.f32.mrf.mxu1 }
 0x284   :  { %v6485_v12 = vadd.f32 %v6484_v63, %v6483_v18 }
 0x285   :  { %v6486_v34 = vpop.f32.mrf.mxu1 }
 0x287   :  { %v6487_v49 = vpop.f32.mrf.mxu1 }
 0x288   :  { %v6488_v31 = vadd.f32 %v6487_v49, %v6486_v34 }
 0x28c   :  { %v6547_v20 = vpop.f32.mrf.mxu0  ;;  %v6489_v9 = vpop.f32.mrf.mxu1 }
 0x28e   :  { %v6548_v8 = vpop.f32.mrf.mxu0  ;;  %v6490_v35 = vpop.f32.mrf.mxu1 }
 0x28f   :  { %v6549_v57 = vadd.f32 %v6548_v8, %v6547_v20  ;;  %v6491_v1 = vadd.f32 %v6490_v35, %v6489_v9 }
 0x290   :  { %v6550_v14 = vpop.f32.mrf.mxu0  ;;  %v6492_v4 = vpop.f32.mrf.mxu1 }
 0x291   :  { %v7963_v28 = vadd.f32 %v6549_v57, %v6485_v12 }
 0x292   :  { %v6551_v15 = vpop.f32.mrf.mxu0  ;;  %v6493_v25 = vpop.f32.mrf.mxu1 }
 0x293   :  { %v6552_v56 = vadd.f32 %v6551_v15, %v6550_v14  ;;  %v6494_v2 = vadd.f32 %v6493_v25, %v6492_v4 }
 0x294   :  { %v6553_v58 = vpop.f32.mrf.mxu0 }
 0x295   :  { %v7965_v22 = vadd.f32 %v6552_v56, %v6488_v31  ;;  %v6495_v32 = vpop.f32.mrf.mxu1 }
 0x296   :  { %v6554_v33 = vpop.f32.mrf.mxu0 }
 0x297   :  { %v6555_v3 = vadd.f32 %v6554_v33, %v6553_v58  ;;  %v6496_v37 = vpop.f32.mrf.mxu1 }
 0x298   :  { %v6556_v27 = vpop.f32.mrf.mxu0  ;;  %v6497_v24 = vadd.f32 %v6496_v37, %v6495_v32 }
 0x299   :  { %v7967_v36 = vadd.f32 %v6555_v3, %v6491_v1  ;;  %v6498_v30 = vpop.f32.mrf.mxu1 }
 0x29a   :  { %v6557_v51 = vpop.f32.mrf.mxu0 }
 0x29b   :  { %v6558_v40 = vadd.f32 %v6557_v51, %v6556_v27  ;;  %v6499_v16 = vpop.f32.mrf.mxu1 }
 0x29c   :  { %v6500_v26 = vadd.f32 %v6499_v16, %v6498_v30 }
 0x29d   :  { %v7969_v38 = vadd.f32 %v6558_v40, %v6494_v2 }
 0x29f   :  { %v6559_v19 = vpop.f32.mrf.mxu0  ;;  %v6501_v41 = vpop.f32.mrf.mxu1 }
 0x2a1   :  { %v6560_v11 = vpop.f32.mrf.mxu0  ;;  %v6502_v44 = vpop.f32.mrf.mxu1 }
 0x2a2   :  { %v6561_v39 = vadd.f32 %v6560_v11, %v6559_v19  ;;  %v6503_v46 = vadd.f32 %v6502_v44, %v6501_v41 }
 0x2a3   :  { %v6562_v42 = vpop.f32.mrf.mxu0  ;;  %v6504_v52 = vpop.f32.mrf.mxu1 }
 0x2a4   :  { %v7971_v43 = vadd.f32 %v6561_v39, %v6497_v24 }
 0x2a5   :  { %v6563_v48 = vpop.f32.mrf.mxu0  ;;  %v6505_v54 = vpop.f32.mrf.mxu1 }
 0x2a6   :  { %v6564_v50 = vadd.f32 %v6563_v48, %v6562_v42  ;;  %v6506_v55 = vadd.f32 %v6505_v54, %v6504_v52 }
 0x2a7   :  { %v6565_v53 = vpop.f32.mrf.mxu0  ;;  %v6507_v61 = vpop.f32.mrf.mxu1 }
 0x2a8   :  { %v7973_v23 = vadd.f32 %v6564_v50, %v6500_v26 }
 0x2a9   :  { %v6566_v59 = vpop.f32.mrf.mxu0  ;;  %v6508_v17 = vpop.f32.mrf.mxu1 }
 0x2aa   :  { %v6567_v60 = vadd.f32 %v6566_v59, %v6565_v53  ;;  %v6509_v21 = vadd.f32 %v6508_v17, %v6507_v61 }
 0x2ab   :  { %v6568_v62 = vpop.f32.mrf.mxu0  ;;  %v6510_v0 = vpop.f32.mrf.mxu1 }
 0x2ac   :  { %v7975_v45 = vadd.f32 %v6567_v60, %v6503_v46 }
 0x2ad   :  { %v6569_v10 = vpop.f32.mrf.mxu0  ;;  %v6511_v7 = vpop.f32.mrf.mxu1 }
 0x2ae   :  { %v6570_v29 = vadd.f32 %v6569_v10, %v6568_v62  ;;  %v6512_v13 = vadd.f32 %v6511_v7, %v6510_v0 }
 0x2b0   :  { %v7977_v6 = vadd.f32 %v6570_v29, %v6506_v55 }
 0x2b1   :  { %v6571_v5 = vpop.f32.mrf.mxu0  ;;  %v6513_v63 = vpop.f32.mrf.mxu1 }
 0x2b3   :  { %v6572_v47 = vpop.f32.mrf.mxu0  ;;  %v6514_v20 = vpop.f32.mrf.mxu1 }
 0x2b4   :  { %v6573_v18 = vadd.f32 %v6572_v47, %v6571_v5  ;;  %v6515_v49 = vadd.f32 %v6514_v20, %v6513_v63 }
 0x2b5   :  { %v6574_v12 = vpop.f32.mrf.mxu0  ;;  %v6516_v57 = vpop.f32.mrf.mxu1 }
 0x2b6   :  { %v7979_v34 = vadd.f32 %v6573_v18, %v6509_v21 }
 0x2b7   :  { %v6575_v31 = vpop.f32.mrf.mxu0  ;;  %v6517_v35 = vpop.f32.mrf.mxu1 }
 0x2b8   :  { %8300 = vst [vmem:[#allocation8_spill] sm:$0xff] %v7979_v34  ;;  %v6576_v8 = vadd.f32 %v6575_v31, %v6574_v12  ;;  %v6518_v1 = vadd.f32 %v6517_v35, %v6516_v57 }
 0x2b9   :  { %v6577_v9 = vpop.f32.mrf.mxu0  ;;  %v6519_v4 = vpop.f32.mrf.mxu1 }
 0x2ba   :  { %v7981_v14 = vadd.f32 %v6576_v8, %v6512_v13 }
 0x2bb   :  { %v6578_v15 = vpop.f32.mrf.mxu0  ;;  %v6520_v2 = vpop.f32.mrf.mxu1 }
 0x2bc   :  { %8301 = vst [vmem:[#allocation18_spill] sm:$0xff] %v7981_v14  ;;  %v6579_v56 = vadd.f32 %v6578_v15, %v6577_v9  ;;  %v6521_v33 = vadd.f32 %v6520_v2, %v6519_v4 }
 0x2bd   :  { %v6580_v58 = vpop.f32.mrf.mxu0  ;;  %v6522_v27 = vpop.f32.mrf.mxu1 }
 0x2be   :  { %v7983_v25 = vadd.f32 %v6579_v56, %v6515_v49 }
 0x2bf   :  { %v6581_v3 = vpop.f32.mrf.mxu0  ;;  %v6523_v51 = vpop.f32.mrf.mxu1 }
 0x2c0   :  { %8302 = vst [vmem:[#allocation9_spill] sm:$0xff] %v7983_v25  ;;  %v6582_v32 = vadd.f32 %v6581_v3, %v6580_v58  ;;  %v6524_v40 = vadd.f32 %v6523_v51, %v6522_v27 }
 0x2c1   :  { %v6583_v37 = vpop.f32.mrf.mxu0  ;;  %v6525_v16 = vpop.f32.mrf.mxu1 }
 0x2c2   :  { %v7985_v24 = vadd.f32 %v6582_v32, %v6518_v1 }
 0x2c3   :  { %v6584_v30 = vpop.f32.mrf.mxu0  ;;  %v6526_v39 = vpop.f32.mrf.mxu1 }
 0x2c4   :  { %8303 = vst [vmem:[#allocation10_spill] sm:$0xff] %v7985_v24  ;;  %v6585_v19 = vadd.f32 %v6584_v30, %v6583_v37  ;;  %v7989_v41 = vadd.f32 %v6526_v39, %v6525_v16 }
 0x2c5   :  { %v6586_v26 = vpop.f32.mrf.mxu0  ;;  %v6528_v46 = vpop.f32.mrf.mxu1 }
 0x2c6   :  { %v7987_v11 = vadd.f32 %v6585_v19, %v6521_v33 }
 0x2c7   :  { %v6587_v42 = vpop.f32.mrf.mxu0  ;;  %v6529_v52 = vpop.f32.mrf.mxu1 }
 0x2c8   :  { %8304 = vst [vmem:[#allocation11_spill] sm:$0xff] %v7987_v11  ;;  %v6588_v44 = vadd.f32 %v6587_v42, %v6586_v26  ;;  %v7995_v53 = vadd.f32 %v6529_v52, %v6528_v46 }
 0x2c9   :  { %v7991_v48 = vpop.f32.mrf.mxu0  ;;  %v6611_v55 = vpop.f32.mrf.mxu1 }
 0x2ca   :  { %v7993_v50 = vadd.f32 %v6588_v44, %v6524_v40 }
 0x2cb   :  { %v7997_v54 = vpop.f32.mrf.mxu0  ;;  %v6612_v60 = vpop.f32.mrf.mxu1 }
 0x2cc   :  { %8305 = vst [vmem:[#allocation12_spill] sm:$0xff] %v7993_v50 }
 0x2cd   :  { %v7999_v59 = vpop.f32.mrf.mxu0  ;;  %v8003_v62 = vpop.f32.mrf.mxu1 }
 0x2cf   :  { %v8001_v61 = vpop.f32.mrf.mxu0  ;;  %v6615_v21 = vpop.f32.mrf.mxu1 }
 0x2d1   :  { %v6675_v17 = vpop.f32.mrf.mxu0  ;;  %v6617_v29 = vpop.f32.mrf.mxu1 }
 0x2d3   :  { %v6676_v10 = vpop.f32.mrf.mxu0  ;;  %v6618_v5 = vpop.f32.mrf.mxu1 }
 0x2d4   :  { %v6619_v25 = vadd.f32 %v6618_v5, %v6617_v29  ;;  %v6616_v29 = vadd.f32 %v6615_v21, %v8003_v62  ;;  %v8110_v21 = vld [vmem:[%s8254_s6] ss:$0 sm:$0xff] }
 0x2d5   :  { %v8005_v0 = vpop.f32.mrf.mxu0  ;;  %v6620_v13 = vpop.f32.mrf.mxu1 }
 0x2d7   :  { %v8007_v7 = vpop.f32.mrf.mxu0  ;;  %v6621_v18 = vpop.f32.mrf.mxu1 }
 0x2d9   :  { %v6681_v47 = vpop.f32.mrf.mxu0  ;;  %v8009_v12 = vpop.f32.mrf.mxu1 }
 0x2db   :  { %v6682_v63 = vpop.f32.mrf.mxu0  ;;  %v8011_v49 = vpop.f32.mrf.mxu1 }
 0x2dd   :  { %v6684_v20 = vpop.f32.mrf.mxu0  ;;  %v8013_v8 = vpop.f32.mrf.mxu1 }
 0x2df   :  { %v6685_v31 = vpop.f32.mrf.mxu0  ;;  %v8017_v9 = vpop.f32.mrf.mxu1 }
 0x2e0   :  { %v6686_v5 = vadd.f32 %v6685_v31, %v6684_v20 }
 0x2e1   :  { %v8015_v57 = vpop.f32.mrf.mxu0  ;;  %v6629_v1 = vpop.f32.mrf.mxu1 }
 0x2e3   :  { %v8019_v35 = vpop.f32.mrf.mxu0  ;;  %v6630_v56 = vpop.f32.mrf.mxu1 }
 0x2e5   :  { %v8021_v15 = vpop.f32.mrf.mxu0  ;;  %v8025_v58 = vpop.f32.mrf.mxu1 }
 0x2e7   :  { %v8023_v4 = vpop.f32.mrf.mxu0  ;;  %v8027_v33 = vpop.f32.mrf.mxu1 }
 0x2e9   :  { %v6693_v2 = vpop.f32.mrf.mxu0  ;;  %v8029_v32 = vpop.f32.mrf.mxu1 }
 0x2eb   :  { %v6694_v3 = vpop.f32.mrf.mxu0  ;;  %v8033_v37 = vpop.f32.mrf.mxu1 }
 0x2ed   :  { %v8031_v27 = vpop.f32.mrf.mxu0  ;;  %v8037_v40 = vpop.f32.mrf.mxu1 }
 0x2ee   :  { %8306 = vst [vmem:[#allocation20_spill] sm:$0xff] %v8037_v40 }
 0x2ef   :  { %v8035_v51 = vpop.f32.mrf.mxu0  ;;  %v8041_v19 = vpop.f32.mrf.mxu1 }
 0x2f0   :  { %8308 = vst [vmem:[#allocation13_spill] sm:$0xff] %v8041_v19 }
 0x2f1   :  { %v8039_v30 = vpop.f32.mrf.mxu0  ;;  %v8045_v26 = vpop.f32.mrf.mxu1 }
 0x2f2   :  { %8307 = vst [vmem:[#allocation22_spill] sm:$0xff] %v8039_v30  ;;  %v6683_v30 = vadd.f32 %v6682_v63, %v6681_v47  ;;  %v6594_v47 = vadd.f32 %v8001_v61, %v7999_v59  ;;  %v6625_v59 = vadd.f32 %v8011_v49, %v8009_v12  ;;  %v6695_v61 = vadd.f32 %v6694_v3, %v6693_v2 }
 0x2f3   :  { %v8043_v16 = vpop.f32.mrf.mxu0  ;;  %v8049_v42 = vpop.f32.mrf.mxu1  ;;  %v6634_v12 = vadd.f32 %v8027_v33, %v8025_v58 }
 0x2f4   :  { %8309 = vst [vmem:[#allocation19_spill] sm:$0xff] %v8043_v16  ;;  %v6613_v16 = vadd.f32 %v6612_v60, %v6611_v55 }
 0x2f5   :  { %v8047_v39 = vpop.f32.mrf.mxu0  ;;  %v8053_v46 = vpop.f32.mrf.mxu1 }
 0x2f6   :  { %8310 = vst [vmem:[#allocation21_spill] sm:$0xff] %v8047_v39  ;;  %8312 = vst [vmem:[#allocation27_spill] sm:$0xff] %v8053_v46 }
 0x2f7   :  { %v8051_v44 = vpop.f32.mrf.mxu0  ;;  %v8057_v50 = vpop.f32.mrf.mxu1 }
 0x2f8   :  { %8311 = vst [vmem:[#allocation25_spill] sm:$0xff] %v8051_v44  ;;  %8313 = vst [vmem:[#allocation14_spill] sm:$0xff] %v8057_v50 }
 0x2f9   :  { %v8055_v52 = vpop.f32.mrf.mxu0  ;;  %v8061_v14 = vpop.f32.mrf.mxu1 }
 0x2fa   :  { %8315 = vst [vmem:[#allocation24_spill] sm:$0xff] %v8061_v14 }
 0x2fb   :  { %v8059_v11 = vpop.f32.mrf.mxu0  ;;  %v8065_v19 = vpop.f32.mrf.mxu1 }
 0x2fc   :  { %8314 = vst [vmem:[#allocation23_spill] sm:$0xff] %v8059_v11  ;;  %8317 = vst [vmem:[#allocation26_spill] sm:$0xff] %v8065_v19  ;;  %v6677_v19 = vadd.f32 %v6676_v10, %v6675_v17  ;;  %v6622_v11 = vadd.f32 %v6621_v18, %v6620_v13  ;;  %v6631_v17 = vadd.f32 %v6630_v56, %v6629_v1 }
 0x2fd   :  { %v8063_v24 = vpop.f32.mrf.mxu0  ;;  %v8069_v39 = vpop.f32.mrf.mxu1  ;;  %v4897_v18 = vadd.f32 %v6616_v29, %v7965_v22  ;;  %v4910_v56 = vadd.f32 %v6625_v59, %v7971_v43  ;;  %v4921_v43 = vadd.f32 %v6634_v12, %v7977_v6  ;;  %v6637_v6 = vadd.f32 %v8033_v37, %v8029_v32  ;;  %v8325_v32 = vld [vmem:[#allocation9_spill] sm:$0xff] }
 0x2fe   :  { %8316 = vst [vmem:[#allocation15_spill] sm:$0xff] %v8063_v24  ;;  %8319 = vst [vmem:[#allocation16_spill] sm:$0xff] %v8069_v39  ;;  %v4918_v63 = vadd.f32 %v6631_v17, %v7975_v45  ;;  %v8330_v12 = vld [vmem:[#allocation13_spill] sm:$0xff] }
 0x2ff   :  { %v8067_v40 = vpop.f32.mrf.mxu0  ;;  %v8071_v34 = vpop.f32.mrf.mxu1 }
 0x300   :  { %8318 = vst [vmem:[#allocation29_spill] sm:$0xff] %v8067_v40  ;;  %8320 = vst [vmem:[#allocation28_spill] sm:$0xff] %v8071_v34  ;;  %v4902_v40 = vadd.f32 %v6619_v25, %v7967_v36  ;;  %v6591_v34 = vadd.f32 %v7997_v54, %v7991_v48  ;;  %v8097_v36 = vld [vmem:[%s8253_s5] ss:$0 sm:$0xff]  ;;  %v6680_v25 = vadd.f32 %v8007_v7, %v8005_v0 }
 0x301   :  { %v8073_v44 = vpop.f32.mrf.mxu0  ;;  %v8075_v46 = vpop.f32.mrf.mxu1  ;;  %v5015_v45 = vadd.f32 %v6695_v61, %v4918_v63  ;;  %v8329_v63 = vld [vmem:[#allocation20_spill] sm:$0xff] }
 0x302   :  { %8321 = vst [vmem:[#allocation17_spill] sm:$0xff] %v8073_v44  ;;  %v4894_v44 = vadd.f32 %v6613_v16, %v7963_v28  ;;  %v4999_v60 = vadd.f32 %v6683_v30, %v4902_v40  ;;  %v4905_v28 = vadd.f32 %v6622_v11, %v7969_v38  ;;  %v8103_v62 = vadd.f32 %v6591_v34, %v7989_v41 }
 0x303   :  { %v8077_v50 = vpop.f32.mrf.mxu1  ;;  %v8079_v14 = vpop.f32.mrf.mxu0  ;;  %v8117_v34 = vadd.f32 %v6594_v47, %v7995_v53  ;;  %v6689_v41 = vadd.f32 %v8019_v35, %v8015_v57  ;;  %v4994_v1 = vadd.f32 %v6680_v25, %v4897_v18  ;;  %v6628_v53 = vadd.f32 %v8017_v9, %v8013_v8  ;;  %v8324_v25 = vld [vmem:[#allocation19_spill] sm:$0xff] }
 0x304   :  { %v4991_v54 = vadd.f32 %v6677_v19, %v4894_v44  ;;  %v5002_v7 = vadd.f32 %v6686_v5, %v4905_v28  ;;  %v6698_v57 = vadd.f32 %v8035_v51, %v8031_v27  ;;  %v6692_v30 = vadd.f32 %v8023_v4, %v8021_v15  ;;  %v8322_v15 = vld [vmem:[#allocation23_spill] sm:$0xff] }
 0x305   :  { %v8081_v24 = vpop.f32.mrf.mxu1  ;;  %v8090_v55 = vpop.f32.mrf.mxu0  ;;  %v6643_v8 = vadd.f32 %v8049_v42, %v8045_v26  ;;  %v5007_v19 = vadd.f32 %v6689_v41, %v4910_v56  ;;  %v4913_v29 = vadd.f32 %v6628_v53, %v7973_v23  ;;  %v6707_v4 = vadd.f32 %v8322_v15, %v8055_v52  ;;  %v8323_v23 = vld [vmem:[#allocation22_spill] sm:$0xff]  ;;  %v8337_v15 = vld [vmem:[#allocation24_spill] sm:$0xff] }
 0x306   :  { %v5018_v42 = vadd.f32 %v6698_v57, %v4921_v43  ;;  %v6701_v28 = vadd.f32 %v8324_v25, %v8323_v23  ;;  %v8327_v52 = vld [vmem:[#allocation14_spill] sm:$0xff] }
 0x307   :  { %v8086_v39 = vpop.f32.mrf.mxu1  ;;  %v8113_v0 = vpop.f32.mrf.mxu0  ;;  %v4934_v37 = vadd.f32 %v6643_v8, %v8325_v32  ;;  %v5010_v61 = vadd.f32 %v6692_v30, %v4913_v29  ;;  %v8335_v30 = vld [vmem:[#allocation10_spill] sm:$0xff]  ;;  %v6655_v8 = vadd.f32 %v8077_v50, %v8075_v46 }
 0x308   :  { %v8336_v29 = vld [vmem:[#allocation18_spill] sm:$0xff] }
 0x309   :  { %v6789_v10 = vpop.f32.mrf.mxu1  ;;  %v6717_v2 = vpop.f32.mrf.mxu0  ;;  %v5031_v56 = vadd.f32 %v6707_v4, %v4934_v37  ;;  %v8338_v4 = vld [vmem:[#allocation26_spill] sm:$0xff]  ;;  %v8339_v25 = vld [vmem:[#allocation17_spill] sm:$0xff]  ;;  %v4950_v32 = vadd.f32 %v6655_v8, %v8103_v62 }
 0x30a   :  { %v5096_v48 = vadd.f32 %v6789_v10, %v4999_v60 }
 0x30b   :  { %v5087_v13 = vpop.f32.mrf.mxu1  ;;  %v6718_v5 = vpop.f32.mrf.mxu0 }
 0x30c   :  { %v5159_v38 = vmul.f32 %v8097_v36, %v5096_v48  ;;  %v5088_v11 = vadd.f32 %v5087_v13, %v4991_v54  ;;  %v8326_v48 = vld [vmem:[#allocation27_spill] sm:$0xff] }
 0x30d   :  { %v6790_v20 = vpop.f32.mrf.mxu1  ;;  %v6646_v54 = vadd.f32 %v8327_v52, %v8326_v48  ;;  %v6720_v53 = vpop.f32.mrf.mxu0 }
 0x30e   :  { %v5182_v22 = vadd.f32 %v8110_v21, %v5159_v38  ;;  %v5157_v49 = vmul.f32 %v8097_v36, %v5088_v11  ;;  %v5099_v31 = vadd.f32 %v6790_v20, %v5002_v7  ;;  %v8328_v7 = vld [vmem:[#allocation8_spill] sm:$0xff]  ;;  %v6640_v20 = vadd.f32 %v8330_v12, %v8329_v63 }
 0x30f   :  { %v5090_v35 = vpop.f32.mrf.mxu1  ;;  %v4926_v41 = vadd.f32 %v6637_v6, %v8328_v7  ;;  %v4937_v43 = vadd.f32 %v6646_v54, %v8335_v30  ;;  %v6721_v46 = vpop.f32.mrf.mxu0  ;;  %v6716_v12 = vadd.f32 %v8113_v0, %v8090_v55 }
 0x310   :  { %v5198_v3 = vmax.f32 %v5182_v22, 0.0  ;;  %v5180_v58 = vadd.f32 %v8110_v21, %v5157_v49  ;;  %v5160_v33 = vmul.f32 %v8097_v36, %v5099_v31  ;;  %v5091_v40 = vadd.f32 %v5090_v35, %v4994_v1  ;;  %v8331_v22 = vld [vmem:[#allocation15_spill] sm:$0xff]  ;;  %v8332_v49 = vld [vmem:[#allocation29_spill] sm:$0xff] }
 0x311   :  { %v6793_v9 = vpop.f32.mrf.mxu1  ;;  %v6710_v31 = vadd.f32 %v8332_v49, %v8331_v22  ;;  %v4929_v6 = vadd.f32 %v6640_v20, %v8336_v29 }
 0x312   :  { %5214 = vst [vmem:[%s8255_s7 + $0x10] sm:$0xff] %v5198_v3  ;;  %v5196_v27 = vmax.f32 %v5180_v58, 0.0  ;;  %v5183_v51 = vadd.f32 %v8110_v21, %v5160_v33  ;;  %v5158_v16 = vmul.f32 %v8097_v36, %v5091_v40  ;;  %v5112_v44 = vadd.f32 %v6793_v9, %v5015_v45  ;;  %v8333_v58 = vld [vmem:[#allocation21_spill] sm:$0xff] }
 0x313   :  { %v5103_v26 = vpop.f32.mrf.mxu1  ;;  %v8334_v33 = vld [vmem:[#allocation25_spill] sm:$0xff]  ;;  %v5034_v50 = vadd.f32 %v6710_v31, %v4937_v43 }
 0x314   :  { %5212 = vst [vmem:[%s8255_s7] sm:$0xff] %v5196_v27  ;;  %v5199_v60 = vmax.f32 %v5183_v51, 0.0  ;;  %v5181_v47 = vadd.f32 %v8110_v21, %v5158_v16  ;;  %v5163_v17 = vmul.f32 %v8097_v36, %v5112_v44  ;;  %v5104_v10 = vadd.f32 %v5103_v26, %v5007_v19 }
 0x315   :  { %v6794_v59 = vpop.f32.mrf.mxu1  ;;  %v6704_v40 = vadd.f32 %v8334_v33, %v8333_v58  ;;  %v5023_v19 = vadd.f32 %v6701_v28, %v4926_v41  ;;  %v6649_v26 = vadd.f32 %v8338_v4, %v8337_v15  ;;  %v6713_v28 = vadd.f32 %v8079_v14, %v8339_v25  ;;  %v8341_v14 = vld [vmem:[#allocation16_spill] sm:$0xff] }
 0x316   :  { %5215 = vst [vmem:[%s8255_s7 + $0x18] sm:$0xff] %v5199_v60  ;;  %v5197_v13 = vmax.f32 %v5181_v47, 0.0  ;;  %v5186_v18 = vadd.f32 %v8110_v21, %v5163_v17  ;;  %v5161_v38 = vmul.f32 %v8097_v36, %v5104_v10  ;;  %v5115_v11 = vadd.f32 %v6794_v59, %v5018_v42 }
 0x317   :  { %v5106_v1 = vpop.f32.mrf.mxu1  ;;  %v6719_v42 = vadd.f32 %v6718_v5, %v6717_v2  ;;  %v6658_v2 = vadd.f32 %v8086_v39, %v8081_v24  ;;  %v5026_v37 = vadd.f32 %v6704_v40, %v4929_v6 }
 0x318   :  { %5213 = vst [vmem:[%s8255_s7 + $0x8] sm:$0xff] %v5197_v13  ;;  %v5202_v57 = vmax.f32 %v5186_v18, 0.0  ;;  %v5184_v35 = vadd.f32 %v8110_v21, %v5161_v38  ;;  %v5164_v45 = vmul.f32 %v8097_v36, %v5115_v11  ;;  %v5107_v3 = vadd.f32 %v5106_v1, %v5010_v61  ;;  %v8340_v61 = vld [vmem:[#allocation11_spill] sm:$0xff]  ;;  %v8342_v18 = vld [vmem:[#allocation28_spill] sm:$0xff] }
 0x319   :  { %v6797_v9 = vpop.f32.mrf.mxu1  ;;  %v4942_v13 = vadd.f32 %v6649_v26, %v8340_v61  ;;  %v6652_v62 = vadd.f32 %v8342_v18, %v8341_v14  ;;  %v6722_v38 = vadd.f32 %v6721_v46, %v6720_v53  ;;  %v5047_v24 = vadd.f32 %v6719_v42, %v4950_v32 }
 0x31a   :  { %5218 = vst [vmem:[%s8255_s7 + $0x30] sm:$0xff] %v5202_v57  ;;  %v5200_v27 = vmax.f32 %v5184_v35, 0.0  ;;  %v5187_v51 = vadd.f32 %v8110_v21, %v5164_v45  ;;  %v5162_v16 = vmul.f32 %v8097_v36, %v5107_v3  ;;  %v5128_v44 = vadd.f32 %v6797_v9, %v5031_v56  ;;  %v8343_v57 = vld [vmem:[#allocation12_spill] sm:$0xff] }
 0x31b   :  { %v5119_v60 = vpop.f32.mrf.mxu1  ;;  %v4953_v20 = vadd.f32 %v6658_v2, %v8117_v34  ;;  %v5039_v49 = vadd.f32 %v6713_v28, %v4942_v13  ;;  %v4945_v35 = vadd.f32 %v6652_v62, %v8343_v57 }
 0x31c   :  { %5216 = vst [vmem:[%s8255_s7 + $0x20] sm:$0xff] %v5200_v27  ;;  %v5203_v47 = vmax.f32 %v5187_v51, 0.0  ;;  %v5185_v17 = vadd.f32 %v8110_v21, %v5162_v16  ;;  %v5167_v10 = vmul.f32 %v8097_v36, %v5128_v44  ;;  %v5120_v23 = vadd.f32 %v5119_v60, %v5023_v19 }
 0x31d   :  { %v6798_v5 = vpop.f32.mrf.mxu1  ;;  %v5050_v3 = vadd.f32 %v6722_v38, %v4953_v20  ;;  %v5042_v40 = vadd.f32 %v6716_v12, %v4945_v35 }
 0x31e   :  { %5219 = vst [vmem:[%s8255_s7 + $0x38] sm:$0xff] %v5203_v47  ;;  %v5201_v48 = vmax.f32 %v5185_v17, 0.0  ;;  %v5190_v52 = vadd.f32 %v8110_v21, %v5167_v10  ;;  %v5165_v54 = vmul.f32 %v8097_v36, %v5120_v23  ;;  %v5131_v59 = vadd.f32 %v6798_v5, %v5034_v50 }
 0x31f   :  { %v5122_v11 = vpop.f32.mrf.mxu1 }
 0x320   :  { %5217 = vst [vmem:[%s8255_s7 + $0x28] sm:$0xff] %v5201_v48  ;;  %v5206_v39 = vmax.f32 %v5190_v52, 0.0  ;;  %v5188_v7 = vadd.f32 %v8110_v21, %v5165_v54  ;;  %v5168_v41 = vmul.f32 %v8097_v36, %v5131_v59  ;;  %v5123_v63 = vadd.f32 %v5122_v11, %v5026_v37 }
 0x321   :  { %v6801_v22 = vpop.f32.mrf.mxu1 }
 0x322   :  { %5222 = vst [vmem:[%s8255_s7 + $0x50] sm:$0xff] %v5206_v39  ;;  %v5204_v31 = vmax.f32 %v5188_v7, 0.0  ;;  %v5191_v1 = vadd.f32 %v8110_v21, %v5168_v41  ;;  %v5166_v56 = vmul.f32 %v8097_v36, %v5123_v63  ;;  %v5144_v53 = vadd.f32 %v6801_v22, %v5047_v24 }
 0x323   :  { %v5135_v45 = vpop.f32.mrf.mxu1 }
 0x324   :  { %5220 = vst [vmem:[%s8255_s7 + $0x40] sm:$0xff] %v5204_v31  ;;  %v5207_v55 = vmax.f32 %v5191_v1, 0.0  ;;  %v5189_v0 = vadd.f32 %v8110_v21, %v5166_v56  ;;  %v5171_v34 = vmul.f32 %v8097_v36, %v5144_v53  ;;  %v5136_v58 = vadd.f32 %v5135_v45, %v5039_v49 }
 0x325   :  { %v6802_v33 = vpop.f32.mrf.mxu1 }
 0x326   :  { %5223 = vst [vmem:[%s8255_s7 + $0x58] sm:$0xff] %v5207_v55  ;;  %v5205_v30 = vmax.f32 %v5189_v0, 0.0  ;;  %v5194_v43 = vadd.f32 %v8110_v21, %v5171_v34  ;;  %v5169_v8 = vmul.f32 %v8097_v36, %v5136_v58  ;;  %v5147_v9 = vadd.f32 %v6802_v33, %v5050_v3 }
 0x327   :  { %v5138_v19 = vpop.f32.mrf.mxu1 }
 0x328   :  { %5221 = vst [vmem:[%s8255_s7 + $0x48] sm:$0xff] %v5205_v30  ;;  %v5210_v27 = vmax.f32 %v5194_v43, 0.0  ;;  %v5192_v51 = vadd.f32 %v8110_v21, %v5169_v8  ;;  %v5172_v16 = vmul.f32 %v8097_v36, %v5147_v9  ;;  %v5139_v44 = vadd.f32 %v5138_v19, %v5042_v40 }
 0x32a   :  { %5226 = vst [vmem:[%s8255_s7 + $0x70] sm:$0xff] %v5210_v27  ;;  %v5208_v29 = vmax.f32 %v5192_v51, 0.0  ;;  %v5195_v6 = vadd.f32 %v8110_v21, %v5172_v16  ;;  %v5170_v15 = vmul.f32 %v8097_v36, %v5139_v44 }
 0x32c   :  { %5224 = vst [vmem:[%s8255_s7 + $0x60] sm:$0xff] %v5208_v29  ;;  %v5211_v4 = vmax.f32 %v5195_v6, 0.0  ;;  %v5193_v26 = vadd.f32 %v8110_v21, %v5170_v15 }
 0x32e   :  { %5227 = vst [vmem:[%s8255_s7 + $0x78] sm:$0xff] %v5211_v4  ;;  %v5209_v42 = vmax.f32 %v5193_v26, 0.0 }
 0x330   :  { %5225 = vst [vmem:[%s8255_s7 + $0x68] sm:$0xff] %v5209_v42 }
 0x331   :  { %5232 = vsyncpa [#allocation6], 1 }

</bundles_post_ra>
